<compile_context>
chip_gen: v7x
topology: tpu7x:2x2x1
jax: 0.10.0
libtpu: 0.0.40
codegen_flags: <defaults>
</compile_context>

<pallas_src>
import functools

import jax
import jax.numpy as jnp
from jax.experimental import pallas as pl
from jax.experimental.pallas import tpu as pltpu

EPS = 1e-5


def _round_up(x, m):
    return (x + m - 1) // m * m


# ---------------------------- fused ClassBlock kernel ----------------------------

def _classblock_kernel(x_ref, w1_ref, s_ref, t_ref, w2_ref, b2_ref, *out_refs,
                       relu, return_f):
    """logits = (maybe_leakyrelu((x @ W1) * scale + shift)) @ W2 + b2.

    Full-K single-shot matmul (W1 is VMEM-resident); BatchNorm1d (eval) and the
    first Linear's bias are folded into scale/shift.  Everything for one M tile
    runs in a single grid step with no accumulator scratch.
    """
    if return_f:
        out_ref, f_ref = out_refs
    else:
        (out_ref,) = out_refs
        f_ref = None

    # bf16 operands (cast in-kernel), f32 accumulation on the MXU.
    x = x_ref[...].astype(jnp.bfloat16)
    h = jnp.dot(x, w1_ref[...], preferred_element_type=jnp.float32)

    h = h * s_ref[...] + t_ref[...]                 # folded BN(eval) + lin1 bias (f32)
    if relu:                                        # optional LeakyReLU(0.1)
        h = jnp.where(h > 0.0, h, 0.1 * h)
    # Dropout(p) is identity in eval mode.

    if f_ref is not None:
        f_ref[...] = h.astype(f_ref.dtype)

    logits = jnp.dot(h.astype(jnp.bfloat16), w2_ref[...],
                     preferred_element_type=jnp.float32) + b2_ref[...]
    out_ref[...] = logits.astype(out_ref.dtype)


# ---------------------------- one-time parameter preparation ----------------------------

def prepare_classblock_params(params):
    """Fold eval-mode BN (+ lin1 bias) and pad/cast weights ONCE (not per forward)."""
    w1, b1 = params['lin1_w'], params['lin1_b']               # (K, Nb), (Nb,)
    bn = params['bn1d']
    w2, b2 = params['lin2_w'], params['lin2_b']               # (Nb, C), (C,)

    K, Nb = w1.shape
    Nb2, C = w2.shape
    assert Nb == Nb2

    s_bn = bn['gamma'] / jnp.sqrt(bn['var'] + EPS)
    scale = s_bn
    shift = (b1 - bn['mean']) * s_bn + bn['beta']

    Kp = _round_up(K, 128)
    Nbp = _round_up(Nb, 128)
    Cp = _round_up(C, 128)                                    # lane-dense output

    return dict(
        w1=jnp.pad(w1, ((0, Kp - K), (0, Nbp - Nb))).astype(jnp.bfloat16),
        w2=jnp.pad(w2, ((0, Nbp - Nb), (0, Cp - C))).astype(jnp.bfloat16),
        scale=jnp.pad(scale, (0, Nbp - Nb)).reshape(1, Nbp).astype(jnp.float32),
        shift=jnp.pad(shift, (0, Nbp - Nb)).reshape(1, Nbp).astype(jnp.float32),
        b2=jnp.pad(b2, (0, Cp - C)).reshape(1, Cp).astype(jnp.float32),
    )


def _pick_tm(M):
    """M tile: multiple of 8; >= 2 tiles when possible so v7x's 2 TCs both get work."""
    if M >= 512:
        return 256
    if M >= 16:
        return _round_up(pl.cdiv(M, 2), 8)
    return _round_up(max(M, 1), 8)


def _vmem_limit_bytes(TM, Kp, Nbp, Cp, return_f):
    est = (2 * TM * Kp * 4            # x tiles (f32, double-buffered)
           + 2 * Kp * Nbp * 2         # W1 (resident; budget 2 buffers)
           + 2 * Nbp * Cp * 2         # W2 (resident)
           + 2 * TM * Cp * 4          # logits output tiles
           + (2 * TM * Nbp * 4 if return_f else 0)
           + 4 * Nbp * 4 + 2 * Cp * 4)                        # scale/shift/b2
    # Explicit so v5e (16 MiB default scoped VMEM) keeps full double-buffering;
    # capped well below v7x's 64 MiB physical VMEM.
    return int(min(max(est * 5 // 4 + (2 << 20), 32 << 20), 56 << 20))


# ---------------------------- forward wrapper ----------------------------

def class_block_forward(prepared, x, *, class_num, num_bottleneck=512,
                        relu=False, return_f=False):
    """x: (B, input_dim) f32 -> logits (B, class_num) f32 (+ features if return_f)."""
    M, K = x.shape
    Kp, Nbp = prepared['w1'].shape
    Nbp2, Cp = prepared['w2'].shape
    assert Nbp == Nbp2 and K <= Kp

    TM = _pick_tm(M)
    Mp = _round_up(M, TM)

    # Only pad (no dtype round trip); bf16 cast happens inside the kernel.
    xp = jnp.pad(x, ((0, Mp - M), (0, Kp - K)))

    in_specs = [
        pl.BlockSpec((TM, Kp), lambda i: (i, 0)),             # x tile (streamed over M)
        pl.BlockSpec((Kp, Nbp), lambda i: (0, 0)),            # W1 (VMEM resident)
        pl.BlockSpec((1, Nbp), lambda i: (0, 0)),             # BN scale
        pl.BlockSpec((1, Nbp), lambda i: (0, 0)),             # BN shift
        pl.BlockSpec((Nbp, Cp), lambda i: (0, 0)),            # W2
        pl.BlockSpec((1, Cp), lambda i: (0, 0)),              # b2
    ]
    out_specs = [pl.BlockSpec((TM, Cp), lambda i: (i, 0))]
    out_shape = [jax.ShapeDtypeStruct((Mp, Cp), jnp.float32)]
    if return_f:
        out_specs.append(pl.BlockSpec((TM, Nbp), lambda i: (i, 0)))
        out_shape.append(jax.ShapeDtypeStruct((Mp, Nbp), jnp.float32))

    outs = pl.pallas_call(
        functools.partial(_classblock_kernel, relu=relu, return_f=return_f),
        out_shape=tuple(out_shape),
        grid=(Mp // TM,),
        in_specs=in_specs,
        out_specs=tuple(out_specs),
        compiler_params=pltpu.CompilerParams(
            dimension_semantics=("parallel",),
            vmem_limit_bytes=_vmem_limit_bytes(TM, Kp, Nbp, Cp, return_f)),
    )(xp, prepared['w1'], prepared['scale'], prepared['shift'],
      prepared['w2'], prepared['b2'])

    logits = outs[0][:M, :class_num]
    if return_f:
        return logits, outs[1][:M, :num_bottleneck]
    return logits


# ---------------------------- pure-JAX reference (f32) ----------------------------

def class_block_reference(params, x, *, relu=False, return_f=False):
    bn = params['bn1d']
    h = x @ params['lin1_w'] + params['lin1_b']
    h = (h - bn['mean']) / jnp.sqrt(bn['var'] + EPS) * bn['gamma'] + bn['beta']
    if relu:
        h = jnp.where(h > 0.0, h, 0.1 * h)
    # Dropout: identity (eval mode).
    logits = h @ params['lin2_w'] + params['lin2_b']
    return (logits, h) if return_f else logits


# ---------------------------- parameter init (mirrors PyTorch init) ----------------------------

def init_classblock_params(key, input_dim, class_num, num_bottleneck=512):
    k = jax.random.split(key, 4)
    # Linear(input_dim, num_bottleneck): kaiming_normal_(mode='fan_out') -> std=sqrt(2/out), bias 0
    w1 = jnp.sqrt(2.0 / num_bottleneck) * jax.random.normal(
        k[0], (input_dim, num_bottleneck), jnp.float32)
    b1 = jnp.zeros((num_bottleneck,), jnp.float32)
    # BatchNorm1d: weight ~ N(1, 0.02), bias 0, running stats (0, 1)
    bn = dict(
        gamma=1.0 + 0.02 * jax.random.normal(k[1], (num_bottleneck,), jnp.float32),
        beta=jnp.zeros((num_bottleneck,), jnp.float32),
        mean=jnp.zeros((num_bottleneck,), jnp.float32),
        var=jnp.ones((num_bottleneck,), jnp.float32),
    )
    # classifier Linear: normal_(std=0.001), bias 0
    w2 = 0.001 * jax.random.normal(k[2], (num_bottleneck, class_num), jnp.float32)
    b2 = jnp.zeros((class_num,), jnp.float32)
    return dict(lin1_w=w1, lin1_b=b1, bn1d=bn, lin2_w=w2, lin2_b=b2)


# ---------------------------- test ----------------------------

if __name__ == "__main__":
    key = jax.random.PRNGKey(0)
    kp, kx = jax.random.split(key)
    B, input_dim, class_num = 2, 3072, 10   # ft_net_middle feeds 2048+1024 concat features
    params = init_classblock_params(kp, input_dim, class_num, num_bottleneck=512)
    x = jax.random.normal(kx, (B, input_dim), jnp.float32)

    prepared = prepare_classblock_params(params)       # one-time fold + pad + bf16 cast

    # Module defaults: relu=False, droprate>0 (identity in eval), return_f=False.
    fwd = jax.jit(functools.partial(class_block_forward,
                                    class_num=class_num, relu=False, return_f=False))
    out = jax.block_until_ready(fwd(prepared, x))
    assert out.shape == (B, class_num), out.shape
    assert bool(jnp.all(jnp.isfinite(out)))
    ref = class_block_reference(params, x)
    err = float(jnp.max(jnp.abs(out - ref)))
    assert err < 5e-2, f"max abs err vs f32 reference: {err}"

    # relu=True / return_f=True variant.
    fwd_f = jax.jit(functools.partial(class_block_forward,
                                      class_num=class_num, relu=True, return_f=True))
    out2, feat = jax.block_until_ready(fwd_f(prepared, x))
    ref2, ref_feat = class_block_reference(params, x, relu=True, return_f=True)
    assert out2.shape == (B, class_num) and feat.shape == (B, 512)
    err2 = float(jnp.max(jnp.abs(out2 - ref2)))
    err_f = float(jnp.max(jnp.abs(feat - ref_feat)))
    assert err2 < 5e-2, f"logits err (relu/return_f): {err2}"
    assert err_f < 5e-1, f"feature err (bf16 matmul vs f32 ref): {err_f}"

    print("KERNEL_OK")
</pallas_src>

<mosaic_0001>
module attributes {stable_mosaic.version = 11 : i64} {
  func.func @_classblock_kernel(%arg0: i32, %arg1: memref<8x3072xf32, #tpu.memory_space<vmem>>, %arg2: memref<3072x512xbf16, #tpu.memory_space<vmem>>, %arg3: memref<1x512xf32, #tpu.memory_space<vmem>>, %arg4: memref<1x512xf32, #tpu.memory_space<vmem>>, %arg5: memref<512x128xbf16, #tpu.memory_space<vmem>>, %arg6: memref<1x128xf32, #tpu.memory_space<vmem>>, %arg7: memref<8x128xf32, #tpu.memory_space<vmem>>) attributes {dimension_semantics = [#tpu.dimension_semantics<parallel>], iteration_bounds = array<i64: 1>, scalar_prefetch = 0 : i64, scratch_operands = 0 : i64, tpu.core_type = #tpu.core_type<tc>, window_params = [{transform_indices = @transform_0, window_bounds = array<i64: 8, 3072>}, {pipeline_mode = #tpu.pipeline_mode<synchronous>, transform_indices = @transform_1, window_bounds = array<i64: 3072, 512>}, {pipeline_mode = #tpu.pipeline_mode<synchronous>, transform_indices = @transform_2, window_bounds = array<i64: 1, 512>}, {pipeline_mode = #tpu.pipeline_mode<synchronous>, transform_indices = @transform_3, window_bounds = array<i64: 1, 512>}, {pipeline_mode = #tpu.pipeline_mode<synchronous>, transform_indices = @transform_4, window_bounds = array<i64: 512, 128>}, {pipeline_mode = #tpu.pipeline_mode<synchronous>, transform_indices = @transform_5, window_bounds = array<i64: 1, 128>}, {transform_indices = @transform_6, window_bounds = array<i64: 8, 128>}]} {
    %c0 = arith.constant 0 : index
    %c0_0 = arith.constant 0 : index
    %0 = vector.load %arg1[%c0, %c0_0] : memref<8x3072xf32, #tpu.memory_space<vmem>>, vector<8x3072xf32>
    %1 = arith.truncf %0 : vector<8x3072xf32> to vector<8x3072xbf16>
    %c0_1 = arith.constant 0 : index
    %c0_2 = arith.constant 0 : index
    %2 = vector.load %arg2[%c0_1, %c0_2] : memref<3072x512xbf16, #tpu.memory_space<vmem>>, vector<3072x512xbf16>
    %cst = arith.constant dense<0.000000e+00> : vector<8x512xf32>
    %3 = tpu.matmul %1, %2, %cst {dimension_numbers = #tpu.dot_dimension_numbers<[1], [0], [0], [1], [0, 0, 1, 1], [], []>} : vector<8x3072xbf16>, vector<3072x512xbf16>, vector<8x512xf32> -> vector<8x512xf32>
    %c0_3 = arith.constant 0 : index
    %c0_4 = arith.constant 0 : index
    %4 = vector.load %arg3[%c0_3, %c0_4] : memref<1x512xf32, #tpu.memory_space<vmem>>, vector<1x512xf32>
    %5 = vector.broadcast %4 : vector<1x512xf32> to vector<8x512xf32>
    %6 = arith.mulf %3, %5 : vector<8x512xf32>
    %c0_5 = arith.constant 0 : index
    %c0_6 = arith.constant 0 : index
    %7 = vector.load %arg4[%c0_5, %c0_6] : memref<1x512xf32, #tpu.memory_space<vmem>>, vector<1x512xf32>
    %8 = vector.broadcast %7 : vector<1x512xf32> to vector<8x512xf32>
    %9 = arith.addf %6, %8 : vector<8x512xf32>
    %10 = arith.truncf %9 : vector<8x512xf32> to vector<8x512xbf16>
    %c0_7 = arith.constant 0 : index
    %c0_8 = arith.constant 0 : index
    %11 = vector.load %arg5[%c0_7, %c0_8] : memref<512x128xbf16, #tpu.memory_space<vmem>>, vector<512x128xbf16>
    %cst_9 = arith.constant dense<0.000000e+00> : vector<8x128xf32>
    %12 = tpu.matmul %10, %11, %cst_9 {dimension_numbers = #tpu.dot_dimension_numbers<[1], [0], [0], [1], [0, 0, 1, 1], [], []>} : vector<8x512xbf16>, vector<512x128xbf16>, vector<8x128xf32> -> vector<8x128xf32>
    %c0_10 = arith.constant 0 : index
    %c0_11 = arith.constant 0 : index
    %13 = vector.load %arg6[%c0_10, %c0_11] : memref<1x128xf32, #tpu.memory_space<vmem>>, vector<1x128xf32>
    %14 = vector.broadcast %13 : vector<1x128xf32> to vector<8x128xf32>
    %15 = arith.addf %12, %14 : vector<8x128xf32>
    %c0_12 = arith.constant 0 : index
    %c0_13 = arith.constant 0 : index
    %16 = vector.load %arg7[%c0_12, %c0_13] : memref<8x128xf32, #tpu.memory_space<vmem>>, vector<8x128xf32>
    tpu.vector_store %arg7[%c0_12, %c0_13], %15 {strides = array<i32>} : memref<8x128xf32, #tpu.memory_space<vmem>>, vector<8x128xf32>,
    return
  }
  func.func @transform_0(%arg0: i32) -> (i32, i32) {
    %c0_i32 = arith.constant 0 : i32
    %c0_i32_0 = arith.constant 0 : i32
    return %arg0, %c0_i32 : i32, i32
  }
  func.func @transform_1(%arg0: i32) -> (i32, i32) {
    %c0_i32 = arith.constant 0 : i32
    %c0_i32_0 = arith.constant 0 : i32
    %c0_i32_1 = arith.constant 0 : i32
    return %c0_i32, %c0_i32_0 : i32, i32
  }
  func.func @transform_2(%arg0: i32) -> (i32, i32) {
    %c0_i32 = arith.constant 0 : i32
    %c0_i32_0 = arith.constant 0 : i32
    %c0_i32_1 = arith.constant 0 : i32
    return %c0_i32, %c0_i32_0 : i32, i32
  }
  func.func @transform_3(%arg0: i32) -> (i32, i32) {
    %c0_i32 = arith.constant 0 : i32
    %c0_i32_0 = arith.constant 0 : i32
    %c0_i32_1 = arith.constant 0 : i32
    return %c0_i32, %c0_i32_0 : i32, i32
  }
  func.func @transform_4(%arg0: i32) -> (i32, i32) {
    %c0_i32 = arith.constant 0 : i32
    %c0_i32_0 = arith.constant 0 : i32
    %c0_i32_1 = arith.constant 0 : i32
    return %c0_i32, %c0_i32_0 : i32, i32
  }
  func.func @transform_5(%arg0: i32) -> (i32, i32) {
    %c0_i32 = arith.constant 0 : i32
    %c0_i32_0 = arith.constant 0 : i32
    %c0_i32_1 = arith.constant 0 : i32
    return %c0_i32, %c0_i32_0 : i32, i32
  }
  func.func @transform_6(%arg0: i32) -> (i32, i32) {
    %c0_i32 = arith.constant 0 : i32
    %c0_i32_0 = arith.constant 0 : i32
    return %arg0, %c0_i32 : i32, i32
  }
}

</mosaic_0001>

<bundles_post_ra>
// kernel: class_block_forward.1
= control target key start
LH: loop header
LB: loop body
LE: loop exit
PB: predicated region body
PF: predicated region fallthrough
CT: control target
= control target key end

     0   :  { %11 = vsyncpa [#allocation3], 0  ;;  %s8561_s0 = inlined_call_operand.vmem [shape: f32[8,3072], index: 0, kind: input, shape index: {}]   ;;  %s8562_s1 = inlined_call_operand.hbm [shape: bf16[3072,512], index: 1, kind: input, shape index: {}]   ;;  %s8563_s2 = inlined_call_operand.hbm [shape: f32[1,512], index: 2, kind: input, shape index: {}]   ;;  %s8564_s3 = inlined_call_operand.hbm [shape: f32[1,512], index: 3, kind: input, shape index: {}]   ;;  %s8565_s4 = inlined_call_operand.hbm [shape: bf16[512,128], index: 4, kind: input, shape index: {}]   ;;  %s8566_s5 = inlined_call_operand.hbm [shape: f32[1,128], index: 5, kind: input, shape index: {}]   ;;  %s8567_s6 = inlined_call_operand.vmem [shape: f32[8,128], index: 6, kind: output, shape index: {}]  }
   0x1   :  { %12 = vsyncpa [#allocation5], 0 }
   0x2   :  { %13 = vsyncpa [#allocation8], 0  ;;  %s8375_s21 = smov [#allocation4]   ;;  %s8376_s23 = smov [#allocation7]  }
   0x3   :  { %s34_s22 = sshll.u32 %s8375_s21, 4  ;;  %s53_s24 = sshll.u32 %s8376_s23, 4  ;;  %s35_s22 = int_to_ptr.vmem [resolvable:$true] %s34_s22  ;;  %s8419_s24 = int_to_ptr.vmem [resolvable:$true] %s53_s24 }
   0x4   :  { %s8259_s27 = scalar_lea.hbm %s8563_s2, 64 }
   0x5   :  { %p8260_p0 = scmp.ne.s32.totalorder %s8563_s2, %s8259_s27  ;;  %p8263_p1 = scmp.lt.u32.totalorder %s8259_s27, %s8563_s2 }
   0x7   :  { %p8265_p2 = pnand %p8263_p1, %p8260_p0 }
   0x9   :  { %8268 = shalt.err (!%p8265_p2)
}
   0xa   :  { %s8269_s8 = scalar_lea.vmem %s35_s22, 64  ;;  %p8274_p4 = scmp.lt.s32.totalorder %s35_s22, %s35_s22 }
   0xb   :  { %p8270_p3 = scmp.ne.s32.totalorder %s35_s22, %s8269_s8  ;;  %p8275_p5 = scmp.lt.s32.totalorder %s8269_s8, %s8269_s8 }
   0xd   :  { %p8276_p6 = por %p8275_p5, %p8274_p4 }
   0xf   :  { %p8277_p7 = pnand %p8276_p6, %p8270_p3 }
  0x11   :  { %8280 = shalt.err (!%p8277_p7)
}
  0x12   :  { %37 = dma.hbm_to_vmem [thread:$0]  %s8563_s2, 64, %s35_s22, [#allocation5]  }
  0x13   :  { %s8281_s13 = scalar_lea.hbm %s8565_s4, 4096 }
  0x14   :  { %p8282_p8 = scmp.ne.s32.totalorder %s8565_s4, %s8281_s13  ;;  %p8285_p9 = scmp.lt.u32.totalorder %s8281_s13, %s8565_s4 }
  0x16   :  { %p8287_p10 = pnand %p8285_p9, %p8282_p8 }
  0x18   :  { %8290 = shalt.err (!%p8287_p10)
}
  0x19   :  { %s8291_s18 = scalar_lea.vmem %s8419_s24, 4096  ;;  %p8296_p12 = scmp.lt.s32.totalorder %s8419_s24, %s8419_s24 }
  0x1a   :  { %p8292_p11 = scmp.ne.s32.totalorder %s8419_s24, %s8291_s18  ;;  %p8297_p13 = scmp.lt.s32.totalorder %s8291_s18, %s8291_s18 }
  0x1c   :  { %p8298_p0 = por %p8297_p13, %p8296_p12 }
  0x1e   :  { %p8299_p1 = pnand %p8298_p0, %p8292_p11 }
  0x20   :  { %8302 = shalt.err (!%p8299_p1)
}
  0x21   :  { %s8377_s2 = smov 64   ;;  %s8378_s19 = smov 4  }
  0x22   :  { %59 = dma.hbm_to_vmem [thread:$0]  %s8565_s4, 4096, %s8419_s24, [#allocation8], %s8377_s2, %s8377_s2, %s8378_s19  }
  0x23   :  { %s8379_s22 = smov [#allocation2]   ;;  %s8303_s27 = scalar_lea.hbm %s8562_s1, 98304 }
  0x24   :  { %s21_s23 = sshll.u32 %s8379_s22, 4  ;;  %p8304_p2 = scmp.ne.s32.totalorder %s8562_s1, %s8303_s27  ;;  %s22_s23 = int_to_ptr.vmem [resolvable:$true] %s21_s23 }
  0x25   :  { %p8307_p3 = scmp.lt.u32.totalorder %s8303_s27, %s8562_s1 }
  0x27   :  { %p8309_p4 = pnand %p8307_p3, %p8304_p2 }
  0x29   :  { %8312 = shalt.err (!%p8309_p4)
}
  0x2a   :  { %s8313_s8 = scalar_lea.vmem %s22_s23, 98304  ;;  %p8318_p6 = scmp.lt.s32.totalorder %s22_s23, %s22_s23 }
  0x2b   :  { %p8314_p5 = scmp.ne.s32.totalorder %s22_s23, %s8313_s8  ;;  %p8319_p7 = scmp.lt.s32.totalorder %s8313_s8, %s8313_s8 }
  0x2d   :  { %p8320_p8 = por %p8319_p7, %p8318_p6 }
  0x2f   :  { %p8321_p9 = pnand %p8320_p8, %p8314_p5 }
  0x31   :  { %8324 = shalt.err (!%p8321_p9)
}
  0x32   :  { %s8380_s4 = smov 256   ;;  %s8381_s24 = smov 16  }
  0x33   :  { %27 = dma.hbm_to_vmem [thread:$0]  %s8562_s1, 98304, %s22_s23, [#allocation3], %s8380_s4, %s8380_s4, %s8381_s24  }
  0x34   :  { %s8382_s11 = smov [#allocation6]   ;;  %s8383_s13 = smov [#allocation9]  }
  0x35   :  { %s44_s12 = sshll.u32 %s8382_s11, 4  ;;  %s66_s14 = sshll.u32 %s8383_s13, 4  ;;  %s45_s12 = int_to_ptr.vmem [resolvable:$true] %s44_s12  ;;  %s67_s14 = int_to_ptr.vmem [resolvable:$true] %s66_s14 }
  0x36   :  { %s8325_s17 = scalar_lea.hbm %s8564_s3, 64 }
  0x37   :  { %p8326_p10 = scmp.ne.s32.totalorder %s8564_s3, %s8325_s17  ;;  %p8329_p11 = scmp.lt.u32.totalorder %s8325_s17, %s8564_s3 }
  0x39   :  { %p8331_p12 = pnand %p8329_p11, %p8326_p10 }
  0x3b   :  { %8334 = shalt.err (!%p8331_p12)
}
  0x3c   :  { %s8335_s1 = scalar_lea.vmem %s45_s12, 64  ;;  %p8340_p0 = scmp.lt.s32.totalorder %s45_s12, %s45_s12 }
  0x3d   :  { %p8336_p13 = scmp.ne.s32.totalorder %s45_s12, %s8335_s1  ;;  %p8341_p1 = scmp.lt.s32.totalorder %s8335_s1, %s8335_s1 }
  0x3f   :  { %p8342_p2 = por %p8341_p1, %p8340_p0 }
  0x41   :  { %p8343_p3 = pnand %p8342_p2, %p8336_p13 }
  0x43   :  { %8346 = shalt.err (!%p8343_p3)
}
  0x44   :  { %47 = dma.hbm_to_vmem [thread:$0]  %s8564_s3, 64, %s45_s12, [#allocation5]  }
  0x45   :  { %s8347_s26 = scalar_lea.hbm %s8566_s5, 16 }
  0x46   :  { %p8348_p4 = scmp.ne.s32.totalorder %s8566_s5, %s8347_s26  ;;  %p8351_p5 = scmp.lt.u32.totalorder %s8347_s26, %s8566_s5 }
  0x48   :  { %p8353_p6 = pnand %p8351_p5, %p8348_p4 }
  0x4a   :  { %8356 = shalt.err (!%p8353_p6)
}
  0x4b   :  { %s8357_s7 = scalar_lea.vmem %s67_s14, 16  ;;  %s8361_s8 = scalar_lea.vmem %s67_s14, 32 }
  0x4c   :  { %p8358_p7 = scmp.ne.s32.totalorder %s67_s14, %s8357_s7  ;;  %p8362_p8 = scmp.lt.s32.totalorder %s67_s14, %s67_s14 }
  0x4d   :  { %p8363_p9 = scmp.lt.s32.totalorder %s8361_s8, %s8357_s7 }
  0x4f   :  { %p8364_p10 = por %p8363_p9, %p8362_p8 }
  0x51   :  { %p8365_p11 = pnand %p8364_p10, %p8358_p7 }
  0x53   :  { %8368 = shalt.err (!%p8365_p11)
}
  0x54   :  { %69 = dma.hbm_to_vmem [thread:$0]  %s8566_s5, 16, %s67_s14, [#allocation8]  }
  0x55   :  { %8369 = dma.done.wait [#allocation3], 98304  }
  0x56   :  { %8370 = vsyncadd [#allocation3], 4294868992 }
  0x57   :  { %8371 = dma.done.wait [#allocation5], 128  }
  0x58   :  { %8372 = vsyncadd [#allocation5], 4294967168 }
  0x59   :  { %8373 = dma.done.wait [#allocation8], 4112  }
  0x5a   :  { %8374 = vsyncadd [#allocation8], 4294963184  ;;  %v7075_v0 = vld [vmem:[#allocation2 + $0x4] ss:$16 sps:$4 sm:$0xff]   ;;  %v7077_v1 = vld [vmem:[#allocation2 + $0xc] ss:$16 sps:$4 sm:$0xff]  }
  0x5b   :  { %4742 = vmatprep.subr.bf16.mxu0 %v7075_v0  ;;  %v7079_v2 = vld [vmem:[#allocation2] ss:$16 sps:$4 sm:$0xff]   ;;  %v7080_v3 = vld [vmem:[#allocation2 + $0x8] ss:$16 sps:$4 sm:$0xff]   ;;  %5234 = vmatprep.subr.bf16.mxu1 %v7077_v1  ;;  %v7081_v4 = vld [vmem:[#allocation2 + $0x24] ss:$16 sps:$4 sm:$0xff]  }
  0x5c   :  { %4743 = vmatpush1.bf16.msra.mxu0 %v7079_v2  ;;  %5235 = vmatpush1.bf16.msra.mxu1 %v7080_v3  ;;  %v7083_v5 = vld [vmem:[#allocation2 + $0x2c] ss:$16 sps:$4 sm:$0xff]   ;;  %v7085_v6 = vld [vmem:[#allocation2 + $0x20] ss:$16 sps:$4 sm:$0xff]   ;;  %v7086_v7 = vld [vmem:[#allocation2 + $0x28] ss:$16 sps:$4 sm:$0xff]  }
  0x5d   :  { %4744 = vmatprep.subr.bf16.mxu0 %v7081_v4  ;;  %5236 = vmatprep.subr.bf16.mxu1 %v7083_v5  ;;  %v7087_v8 = vld [vmem:[#allocation2 + $0x44] ss:$16 sps:$4 sm:$0xff]   ;;  %v7089_v9 = vld [vmem:[#allocation2 + $0x4c] ss:$16 sps:$4 sm:$0xff]   ;;  %v7091_v10 = vld [vmem:[#allocation2 + $0x40] ss:$16 sps:$4 sm:$0xff]  }
  0x5e   :  { %v7092_v11 = vld [vmem:[#allocation2 + $0x48] ss:$16 sps:$4 sm:$0xff]   ;;  %v7093_v12 = vld [vmem:[#allocation2 + $0x64] ss:$16 sps:$4 sm:$0xff]   ;;  %v7095_v13 = vld [vmem:[#allocation2 + $0x6c] ss:$16 sps:$4 sm:$0xff]  }
  0x5f   :  { %v7097_v14 = vld [vmem:[#allocation2 + $0x60] ss:$16 sps:$4 sm:$0xff]   ;;  %v7098_v15 = vld [vmem:[#allocation2 + $0x68] ss:$16 sps:$4 sm:$0xff]   ;;  %v7099_v16 = vld [vmem:[#allocation2 + $0x84] ss:$16 sps:$4 sm:$0xff]  }
  0x60   :  { %4745 = vmatpush1.bf16.msra.mxu0 %v7085_v6  ;;  %5237 = vmatpush1.bf16.msra.mxu1 %v7086_v7  ;;  %v7101_v17 = vld [vmem:[#allocation2 + $0x8c] ss:$16 sps:$4 sm:$0xff]   ;;  %v7103_v18 = vld [vmem:[#allocation2 + $0x80] ss:$16 sps:$4 sm:$0xff]   ;;  %v7104_v19 = vld [vmem:[#allocation2 + $0x88] ss:$16 sps:$4 sm:$0xff]  }
  0x61   :  { %4746 = vmatprep.subr.bf16.mxu0 %v7087_v8  ;;  %5238 = vmatprep.subr.bf16.mxu1 %v7089_v9  ;;  %v7105_v20 = vld [vmem:[#allocation2 + $0xa4] ss:$16 sps:$4 sm:$0xff]   ;;  %v7107_v21 = vld [vmem:[#allocation2 + $0xac] ss:$16 sps:$4 sm:$0xff]   ;;  %v7109_v22 = vld [vmem:[#allocation2 + $0xa0] ss:$16 sps:$4 sm:$0xff]  }
  0x62   :  { %v7110_v23 = vld [vmem:[#allocation2 + $0xa8] ss:$16 sps:$4 sm:$0xff]   ;;  %v7111_v24 = vld [vmem:[#allocation2 + $0xc4] ss:$16 sps:$4 sm:$0xff]   ;;  %v7113_v25 = vld [vmem:[#allocation2 + $0xcc] ss:$16 sps:$4 sm:$0xff]  }
  0x63   :  { %v7115_v26 = vld [vmem:[#allocation2 + $0xc0] ss:$16 sps:$4 sm:$0xff]   ;;  %v7116_v27 = vld [vmem:[#allocation2 + $0xc8] ss:$16 sps:$4 sm:$0xff]   ;;  %v7117_v28 = vld [vmem:[#allocation2 + $0xe4] ss:$16 sps:$4 sm:$0xff]  }
  0x64   :  { %4747 = vmatpush1.bf16.msra.mxu0 %v7091_v10  ;;  %5239 = vmatpush1.bf16.msra.mxu1 %v7092_v11  ;;  %v7119_v29 = vld [vmem:[#allocation2 + $0xec] ss:$16 sps:$4 sm:$0xff]   ;;  %v7121_v30 = vld [vmem:[#allocation2 + $0xe0] ss:$16 sps:$4 sm:$0xff]   ;;  %v7122_v31 = vld [vmem:[#allocation2 + $0xe8] ss:$16 sps:$4 sm:$0xff]  }
  0x65   :  { %4748 = vmatprep.subr.bf16.mxu0 %v7093_v12  ;;  %5240 = vmatprep.subr.bf16.mxu1 %v7095_v13  ;;  %v7123_v32 = vld [vmem:[#allocation2 + $0x104] ss:$16 sps:$4 sm:$0xff]   ;;  %v7125_v33 = vld [vmem:[#allocation2 + $0x10c] ss:$16 sps:$4 sm:$0xff]   ;;  %v7127_v34 = vld [vmem:[#allocation2 + $0x100] ss:$16 sps:$4 sm:$0xff]  }
  0x66   :  { %v7128_v35 = vld [vmem:[#allocation2 + $0x108] ss:$16 sps:$4 sm:$0xff]   ;;  %v7129_v36 = vld [vmem:[#allocation2 + $0x124] ss:$16 sps:$4 sm:$0xff]   ;;  %v7131_v37 = vld [vmem:[#allocation2 + $0x12c] ss:$16 sps:$4 sm:$0xff]  }
  0x67   :  { %v7133_v38 = vld [vmem:[#allocation2 + $0x120] ss:$16 sps:$4 sm:$0xff]   ;;  %v7134_v39 = vld [vmem:[#allocation2 + $0x128] ss:$16 sps:$4 sm:$0xff]   ;;  %v7135_v40 = vld [vmem:[#allocation2 + $0x144] ss:$16 sps:$4 sm:$0xff]  }
  0x68   :  { %4749 = vmatpush1.bf16.msra.mxu0 %v7097_v14  ;;  %5241 = vmatpush1.bf16.msra.mxu1 %v7098_v15  ;;  %v7137_v41 = vld [vmem:[#allocation2 + $0x14c] ss:$16 sps:$4 sm:$0xff]   ;;  %v7139_v42 = vld [vmem:[#allocation2 + $0x140] ss:$16 sps:$4 sm:$0xff]   ;;  %v7140_v43 = vld [vmem:[#allocation2 + $0x148] ss:$16 sps:$4 sm:$0xff]  }
  0x69   :  { %4750 = vmatprep.subr.bf16.mxu0 %v7099_v16  ;;  %5242 = vmatprep.subr.bf16.mxu1 %v7101_v17  ;;  %v7141_v44 = vld [vmem:[#allocation2 + $0x164] ss:$16 sps:$4 sm:$0xff]   ;;  %v7143_v45 = vld [vmem:[#allocation2 + $0x16c] ss:$16 sps:$4 sm:$0xff]   ;;  %v7145_v47 = vld [vmem:[#allocation2 + $0x160] ss:$16 sps:$4 sm:$0xff]  }
  0x6a   :  { %v87_v46 = vld [vmem:[%s8561_s0 + $0x8] sm:$0xff]  ;;  %v7147_v50 = vld [vmem:[#allocation2 + $0x184] ss:$16 sps:$4 sm:$0xff]   ;;  %v7151_v52 = vld [vmem:[#allocation2 + $0x180] ss:$16 sps:$4 sm:$0xff]  }
  0x6b   :  { %v111_v48 = vpack.c.bf16 %v87_v46, %v87_v46  ;;  %v7146_v49 = vld [vmem:[#allocation2 + $0x168] ss:$16 sps:$4 sm:$0xff]   ;;  %v7149_v51 = vld [vmem:[#allocation2 + $0x18c] ss:$16 sps:$4 sm:$0xff]   ;;  %v7153_v54 = vld [vmem:[#allocation2 + $0x1a4] ss:$16 sps:$4 sm:$0xff]  }
  0x6c   :  { %4751 = vmatpush1.bf16.msra.mxu0 %v7103_v18  ;;  %5243 = vmatpush1.bf16.msra.mxu1 %v7104_v19  ;;  %v7152_v53 = vld [vmem:[#allocation2 + $0x188] ss:$16 sps:$4 sm:$0xff]   ;;  %v7155_v55 = vld [vmem:[#allocation2 + $0x1ac] ss:$16 sps:$4 sm:$0xff]   ;;  %v7157_v56 = vld [vmem:[#allocation2 + $0x1a0] ss:$16 sps:$4 sm:$0xff]  }
  0x6d   :  { %4752 = vmatprep.subr.bf16.mxu0 %v7105_v20  ;;  %5244 = vmatprep.subr.bf16.mxu1 %v7107_v21  ;;  %v7158_v57 = vld [vmem:[#allocation2 + $0x1a8] ss:$16 sps:$4 sm:$0xff]   ;;  %v7159_v58 = vld [vmem:[#allocation2 + $0x1c4] ss:$16 sps:$4 sm:$0xff]   ;;  %v7161_v59 = vld [vmem:[#allocation2 + $0x1cc] ss:$16 sps:$4 sm:$0xff]  }
  0x6e   :  { %4774 = vmatprep.mubr.bf16.mxu0 %v111_v48  ;;  %5266 = vmatprep.mubr.bf16.mxu1 %v111_v48  ;;  %v7163_v60 = vld [vmem:[#allocation2 + $0x1c0] ss:$16 sps:$4 sm:$0xff]   ;;  %v7164_v61 = vld [vmem:[#allocation2 + $0x1c8] ss:$16 sps:$4 sm:$0xff]   ;;  %v7165_v62 = vld [vmem:[#allocation2 + $0x1e4] ss:$16 sps:$4 sm:$0xff]  }
  0x6f   :  { %v7167_v63 = vld [vmem:[#allocation2 + $0x1ec] ss:$16 sps:$4 sm:$0xff]   ;;  %v7169_v0 = vld [vmem:[#allocation2 + $0x1e0] ss:$16 sps:$4 sm:$0xff]   ;;  %v7170_v1 = vld [vmem:[#allocation2 + $0x1e8] ss:$16 sps:$4 sm:$0xff]  }
  0x70   :  { %4753 = vmatpush1.bf16.msra.mxu0 %v7109_v22  ;;  %5245 = vmatpush1.bf16.msra.mxu1 %v7110_v23  ;;  %v86_v2 = vld [vmem:[%s8561_s0] sm:$0xff]  ;;  %v7176_v4 = vld [vmem:[#allocation2 + $0x20c] ss:$16 sps:$4 sm:$0xff]   ;;  %v7174_v7 = vld [vmem:[#allocation2 + $0x208] ss:$16 sps:$4 sm:$0xff]  }
  0x71   :  { %4754 = vmatprep.subr.bf16.mxu0 %v7111_v24  ;;  %5246 = vmatprep.subr.bf16.mxu1 %v7113_v25  ;;  %v7173_v3 = vld [vmem:[#allocation2 + $0x204] ss:$16 sps:$4 sm:$0xff]   ;;  %v110_v5 = vpack.c.bf16 %v86_v2, %v86_v2  ;;  %v7171_v6 = vld [vmem:[#allocation2 + $0x200] ss:$16 sps:$4 sm:$0xff]   ;;  %v7182_v9 = vld [vmem:[#allocation2 + $0x22c] ss:$16 sps:$4 sm:$0xff]  }
  0x72   :  { %v7179_v8 = vld [vmem:[#allocation2 + $0x224] ss:$16 sps:$4 sm:$0xff]   ;;  %v7177_v10 = vld [vmem:[#allocation2 + $0x220] ss:$16 sps:$4 sm:$0xff]   ;;  %v7180_v11 = vld [vmem:[#allocation2 + $0x228] ss:$16 sps:$4 sm:$0xff]  }
  0x73   :  { %v7185_v12 = vld [vmem:[#allocation2 + $0x244] ss:$16 sps:$4 sm:$0xff]   ;;  %v7188_v13 = vld [vmem:[#allocation2 + $0x24c] ss:$16 sps:$4 sm:$0xff]   ;;  %v7183_v14 = vld [vmem:[#allocation2 + $0x240] ss:$16 sps:$4 sm:$0xff]  }
  0x74   :  { %4755 = vmatpush1.bf16.msra.mxu0 %v7115_v26  ;;  %5247 = vmatpush1.bf16.msra.mxu1 %v7116_v27  ;;  %v7186_v15 = vld [vmem:[#allocation2 + $0x248] ss:$16 sps:$4 sm:$0xff]   ;;  %v7191_v16 = vld [vmem:[#allocation2 + $0x264] ss:$16 sps:$4 sm:$0xff]   ;;  %v7194_v17 = vld [vmem:[#allocation2 + $0x26c] ss:$16 sps:$4 sm:$0xff]  }
  0x75   :  { %4756 = vmatprep.subr.bf16.mxu0 %v7117_v28  ;;  %5248 = vmatprep.subr.bf16.mxu1 %v7119_v29  ;;  %v7189_v18 = vld [vmem:[#allocation2 + $0x260] ss:$16 sps:$4 sm:$0xff]   ;;  %v7192_v19 = vld [vmem:[#allocation2 + $0x268] ss:$16 sps:$4 sm:$0xff]   ;;  %v7197_v20 = vld [vmem:[#allocation2 + $0x284] ss:$16 sps:$4 sm:$0xff]  }
  0x76   :  { %v7200_v21 = vld [vmem:[#allocation2 + $0x28c] ss:$16 sps:$4 sm:$0xff]   ;;  %v7195_v22 = vld [vmem:[#allocation2 + $0x280] ss:$16 sps:$4 sm:$0xff]   ;;  %v7198_v23 = vld [vmem:[#allocation2 + $0x288] ss:$16 sps:$4 sm:$0xff]  }
  0x77   :  { %v7203_v24 = vld [vmem:[#allocation2 + $0x2a4] ss:$16 sps:$4 sm:$0xff]   ;;  %v7206_v25 = vld [vmem:[#allocation2 + $0x2ac] ss:$16 sps:$4 sm:$0xff]   ;;  %v7201_v26 = vld [vmem:[#allocation2 + $0x2a0] ss:$16 sps:$4 sm:$0xff]  }
  0x78   :  { %4757 = vmatpush1.bf16.msra.mxu0 %v7121_v30  ;;  %5249 = vmatpush1.bf16.msra.mxu1 %v7122_v31  ;;  %v7204_v27 = vld [vmem:[#allocation2 + $0x2a8] ss:$16 sps:$4 sm:$0xff]   ;;  %v7209_v28 = vld [vmem:[#allocation2 + $0x2c4] ss:$16 sps:$4 sm:$0xff]   ;;  %v7212_v29 = vld [vmem:[#allocation2 + $0x2cc] ss:$16 sps:$4 sm:$0xff]  }
  0x79   :  { %4758 = vmatprep.subr.bf16.mxu0 %v7123_v32  ;;  %5250 = vmatprep.subr.bf16.mxu1 %v7125_v33  ;;  %v89_v30 = vld [vmem:[%s8561_s0 + $0x18] sm:$0xff]  ;;  %v7207_v31 = vld [vmem:[#allocation2 + $0x2c0] ss:$16 sps:$4 sm:$0xff]   ;;  %v7233_v46 = vld [vmem:[#allocation2 + $0x344] ss:$16 sps:$4 sm:$0xff]  }
  0x7a   :  { %v113_v32 = vpack.c.bf16 %v89_v30, %v89_v30  ;;  %v7210_v33 = vld [vmem:[#allocation2 + $0x2c8] ss:$16 sps:$4 sm:$0xff]   ;;  %v7231_v48 = vld [vmem:[#allocation2 + $0x340] ss:$16 sps:$4 sm:$0xff]   ;;  %v7263_v2 = vld [vmem:[#allocation2 + $0x3e4] ss:$16 sps:$4 sm:$0xff]  }
  0x7b   :  { %v7299_v30 = vld [vmem:[#allocation2 + $0x4a4] ss:$16 sps:$4 sm:$0xff]  }
  0x7c   :  { %4759 = vmatpush1.bf16.msra.mxu0 %v7127_v34  ;;  %5251 = vmatpush1.bf16.msra.mxu1 %v7128_v35  ;;  %v7215_v34 = vld [vmem:[#allocation2 + $0x2e4] ss:$16 sps:$4 sm:$0xff]   ;;  %v7218_v35 = vld [vmem:[#allocation2 + $0x2ec] ss:$16 sps:$4 sm:$0xff]  }
  0x7d   :  { %4760 = vmatprep.subr.bf16.mxu0 %v7129_v36  ;;  %5252 = vmatprep.subr.bf16.mxu1 %v7131_v37  ;;  %v7213_v36 = vld [vmem:[#allocation2 + $0x2e0] ss:$16 sps:$4 sm:$0xff]   ;;  %v7216_v37 = vld [vmem:[#allocation2 + $0x2e8] ss:$16 sps:$4 sm:$0xff]  }
  0x80   :  { %4761 = vmatpush1.bf16.msra.mxu0 %v7133_v38  ;;  %5253 = vmatpush1.bf16.msra.mxu1 %v7134_v39  ;;  %v7221_v38 = vld [vmem:[#allocation2 + $0x304] ss:$16 sps:$4 sm:$0xff]   ;;  %v7224_v39 = vld [vmem:[#allocation2 + $0x30c] ss:$16 sps:$4 sm:$0xff]  }
  0x81   :  { %4762 = vmatprep.subr.bf16.mxu0 %v7135_v40  ;;  %5254 = vmatprep.subr.bf16.mxu1 %v7137_v41  ;;  %v7219_v40 = vld [vmem:[#allocation2 + $0x300] ss:$16 sps:$4 sm:$0xff]   ;;  %v7222_v41 = vld [vmem:[#allocation2 + $0x308] ss:$16 sps:$4 sm:$0xff]  }
  0x84   :  { %4763 = vmatpush1.bf16.msra.mxu0 %v7139_v42  ;;  %5255 = vmatpush1.bf16.msra.mxu1 %v7140_v43  ;;  %v7227_v42 = vld [vmem:[#allocation2 + $0x324] ss:$16 sps:$4 sm:$0xff]   ;;  %v7230_v43 = vld [vmem:[#allocation2 + $0x32c] ss:$16 sps:$4 sm:$0xff]  }
  0x85   :  { %4764 = vmatprep.subr.bf16.mxu0 %v7141_v44  ;;  %5256 = vmatprep.subr.bf16.mxu1 %v7143_v45  ;;  %v7225_v44 = vld [vmem:[#allocation2 + $0x320] ss:$16 sps:$4 sm:$0xff]   ;;  %v7228_v45 = vld [vmem:[#allocation2 + $0x328] ss:$16 sps:$4 sm:$0xff]  }
  0x88   :  { %4765 = vmatpush1.bf16.msra.mxu0 %v7145_v47  ;;  %5257 = vmatpush1.bf16.msra.mxu1 %v7146_v49  ;;  %v7236_v47 = vld [vmem:[#allocation2 + $0x34c] ss:$16 sps:$4 sm:$0xff]   ;;  %v7234_v49 = vld [vmem:[#allocation2 + $0x348] ss:$16 sps:$4 sm:$0xff]  }
  0x89   :  { %4766 = vmatprep.subr.bf16.mxu0 %v7147_v50  ;;  %5258 = vmatprep.subr.bf16.mxu1 %v7149_v51  ;;  %v7239_v50 = vld [vmem:[#allocation2 + $0x364] ss:$16 sps:$4 sm:$0xff]   ;;  %v7242_v51 = vld [vmem:[#allocation2 + $0x36c] ss:$16 sps:$4 sm:$0xff]  }
  0x8c   :  { %4767 = vmatpush1.bf16.msra.mxu0 %v7151_v52  ;;  %5259 = vmatpush1.bf16.msra.mxu1 %v7152_v53  ;;  %v7237_v52 = vld [vmem:[#allocation2 + $0x360] ss:$16 sps:$4 sm:$0xff]   ;;  %v7240_v53 = vld [vmem:[#allocation2 + $0x368] ss:$16 sps:$4 sm:$0xff]  }
  0x8d   :  { %4768 = vmatprep.subr.bf16.mxu0 %v7153_v54  ;;  %5260 = vmatprep.subr.bf16.mxu1 %v7155_v55  ;;  %v7245_v54 = vld [vmem:[#allocation2 + $0x384] ss:$16 sps:$4 sm:$0xff]   ;;  %v7248_v55 = vld [vmem:[#allocation2 + $0x38c] ss:$16 sps:$4 sm:$0xff]  }
  0x90   :  { %4769 = vmatpush1.bf16.msra.mxu0 %v7157_v56  ;;  %5261 = vmatpush1.bf16.msra.mxu1 %v7158_v57  ;;  %v7243_v56 = vld [vmem:[#allocation2 + $0x380] ss:$16 sps:$4 sm:$0xff]   ;;  %v7246_v57 = vld [vmem:[#allocation2 + $0x388] ss:$16 sps:$4 sm:$0xff]  }
  0x91   :  { %4770 = vmatprep.subr.bf16.mxu0 %v7159_v58  ;;  %5262 = vmatprep.subr.bf16.mxu1 %v7161_v59  ;;  %v7251_v58 = vld [vmem:[#allocation2 + $0x3a4] ss:$16 sps:$4 sm:$0xff]   ;;  %v7254_v59 = vld [vmem:[#allocation2 + $0x3ac] ss:$16 sps:$4 sm:$0xff]  }
  0x94   :  { %4771 = vmatpush1.bf16.msra.mxu0 %v7163_v60  ;;  %5263 = vmatpush1.bf16.msra.mxu1 %v7164_v61  ;;  %v7249_v60 = vld [vmem:[#allocation2 + $0x3a0] ss:$16 sps:$4 sm:$0xff]   ;;  %v7252_v61 = vld [vmem:[#allocation2 + $0x3a8] ss:$16 sps:$4 sm:$0xff]  }
  0x95   :  { %4772 = vmatprep.subr.bf16.mxu0 %v7165_v62  ;;  %5264 = vmatprep.subr.bf16.mxu1 %v7167_v63  ;;  %v7257_v62 = vld [vmem:[#allocation2 + $0x3c4] ss:$16 sps:$4 sm:$0xff]   ;;  %v7260_v63 = vld [vmem:[#allocation2 + $0x3cc] ss:$16 sps:$4 sm:$0xff]  }
  0x98   :  { %4773 = vmatpush1.bf16.msra.mxu0 %v7169_v0  ;;  %5265 = vmatpush1.bf16.msra.mxu1 %v7170_v1  ;;  %v7255_v0 = vld [vmem:[#allocation2 + $0x3c0] ss:$16 sps:$4 sm:$0xff]   ;;  %v7258_v1 = vld [vmem:[#allocation2 + $0x3c8] ss:$16 sps:$4 sm:$0xff]  }
  0x99   :  { %4783 = vmatprep.subr.bf16.mxu0 %v7173_v3  ;;  %5275 = vmatprep.subr.bf16.mxu1 %v7176_v4  ;;  %v7266_v3 = vld [vmem:[#allocation2 + $0x3ec] ss:$16 sps:$4 sm:$0xff]   ;;  %v7261_v4 = vld [vmem:[#allocation2 + $0x3e0] ss:$16 sps:$4 sm:$0xff]  }
  0x9b   :  { %4775 = vmatmul.mubr.bf16.vlgmr.msra.gmra.mrb[0].mxu0 %v110_v5  ;;  %5267 = vmatmul.mubr.bf16.vlgmr.msra.gmra.mrb[0].mxu1 %v110_v5  ;;  %v7264_v5 = vld [vmem:[#allocation2 + $0x3e8] ss:$16 sps:$4 sm:$0xff]  }
  0x9c   :  { %4784 = vmatpush1.bf16.msra.mxu0 %v7171_v6  ;;  %5276 = vmatpush1.bf16.msra.mxu1 %v7174_v7  ;;  %v7269_v6 = vld [vmem:[#allocation2 + $0x404] ss:$16 sps:$4 sm:$0xff]  }
  0x9d   :  { %4785 = vmatprep.subr.bf16.mxu0 %v7179_v8  ;;  %5277 = vmatprep.subr.bf16.mxu1 %v7182_v9  ;;  %v88_v7 = vld [vmem:[%s8561_s0 + $0x10] sm:$0xff]  ;;  %v7272_v8 = vld [vmem:[#allocation2 + $0x40c] ss:$16 sps:$4 sm:$0xff]  }
  0x9e   :  { %4815 = vmatprep.mubr.bf16.mxu0 %v113_v32  ;;  %5307 = vmatprep.mubr.bf16.mxu1 %v113_v32  ;;  %v7267_v9 = vld [vmem:[#allocation2 + $0x400] ss:$16 sps:$4 sm:$0xff]  }
  0x9f   :  { %v7297_v32 = vld [vmem:[#allocation2 + $0x4a0] ss:$16 sps:$4 sm:$0xff]  }
  0xa0   :  { %4786 = vmatpush1.bf16.msra.mxu0 %v7177_v10  ;;  %5278 = vmatpush1.bf16.msra.mxu1 %v7180_v11  ;;  %v7270_v10 = vld [vmem:[#allocation2 + $0x408] ss:$16 sps:$4 sm:$0xff]   ;;  %v112_v11 = vpack.c.bf16 %v88_v7, %v88_v7  ;;  %v7362_v7 = vld [vmem:[#allocation2 + $0x5ec] ss:$16 sps:$4 sm:$0xff]  }
  0xa1   :  { %4787 = vmatprep.subr.bf16.mxu0 %v7185_v12  ;;  %5279 = vmatprep.subr.bf16.mxu1 %v7188_v13  ;;  %v7275_v12 = vld [vmem:[#allocation2 + $0x424] ss:$16 sps:$4 sm:$0xff]   ;;  %v7278_v13 = vld [vmem:[#allocation2 + $0x42c] ss:$16 sps:$4 sm:$0xff]  }
  0xa4   :  { %4788 = vmatpush1.bf16.msra.mxu0 %v7183_v14  ;;  %5280 = vmatpush1.bf16.msra.mxu1 %v7186_v15  ;;  %v91_v14 = vld [vmem:[%s8561_s0 + $0x28] sm:$0xff] }
  0xa5   :  { %4789 = vmatprep.subr.bf16.mxu0 %v7191_v16  ;;  %5281 = vmatprep.subr.bf16.mxu1 %v7194_v17  ;;  %v115_v15 = vpack.c.bf16 %v91_v14, %v91_v14  ;;  %v7273_v16 = vld [vmem:[#allocation2 + $0x420] ss:$16 sps:$4 sm:$0xff]   ;;  %v7276_v17 = vld [vmem:[#allocation2 + $0x428] ss:$16 sps:$4 sm:$0xff]  }
  0xa6   :  { %v7366_v14 = vld [vmem:[#allocation2 + $0x608] ss:$16 sps:$4 sm:$0xff]  }
  0xa8   :  { %4790 = vmatpush1.bf16.msra.mxu0 %v7189_v18  ;;  %5282 = vmatpush1.bf16.msra.mxu1 %v7192_v19  ;;  %v7281_v18 = vld [vmem:[#allocation2 + $0x444] ss:$16 sps:$4 sm:$0xff]   ;;  %v7284_v19 = vld [vmem:[#allocation2 + $0x44c] ss:$16 sps:$4 sm:$0xff]  }
  0xa9   :  { %4791 = vmatprep.subr.bf16.mxu0 %v7197_v20  ;;  %5283 = vmatprep.subr.bf16.mxu1 %v7200_v21  ;;  %v7279_v20 = vld [vmem:[#allocation2 + $0x440] ss:$16 sps:$4 sm:$0xff]   ;;  %v7282_v21 = vld [vmem:[#allocation2 + $0x448] ss:$16 sps:$4 sm:$0xff]  }
  0xac   :  { %4792 = vmatpush1.bf16.msra.mxu0 %v7195_v22  ;;  %5284 = vmatpush1.bf16.msra.mxu1 %v7198_v23  ;;  %v7287_v22 = vld [vmem:[#allocation2 + $0x464] ss:$16 sps:$4 sm:$0xff]   ;;  %v7290_v23 = vld [vmem:[#allocation2 + $0x46c] ss:$16 sps:$4 sm:$0xff]  }
  0xad   :  { %4793 = vmatprep.subr.bf16.mxu0 %v7203_v24  ;;  %5285 = vmatprep.subr.bf16.mxu1 %v7206_v25  ;;  %v7285_v24 = vld [vmem:[#allocation2 + $0x460] ss:$16 sps:$4 sm:$0xff]   ;;  %v7288_v25 = vld [vmem:[#allocation2 + $0x468] ss:$16 sps:$4 sm:$0xff]  }
  0xb0   :  { %4794 = vmatpush1.bf16.msra.mxu0 %v7201_v26  ;;  %5286 = vmatpush1.bf16.msra.mxu1 %v7204_v27  ;;  %v7293_v26 = vld [vmem:[#allocation2 + $0x484] ss:$16 sps:$4 sm:$0xff]   ;;  %v7296_v27 = vld [vmem:[#allocation2 + $0x48c] ss:$16 sps:$4 sm:$0xff]  }
  0xb1   :  { %4795 = vmatprep.subr.bf16.mxu0 %v7209_v28  ;;  %5287 = vmatprep.subr.bf16.mxu1 %v7212_v29  ;;  %v7291_v28 = vld [vmem:[#allocation2 + $0x480] ss:$16 sps:$4 sm:$0xff]   ;;  %v7294_v29 = vld [vmem:[#allocation2 + $0x488] ss:$16 sps:$4 sm:$0xff]  }
  0xb4   :  { %4796 = vmatpush1.bf16.msra.mxu0 %v7207_v31  ;;  %5288 = vmatpush1.bf16.msra.mxu1 %v7210_v33  ;;  %v7302_v31 = vld [vmem:[#allocation2 + $0x4ac] ss:$16 sps:$4 sm:$0xff]   ;;  %v7300_v33 = vld [vmem:[#allocation2 + $0x4a8] ss:$16 sps:$4 sm:$0xff]  }
  0xb5   :  { %4797 = vmatprep.subr.bf16.mxu0 %v7215_v34  ;;  %5289 = vmatprep.subr.bf16.mxu1 %v7218_v35  ;;  %v7305_v34 = vld [vmem:[#allocation2 + $0x4c4] ss:$16 sps:$4 sm:$0xff]   ;;  %v7308_v35 = vld [vmem:[#allocation2 + $0x4cc] ss:$16 sps:$4 sm:$0xff]  }
  0xb8   :  { %4798 = vmatpush1.bf16.msra.mxu0 %v7213_v36  ;;  %5290 = vmatpush1.bf16.msra.mxu1 %v7216_v37  ;;  %v7303_v36 = vld [vmem:[#allocation2 + $0x4c0] ss:$16 sps:$4 sm:$0xff]   ;;  %v7306_v37 = vld [vmem:[#allocation2 + $0x4c8] ss:$16 sps:$4 sm:$0xff]  }
  0xb9   :  { %4799 = vmatprep.subr.bf16.mxu0 %v7221_v38  ;;  %5291 = vmatprep.subr.bf16.mxu1 %v7224_v39  ;;  %v7311_v38 = vld [vmem:[#allocation2 + $0x4e4] ss:$16 sps:$4 sm:$0xff]   ;;  %v7314_v39 = vld [vmem:[#allocation2 + $0x4ec] ss:$16 sps:$4 sm:$0xff]  }
  0xbc   :  { %4800 = vmatpush1.bf16.msra.mxu0 %v7219_v40  ;;  %5292 = vmatpush1.bf16.msra.mxu1 %v7222_v41  ;;  %v7309_v40 = vld [vmem:[#allocation2 + $0x4e0] ss:$16 sps:$4 sm:$0xff]   ;;  %v7312_v41 = vld [vmem:[#allocation2 + $0x4e8] ss:$16 sps:$4 sm:$0xff]  }
  0xbd   :  { %4801 = vmatprep.subr.bf16.mxu0 %v7227_v42  ;;  %5293 = vmatprep.subr.bf16.mxu1 %v7230_v43  ;;  %v7317_v42 = vld [vmem:[#allocation2 + $0x504] ss:$16 sps:$4 sm:$0xff]   ;;  %v7320_v43 = vld [vmem:[#allocation2 + $0x50c] ss:$16 sps:$4 sm:$0xff]  }
  0xc0   :  { %4802 = vmatpush1.bf16.msra.mxu0 %v7225_v44  ;;  %5294 = vmatpush1.bf16.msra.mxu1 %v7228_v45  ;;  %v7315_v44 = vld [vmem:[#allocation2 + $0x500] ss:$16 sps:$4 sm:$0xff]   ;;  %v7318_v45 = vld [vmem:[#allocation2 + $0x508] ss:$16 sps:$4 sm:$0xff]  }
  0xc1   :  { %4803 = vmatprep.subr.bf16.mxu0 %v7233_v46  ;;  %5295 = vmatprep.subr.bf16.mxu1 %v7236_v47  ;;  %v7323_v46 = vld [vmem:[#allocation2 + $0x524] ss:$16 sps:$4 sm:$0xff]   ;;  %v7326_v47 = vld [vmem:[#allocation2 + $0x52c] ss:$16 sps:$4 sm:$0xff]  }
  0xc4   :  { %4804 = vmatpush1.bf16.msra.mxu0 %v7231_v48  ;;  %5296 = vmatpush1.bf16.msra.mxu1 %v7234_v49  ;;  %v7321_v48 = vld [vmem:[#allocation2 + $0x520] ss:$16 sps:$4 sm:$0xff]   ;;  %v7324_v49 = vld [vmem:[#allocation2 + $0x528] ss:$16 sps:$4 sm:$0xff]  }
  0xc5   :  { %4805 = vmatprep.subr.bf16.mxu0 %v7239_v50  ;;  %5297 = vmatprep.subr.bf16.mxu1 %v7242_v51  ;;  %v7329_v50 = vld [vmem:[#allocation2 + $0x544] ss:$16 sps:$4 sm:$0xff]   ;;  %v7332_v51 = vld [vmem:[#allocation2 + $0x54c] ss:$16 sps:$4 sm:$0xff]  }
  0xc8   :  { %4806 = vmatpush1.bf16.msra.mxu0 %v7237_v52  ;;  %5298 = vmatpush1.bf16.msra.mxu1 %v7240_v53  ;;  %v7327_v52 = vld [vmem:[#allocation2 + $0x540] ss:$16 sps:$4 sm:$0xff]   ;;  %v7330_v53 = vld [vmem:[#allocation2 + $0x548] ss:$16 sps:$4 sm:$0xff]  }
  0xc9   :  { %4807 = vmatprep.subr.bf16.mxu0 %v7245_v54  ;;  %5299 = vmatprep.subr.bf16.mxu1 %v7248_v55  ;;  %v7335_v54 = vld [vmem:[#allocation2 + $0x564] ss:$16 sps:$4 sm:$0xff]   ;;  %v7338_v55 = vld [vmem:[#allocation2 + $0x56c] ss:$16 sps:$4 sm:$0xff]  }
  0xcc   :  { %4808 = vmatpush1.bf16.msra.mxu0 %v7243_v56  ;;  %5300 = vmatpush1.bf16.msra.mxu1 %v7246_v57  ;;  %v7333_v56 = vld [vmem:[#allocation2 + $0x560] ss:$16 sps:$4 sm:$0xff]   ;;  %v7336_v57 = vld [vmem:[#allocation2 + $0x568] ss:$16 sps:$4 sm:$0xff]  }
  0xcd   :  { %4809 = vmatprep.subr.bf16.mxu0 %v7251_v58  ;;  %5301 = vmatprep.subr.bf16.mxu1 %v7254_v59  ;;  %v7341_v58 = vld [vmem:[#allocation2 + $0x584] ss:$16 sps:$4 sm:$0xff]   ;;  %v7344_v59 = vld [vmem:[#allocation2 + $0x58c] ss:$16 sps:$4 sm:$0xff]  }
  0xd0   :  { %4810 = vmatpush1.bf16.msra.mxu0 %v7249_v60  ;;  %5302 = vmatpush1.bf16.msra.mxu1 %v7252_v61  ;;  %v7339_v60 = vld [vmem:[#allocation2 + $0x580] ss:$16 sps:$4 sm:$0xff]   ;;  %v7342_v61 = vld [vmem:[#allocation2 + $0x588] ss:$16 sps:$4 sm:$0xff]  }
  0xd1   :  { %4811 = vmatprep.subr.bf16.mxu0 %v7257_v62  ;;  %5303 = vmatprep.subr.bf16.mxu1 %v7260_v63  ;;  %v7347_v62 = vld [vmem:[#allocation2 + $0x5a4] ss:$16 sps:$4 sm:$0xff]   ;;  %v7350_v63 = vld [vmem:[#allocation2 + $0x5ac] ss:$16 sps:$4 sm:$0xff]  }
  0xd4   :  { %4812 = vmatpush1.bf16.msra.mxu0 %v7255_v0  ;;  %5304 = vmatpush1.bf16.msra.mxu1 %v7258_v1  ;;  %v7345_v0 = vld [vmem:[#allocation2 + $0x5a0] ss:$16 sps:$4 sm:$0xff]   ;;  %v7348_v1 = vld [vmem:[#allocation2 + $0x5a8] ss:$16 sps:$4 sm:$0xff]  }
  0xd5   :  { %4813 = vmatprep.subr.bf16.mxu0 %v7263_v2  ;;  %5305 = vmatprep.subr.bf16.mxu1 %v7266_v3  ;;  %v7353_v2 = vld [vmem:[#allocation2 + $0x5c4] ss:$16 sps:$4 sm:$0xff]   ;;  %v7356_v3 = vld [vmem:[#allocation2 + $0x5cc] ss:$16 sps:$4 sm:$0xff]  }
  0xd8   :  { %4814 = vmatpush1.bf16.msra.mxu0 %v7261_v4  ;;  %5306 = vmatpush1.bf16.msra.mxu1 %v7264_v5  ;;  %v7351_v4 = vld [vmem:[#allocation2 + $0x5c0] ss:$16 sps:$4 sm:$0xff]   ;;  %v7354_v5 = vld [vmem:[#allocation2 + $0x5c8] ss:$16 sps:$4 sm:$0xff]  }
  0xd9   :  { %4824 = vmatprep.subr.bf16.mxu0 %v7269_v6  ;;  %5316 = vmatprep.subr.bf16.mxu1 %v7272_v8  ;;  %v7359_v6 = vld [vmem:[#allocation2 + $0x5e4] ss:$16 sps:$4 sm:$0xff]   ;;  %v7357_v8 = vld [vmem:[#allocation2 + $0x5e0] ss:$16 sps:$4 sm:$0xff]  }
  0xdb   :  { %4816 = vmatmul.mubr.bf16.vlgmr.msra.gmra.mrb[0].mxu0 %v112_v11  ;;  %5308 = vmatmul.mubr.bf16.vlgmr.msra.gmra.mrb[0].mxu1 %v112_v11  ;;  %v90_v11 = vld [vmem:[%s8561_s0 + $0x20] sm:$0xff] }
  0xdc   :  { %4825 = vmatpush1.bf16.msra.mxu0 %v7267_v9  ;;  %5317 = vmatpush1.bf16.msra.mxu1 %v7270_v10  ;;  %v7360_v9 = vld [vmem:[#allocation2 + $0x5e8] ss:$16 sps:$4 sm:$0xff]   ;;  %v7365_v10 = vld [vmem:[#allocation2 + $0x604] ss:$16 sps:$4 sm:$0xff]  }
  0xdd   :  { %4826 = vmatprep.subr.bf16.mxu0 %v7275_v12  ;;  %5318 = vmatprep.subr.bf16.mxu1 %v7278_v13  ;;  %v7368_v12 = vld [vmem:[#allocation2 + $0x60c] ss:$16 sps:$4 sm:$0xff]   ;;  %v7363_v13 = vld [vmem:[#allocation2 + $0x600] ss:$16 sps:$4 sm:$0xff]  }
  0xde   :  { %4856 = vmatprep.mubr.bf16.mxu0 %v115_v15  ;;  %5348 = vmatprep.mubr.bf16.mxu1 %v115_v15  ;;  %v114_v15 = vpack.c.bf16 %v90_v11, %v90_v11  ;;  %v7458_v11 = vld [vmem:[#allocation2 + $0x7ec] ss:$16 sps:$4 sm:$0xff]  }
  0xe0   :  { %4827 = vmatpush1.bf16.msra.mxu0 %v7273_v16  ;;  %5319 = vmatpush1.bf16.msra.mxu1 %v7276_v17  ;;  %v93_v16 = vld [vmem:[%s8561_s0 + $0x38] sm:$0xff]  ;;  %v7371_v17 = vld [vmem:[#allocation2 + $0x624] ss:$16 sps:$4 sm:$0xff]  }
  0xe1   :  { %4828 = vmatprep.subr.bf16.mxu0 %v7281_v18  ;;  %5320 = vmatprep.subr.bf16.mxu1 %v7284_v19  ;;  %v7374_v18 = vld [vmem:[#allocation2 + $0x62c] ss:$16 sps:$4 sm:$0xff]   ;;  %v117_v19 = vpack.c.bf16 %v93_v16, %v93_v16 }
  0xe2   :  { %v7464_v16 = vld [vmem:[#allocation2 + $0x80c] ss:$16 sps:$4 sm:$0xff]  }
  0xe4   :  { %4829 = vmatpush1.bf16.msra.mxu0 %v7279_v20  ;;  %5321 = vmatpush1.bf16.msra.mxu1 %v7282_v21  ;;  %v7369_v20 = vld [vmem:[#allocation2 + $0x620] ss:$16 sps:$4 sm:$0xff]   ;;  %v7372_v21 = vld [vmem:[#allocation2 + $0x628] ss:$16 sps:$4 sm:$0xff]  }
  0xe5   :  { %4830 = vmatprep.subr.bf16.mxu0 %v7287_v22  ;;  %5322 = vmatprep.subr.bf16.mxu1 %v7290_v23  ;;  %v7377_v22 = vld [vmem:[#allocation2 + $0x644] ss:$16 sps:$4 sm:$0xff]   ;;  %v7380_v23 = vld [vmem:[#allocation2 + $0x64c] ss:$16 sps:$4 sm:$0xff]  }
  0xe8   :  { %4831 = vmatpush1.bf16.msra.mxu0 %v7285_v24  ;;  %5323 = vmatpush1.bf16.msra.mxu1 %v7288_v25  ;;  %v7375_v24 = vld [vmem:[#allocation2 + $0x640] ss:$16 sps:$4 sm:$0xff]   ;;  %v7378_v25 = vld [vmem:[#allocation2 + $0x648] ss:$16 sps:$4 sm:$0xff]  }
  0xe9   :  { %4832 = vmatprep.subr.bf16.mxu0 %v7293_v26  ;;  %5324 = vmatprep.subr.bf16.mxu1 %v7296_v27  ;;  %v7383_v26 = vld [vmem:[#allocation2 + $0x664] ss:$16 sps:$4 sm:$0xff]   ;;  %v7386_v27 = vld [vmem:[#allocation2 + $0x66c] ss:$16 sps:$4 sm:$0xff]  }
  0xec   :  { %4833 = vmatpush1.bf16.msra.mxu0 %v7291_v28  ;;  %5325 = vmatpush1.bf16.msra.mxu1 %v7294_v29  ;;  %v7381_v28 = vld [vmem:[#allocation2 + $0x660] ss:$16 sps:$4 sm:$0xff]   ;;  %v7384_v29 = vld [vmem:[#allocation2 + $0x668] ss:$16 sps:$4 sm:$0xff]  }
  0xed   :  { %4834 = vmatprep.subr.bf16.mxu0 %v7299_v30  ;;  %5326 = vmatprep.subr.bf16.mxu1 %v7302_v31  ;;  %v7389_v30 = vld [vmem:[#allocation2 + $0x684] ss:$16 sps:$4 sm:$0xff]   ;;  %v7392_v31 = vld [vmem:[#allocation2 + $0x68c] ss:$16 sps:$4 sm:$0xff]  }
  0xf0   :  { %4835 = vmatpush1.bf16.msra.mxu0 %v7297_v32  ;;  %5327 = vmatpush1.bf16.msra.mxu1 %v7300_v33  ;;  %v7387_v32 = vld [vmem:[#allocation2 + $0x680] ss:$16 sps:$4 sm:$0xff]   ;;  %v7390_v33 = vld [vmem:[#allocation2 + $0x688] ss:$16 sps:$4 sm:$0xff]  }
  0xf1   :  { %4836 = vmatprep.subr.bf16.mxu0 %v7305_v34  ;;  %5328 = vmatprep.subr.bf16.mxu1 %v7308_v35  ;;  %v7395_v34 = vld [vmem:[#allocation2 + $0x6a4] ss:$16 sps:$4 sm:$0xff]   ;;  %v7398_v35 = vld [vmem:[#allocation2 + $0x6ac] ss:$16 sps:$4 sm:$0xff]  }
  0xf4   :  { %4837 = vmatpush1.bf16.msra.mxu0 %v7303_v36  ;;  %5329 = vmatpush1.bf16.msra.mxu1 %v7306_v37  ;;  %v7393_v36 = vld [vmem:[#allocation2 + $0x6a0] ss:$16 sps:$4 sm:$0xff]   ;;  %v7396_v37 = vld [vmem:[#allocation2 + $0x6a8] ss:$16 sps:$4 sm:$0xff]  }
  0xf5   :  { %4838 = vmatprep.subr.bf16.mxu0 %v7311_v38  ;;  %5330 = vmatprep.subr.bf16.mxu1 %v7314_v39  ;;  %v7401_v38 = vld [vmem:[#allocation2 + $0x6c4] ss:$16 sps:$4 sm:$0xff]   ;;  %v7404_v39 = vld [vmem:[#allocation2 + $0x6cc] ss:$16 sps:$4 sm:$0xff]  }
  0xf8   :  { %4839 = vmatpush1.bf16.msra.mxu0 %v7309_v40  ;;  %5331 = vmatpush1.bf16.msra.mxu1 %v7312_v41  ;;  %v7399_v40 = vld [vmem:[#allocation2 + $0x6c0] ss:$16 sps:$4 sm:$0xff]   ;;  %v7402_v41 = vld [vmem:[#allocation2 + $0x6c8] ss:$16 sps:$4 sm:$0xff]  }
  0xf9   :  { %4840 = vmatprep.subr.bf16.mxu0 %v7317_v42  ;;  %5332 = vmatprep.subr.bf16.mxu1 %v7320_v43  ;;  %v7407_v42 = vld [vmem:[#allocation2 + $0x6e4] ss:$16 sps:$4 sm:$0xff]   ;;  %v7410_v43 = vld [vmem:[#allocation2 + $0x6ec] ss:$16 sps:$4 sm:$0xff]  }
  0xfc   :  { %4841 = vmatpush1.bf16.msra.mxu0 %v7315_v44  ;;  %5333 = vmatpush1.bf16.msra.mxu1 %v7318_v45  ;;  %v7405_v44 = vld [vmem:[#allocation2 + $0x6e0] ss:$16 sps:$4 sm:$0xff]   ;;  %v7408_v45 = vld [vmem:[#allocation2 + $0x6e8] ss:$16 sps:$4 sm:$0xff]  }
  0xfd   :  { %4842 = vmatprep.subr.bf16.mxu0 %v7323_v46  ;;  %5334 = vmatprep.subr.bf16.mxu1 %v7326_v47  ;;  %v7413_v46 = vld [vmem:[#allocation2 + $0x704] ss:$16 sps:$4 sm:$0xff]   ;;  %v7416_v47 = vld [vmem:[#allocation2 + $0x70c] ss:$16 sps:$4 sm:$0xff]  }
 0x100   :  { %4843 = vmatpush1.bf16.msra.mxu0 %v7321_v48  ;;  %5335 = vmatpush1.bf16.msra.mxu1 %v7324_v49  ;;  %v7411_v48 = vld [vmem:[#allocation2 + $0x700] ss:$16 sps:$4 sm:$0xff]   ;;  %v7414_v49 = vld [vmem:[#allocation2 + $0x708] ss:$16 sps:$4 sm:$0xff]  }
 0x101   :  { %4844 = vmatprep.subr.bf16.mxu0 %v7329_v50  ;;  %5336 = vmatprep.subr.bf16.mxu1 %v7332_v51  ;;  %v7419_v50 = vld [vmem:[#allocation2 + $0x724] ss:$16 sps:$4 sm:$0xff]   ;;  %v7422_v51 = vld [vmem:[#allocation2 + $0x72c] ss:$16 sps:$4 sm:$0xff]  }
 0x104   :  { %4845 = vmatpush1.bf16.msra.mxu0 %v7327_v52  ;;  %5337 = vmatpush1.bf16.msra.mxu1 %v7330_v53  ;;  %v7417_v52 = vld [vmem:[#allocation2 + $0x720] ss:$16 sps:$4 sm:$0xff]   ;;  %v7420_v53 = vld [vmem:[#allocation2 + $0x728] ss:$16 sps:$4 sm:$0xff]  }
 0x105   :  { %4846 = vmatprep.subr.bf16.mxu0 %v7335_v54  ;;  %5338 = vmatprep.subr.bf16.mxu1 %v7338_v55  ;;  %v7425_v54 = vld [vmem:[#allocation2 + $0x744] ss:$16 sps:$4 sm:$0xff]   ;;  %v7428_v55 = vld [vmem:[#allocation2 + $0x74c] ss:$16 sps:$4 sm:$0xff]  }
 0x108   :  { %4847 = vmatpush1.bf16.msra.mxu0 %v7333_v56  ;;  %5339 = vmatpush1.bf16.msra.mxu1 %v7336_v57  ;;  %v7423_v56 = vld [vmem:[#allocation2 + $0x740] ss:$16 sps:$4 sm:$0xff]   ;;  %v7426_v57 = vld [vmem:[#allocation2 + $0x748] ss:$16 sps:$4 sm:$0xff]  }
 0x109   :  { %4848 = vmatprep.subr.bf16.mxu0 %v7341_v58  ;;  %5340 = vmatprep.subr.bf16.mxu1 %v7344_v59  ;;  %v7431_v58 = vld [vmem:[#allocation2 + $0x764] ss:$16 sps:$4 sm:$0xff]   ;;  %v7434_v59 = vld [vmem:[#allocation2 + $0x76c] ss:$16 sps:$4 sm:$0xff]  }
 0x10c   :  { %4849 = vmatpush1.bf16.msra.mxu0 %v7339_v60  ;;  %5341 = vmatpush1.bf16.msra.mxu1 %v7342_v61  ;;  %v7429_v60 = vld [vmem:[#allocation2 + $0x760] ss:$16 sps:$4 sm:$0xff]   ;;  %v7432_v61 = vld [vmem:[#allocation2 + $0x768] ss:$16 sps:$4 sm:$0xff]  }
 0x10d   :  { %4850 = vmatprep.subr.bf16.mxu0 %v7347_v62  ;;  %5342 = vmatprep.subr.bf16.mxu1 %v7350_v63  ;;  %v7437_v62 = vld [vmem:[#allocation2 + $0x784] ss:$16 sps:$4 sm:$0xff]   ;;  %v7440_v63 = vld [vmem:[#allocation2 + $0x78c] ss:$16 sps:$4 sm:$0xff]  }
 0x110   :  { %4851 = vmatpush1.bf16.msra.mxu0 %v7345_v0  ;;  %5343 = vmatpush1.bf16.msra.mxu1 %v7348_v1  ;;  %v7435_v0 = vld [vmem:[#allocation2 + $0x780] ss:$16 sps:$4 sm:$0xff]   ;;  %v7438_v1 = vld [vmem:[#allocation2 + $0x788] ss:$16 sps:$4 sm:$0xff]  }
 0x111   :  { %4852 = vmatprep.subr.bf16.mxu0 %v7353_v2  ;;  %5344 = vmatprep.subr.bf16.mxu1 %v7356_v3  ;;  %v7443_v2 = vld [vmem:[#allocation2 + $0x7a4] ss:$16 sps:$4 sm:$0xff]   ;;  %v7446_v3 = vld [vmem:[#allocation2 + $0x7ac] ss:$16 sps:$4 sm:$0xff]  }
 0x114   :  { %4853 = vmatpush1.bf16.msra.mxu0 %v7351_v4  ;;  %5345 = vmatpush1.bf16.msra.mxu1 %v7354_v5  ;;  %v7441_v4 = vld [vmem:[#allocation2 + $0x7a0] ss:$16 sps:$4 sm:$0xff]   ;;  %v7444_v5 = vld [vmem:[#allocation2 + $0x7a8] ss:$16 sps:$4 sm:$0xff]  }
 0x115   :  { %4854 = vmatprep.subr.bf16.mxu0 %v7359_v6  ;;  %5346 = vmatprep.subr.bf16.mxu1 %v7362_v7  ;;  %v7449_v6 = vld [vmem:[#allocation2 + $0x7c4] ss:$16 sps:$4 sm:$0xff]   ;;  %v7452_v7 = vld [vmem:[#allocation2 + $0x7cc] ss:$16 sps:$4 sm:$0xff]  }
 0x118   :  { %4855 = vmatpush1.bf16.msra.mxu0 %v7357_v8  ;;  %5347 = vmatpush1.bf16.msra.mxu1 %v7360_v9  ;;  %v7447_v8 = vld [vmem:[#allocation2 + $0x7c0] ss:$16 sps:$4 sm:$0xff]   ;;  %v7450_v9 = vld [vmem:[#allocation2 + $0x7c8] ss:$16 sps:$4 sm:$0xff]  }
 0x119   :  { %4865 = vmatprep.subr.bf16.mxu0 %v7365_v10  ;;  %5357 = vmatprep.subr.bf16.mxu1 %v7368_v12  ;;  %v7455_v10 = vld [vmem:[#allocation2 + $0x7e4] ss:$16 sps:$4 sm:$0xff]   ;;  %v7453_v12 = vld [vmem:[#allocation2 + $0x7e0] ss:$16 sps:$4 sm:$0xff]  }
 0x11b   :  { %4857 = vmatmul.mubr.bf16.vlgmr.msra.gmra.mrb[0].mxu0 %v114_v15  ;;  %5349 = vmatmul.mubr.bf16.vlgmr.msra.gmra.mrb[0].mxu1 %v114_v15  ;;  %v7461_v15 = vld [vmem:[#allocation2 + $0x804] ss:$16 sps:$4 sm:$0xff]  }
 0x11c   :  { %4866 = vmatpush1.bf16.msra.mxu0 %v7363_v13  ;;  %5358 = vmatpush1.bf16.msra.mxu1 %v7366_v14  ;;  %v7456_v13 = vld [vmem:[#allocation2 + $0x7e8] ss:$16 sps:$4 sm:$0xff]   ;;  %v92_v14 = vld [vmem:[%s8561_s0 + $0x30] sm:$0xff] }
 0x11d   :  { %4867 = vmatprep.subr.bf16.mxu0 %v7371_v17  ;;  %5359 = vmatprep.subr.bf16.mxu1 %v7374_v18  ;;  %v116_v17 = vpack.c.bf16 %v92_v14, %v92_v14  ;;  %v95_v18 = vld [vmem:[%s8561_s0 + $0x48] sm:$0xff]  ;;  %v7551_v14 = vld [vmem:[#allocation2 + $0x9e4] ss:$16 sps:$4 sm:$0xff]  }
 0x11e   :  { %4897 = vmatprep.mubr.bf16.mxu0 %v117_v19  ;;  %5389 = vmatprep.mubr.bf16.mxu1 %v117_v19  ;;  %v7459_v19 = vld [vmem:[#allocation2 + $0x800] ss:$16 sps:$4 sm:$0xff]  }
 0x120   :  { %4868 = vmatpush1.bf16.msra.mxu0 %v7369_v20  ;;  %5360 = vmatpush1.bf16.msra.mxu1 %v7372_v21  ;;  %v7462_v20 = vld [vmem:[#allocation2 + $0x808] ss:$16 sps:$4 sm:$0xff]   ;;  %v7467_v21 = vld [vmem:[#allocation2 + $0x824] ss:$16 sps:$4 sm:$0xff]  }
 0x121   :  { %4869 = vmatprep.subr.bf16.mxu0 %v7377_v22  ;;  %5361 = vmatprep.subr.bf16.mxu1 %v7380_v23  ;;  %v7470_v22 = vld [vmem:[#allocation2 + $0x82c] ss:$16 sps:$4 sm:$0xff]   ;;  %v119_v23 = vpack.c.bf16 %v95_v18, %v95_v18  ;;  %v7557_v18 = vld [vmem:[#allocation2 + $0xa04] ss:$16 sps:$4 sm:$0xff]  }
 0x124   :  { %4870 = vmatpush1.bf16.msra.mxu0 %v7375_v24  ;;  %5362 = vmatpush1.bf16.msra.mxu1 %v7378_v25  ;;  %v7465_v24 = vld [vmem:[#allocation2 + $0x820] ss:$16 sps:$4 sm:$0xff]   ;;  %v7468_v25 = vld [vmem:[#allocation2 + $0x828] ss:$16 sps:$4 sm:$0xff]  }
 0x125   :  { %4871 = vmatprep.subr.bf16.mxu0 %v7383_v26  ;;  %5363 = vmatprep.subr.bf16.mxu1 %v7386_v27  ;;  %v7473_v26 = vld [vmem:[#allocation2 + $0x844] ss:$16 sps:$4 sm:$0xff]   ;;  %v7476_v27 = vld [vmem:[#allocation2 + $0x84c] ss:$16 sps:$4 sm:$0xff]  }
 0x128   :  { %4872 = vmatpush1.bf16.msra.mxu0 %v7381_v28  ;;  %5364 = vmatpush1.bf16.msra.mxu1 %v7384_v29  ;;  %v7471_v28 = vld [vmem:[#allocation2 + $0x840] ss:$16 sps:$4 sm:$0xff]   ;;  %v7474_v29 = vld [vmem:[#allocation2 + $0x848] ss:$16 sps:$4 sm:$0xff]  }
 0x129   :  { %4873 = vmatprep.subr.bf16.mxu0 %v7389_v30  ;;  %5365 = vmatprep.subr.bf16.mxu1 %v7392_v31  ;;  %v7479_v30 = vld [vmem:[#allocation2 + $0x864] ss:$16 sps:$4 sm:$0xff]   ;;  %v7482_v31 = vld [vmem:[#allocation2 + $0x86c] ss:$16 sps:$4 sm:$0xff]  }
 0x12c   :  { %4874 = vmatpush1.bf16.msra.mxu0 %v7387_v32  ;;  %5366 = vmatpush1.bf16.msra.mxu1 %v7390_v33  ;;  %v7477_v32 = vld [vmem:[#allocation2 + $0x860] ss:$16 sps:$4 sm:$0xff]   ;;  %v7480_v33 = vld [vmem:[#allocation2 + $0x868] ss:$16 sps:$4 sm:$0xff]  }
 0x12d   :  { %4875 = vmatprep.subr.bf16.mxu0 %v7395_v34  ;;  %5367 = vmatprep.subr.bf16.mxu1 %v7398_v35  ;;  %v7485_v34 = vld [vmem:[#allocation2 + $0x884] ss:$16 sps:$4 sm:$0xff]   ;;  %v7488_v35 = vld [vmem:[#allocation2 + $0x88c] ss:$16 sps:$4 sm:$0xff]  }
 0x130   :  { %4876 = vmatpush1.bf16.msra.mxu0 %v7393_v36  ;;  %5368 = vmatpush1.bf16.msra.mxu1 %v7396_v37  ;;  %v7483_v36 = vld [vmem:[#allocation2 + $0x880] ss:$16 sps:$4 sm:$0xff]   ;;  %v7486_v37 = vld [vmem:[#allocation2 + $0x888] ss:$16 sps:$4 sm:$0xff]  }
 0x131   :  { %4877 = vmatprep.subr.bf16.mxu0 %v7401_v38  ;;  %5369 = vmatprep.subr.bf16.mxu1 %v7404_v39  ;;  %v7491_v38 = vld [vmem:[#allocation2 + $0x8a4] ss:$16 sps:$4 sm:$0xff]   ;;  %v7494_v39 = vld [vmem:[#allocation2 + $0x8ac] ss:$16 sps:$4 sm:$0xff]  }
 0x134   :  { %4878 = vmatpush1.bf16.msra.mxu0 %v7399_v40  ;;  %5370 = vmatpush1.bf16.msra.mxu1 %v7402_v41  ;;  %v7489_v40 = vld [vmem:[#allocation2 + $0x8a0] ss:$16 sps:$4 sm:$0xff]   ;;  %v7492_v41 = vld [vmem:[#allocation2 + $0x8a8] ss:$16 sps:$4 sm:$0xff]  }
 0x135   :  { %4879 = vmatprep.subr.bf16.mxu0 %v7407_v42  ;;  %5371 = vmatprep.subr.bf16.mxu1 %v7410_v43  ;;  %v7497_v42 = vld [vmem:[#allocation2 + $0x8c4] ss:$16 sps:$4 sm:$0xff]   ;;  %v7500_v43 = vld [vmem:[#allocation2 + $0x8cc] ss:$16 sps:$4 sm:$0xff]  }
 0x138   :  { %4880 = vmatpush1.bf16.msra.mxu0 %v7405_v44  ;;  %5372 = vmatpush1.bf16.msra.mxu1 %v7408_v45  ;;  %v7495_v44 = vld [vmem:[#allocation2 + $0x8c0] ss:$16 sps:$4 sm:$0xff]   ;;  %v7498_v45 = vld [vmem:[#allocation2 + $0x8c8] ss:$16 sps:$4 sm:$0xff]  }
 0x139   :  { %4881 = vmatprep.subr.bf16.mxu0 %v7413_v46  ;;  %5373 = vmatprep.subr.bf16.mxu1 %v7416_v47  ;;  %v7503_v46 = vld [vmem:[#allocation2 + $0x8e4] ss:$16 sps:$4 sm:$0xff]   ;;  %v7506_v47 = vld [vmem:[#allocation2 + $0x8ec] ss:$16 sps:$4 sm:$0xff]  }
 0x13c   :  { %4882 = vmatpush1.bf16.msra.mxu0 %v7411_v48  ;;  %5374 = vmatpush1.bf16.msra.mxu1 %v7414_v49  ;;  %v7501_v48 = vld [vmem:[#allocation2 + $0x8e0] ss:$16 sps:$4 sm:$0xff]   ;;  %v7504_v49 = vld [vmem:[#allocation2 + $0x8e8] ss:$16 sps:$4 sm:$0xff]  }
 0x13d   :  { %4883 = vmatprep.subr.bf16.mxu0 %v7419_v50  ;;  %5375 = vmatprep.subr.bf16.mxu1 %v7422_v51  ;;  %v7509_v50 = vld [vmem:[#allocation2 + $0x904] ss:$16 sps:$4 sm:$0xff]   ;;  %v7512_v51 = vld [vmem:[#allocation2 + $0x90c] ss:$16 sps:$4 sm:$0xff]  }
 0x140   :  { %4884 = vmatpush1.bf16.msra.mxu0 %v7417_v52  ;;  %5376 = vmatpush1.bf16.msra.mxu1 %v7420_v53  ;;  %v7507_v52 = vld [vmem:[#allocation2 + $0x900] ss:$16 sps:$4 sm:$0xff]   ;;  %v7510_v53 = vld [vmem:[#allocation2 + $0x908] ss:$16 sps:$4 sm:$0xff]  }
 0x141   :  { %4885 = vmatprep.subr.bf16.mxu0 %v7425_v54  ;;  %5377 = vmatprep.subr.bf16.mxu1 %v7428_v55  ;;  %v7515_v54 = vld [vmem:[#allocation2 + $0x924] ss:$16 sps:$4 sm:$0xff]   ;;  %v7518_v55 = vld [vmem:[#allocation2 + $0x92c] ss:$16 sps:$4 sm:$0xff]  }
 0x144   :  { %4886 = vmatpush1.bf16.msra.mxu0 %v7423_v56  ;;  %5378 = vmatpush1.bf16.msra.mxu1 %v7426_v57  ;;  %v7513_v56 = vld [vmem:[#allocation2 + $0x920] ss:$16 sps:$4 sm:$0xff]   ;;  %v7516_v57 = vld [vmem:[#allocation2 + $0x928] ss:$16 sps:$4 sm:$0xff]  }
 0x145   :  { %4887 = vmatprep.subr.bf16.mxu0 %v7431_v58  ;;  %5379 = vmatprep.subr.bf16.mxu1 %v7434_v59  ;;  %v7521_v58 = vld [vmem:[#allocation2 + $0x944] ss:$16 sps:$4 sm:$0xff]   ;;  %v7524_v59 = vld [vmem:[#allocation2 + $0x94c] ss:$16 sps:$4 sm:$0xff]  }
 0x148   :  { %4888 = vmatpush1.bf16.msra.mxu0 %v7429_v60  ;;  %5380 = vmatpush1.bf16.msra.mxu1 %v7432_v61  ;;  %v7519_v60 = vld [vmem:[#allocation2 + $0x940] ss:$16 sps:$4 sm:$0xff]   ;;  %v7522_v61 = vld [vmem:[#allocation2 + $0x948] ss:$16 sps:$4 sm:$0xff]  }
 0x149   :  { %4889 = vmatprep.subr.bf16.mxu0 %v7437_v62  ;;  %5381 = vmatprep.subr.bf16.mxu1 %v7440_v63  ;;  %v7527_v62 = vld [vmem:[#allocation2 + $0x964] ss:$16 sps:$4 sm:$0xff]   ;;  %v7530_v63 = vld [vmem:[#allocation2 + $0x96c] ss:$16 sps:$4 sm:$0xff]  }
 0x14c   :  { %4890 = vmatpush1.bf16.msra.mxu0 %v7435_v0  ;;  %5382 = vmatpush1.bf16.msra.mxu1 %v7438_v1  ;;  %v7525_v0 = vld [vmem:[#allocation2 + $0x960] ss:$16 sps:$4 sm:$0xff]   ;;  %v7528_v1 = vld [vmem:[#allocation2 + $0x968] ss:$16 sps:$4 sm:$0xff]  }
 0x14d   :  { %4891 = vmatprep.subr.bf16.mxu0 %v7443_v2  ;;  %5383 = vmatprep.subr.bf16.mxu1 %v7446_v3  ;;  %v7533_v2 = vld [vmem:[#allocation2 + $0x984] ss:$16 sps:$4 sm:$0xff]   ;;  %v7536_v3 = vld [vmem:[#allocation2 + $0x98c] ss:$16 sps:$4 sm:$0xff]  }
 0x150   :  { %4892 = vmatpush1.bf16.msra.mxu0 %v7441_v4  ;;  %5384 = vmatpush1.bf16.msra.mxu1 %v7444_v5  ;;  %v7531_v4 = vld [vmem:[#allocation2 + $0x980] ss:$16 sps:$4 sm:$0xff]   ;;  %v7534_v5 = vld [vmem:[#allocation2 + $0x988] ss:$16 sps:$4 sm:$0xff]  }
 0x151   :  { %4893 = vmatprep.subr.bf16.mxu0 %v7449_v6  ;;  %5385 = vmatprep.subr.bf16.mxu1 %v7452_v7  ;;  %v7539_v6 = vld [vmem:[#allocation2 + $0x9a4] ss:$16 sps:$4 sm:$0xff]   ;;  %v7542_v7 = vld [vmem:[#allocation2 + $0x9ac] ss:$16 sps:$4 sm:$0xff]  }
 0x154   :  { %4894 = vmatpush1.bf16.msra.mxu0 %v7447_v8  ;;  %5386 = vmatpush1.bf16.msra.mxu1 %v7450_v9  ;;  %v7537_v8 = vld [vmem:[#allocation2 + $0x9a0] ss:$16 sps:$4 sm:$0xff]   ;;  %v7540_v9 = vld [vmem:[#allocation2 + $0x9a8] ss:$16 sps:$4 sm:$0xff]  }
 0x155   :  { %4895 = vmatprep.subr.bf16.mxu0 %v7455_v10  ;;  %5387 = vmatprep.subr.bf16.mxu1 %v7458_v11  ;;  %v7545_v10 = vld [vmem:[#allocation2 + $0x9c4] ss:$16 sps:$4 sm:$0xff]   ;;  %v7548_v11 = vld [vmem:[#allocation2 + $0x9cc] ss:$16 sps:$4 sm:$0xff]  }
 0x158   :  { %4896 = vmatpush1.bf16.msra.mxu0 %v7453_v12  ;;  %5388 = vmatpush1.bf16.msra.mxu1 %v7456_v13  ;;  %v7543_v12 = vld [vmem:[#allocation2 + $0x9c0] ss:$16 sps:$4 sm:$0xff]   ;;  %v7546_v13 = vld [vmem:[#allocation2 + $0x9c8] ss:$16 sps:$4 sm:$0xff]  }
 0x159   :  { %4906 = vmatprep.subr.bf16.mxu0 %v7461_v15  ;;  %5398 = vmatprep.subr.bf16.mxu1 %v7464_v16  ;;  %v7554_v15 = vld [vmem:[#allocation2 + $0x9ec] ss:$16 sps:$4 sm:$0xff]   ;;  %v7549_v16 = vld [vmem:[#allocation2 + $0x9e0] ss:$16 sps:$4 sm:$0xff]  }
 0x15b   :  { %4898 = vmatmul.mubr.bf16.vlgmr.msra.gmra.mrb[0].mxu0 %v116_v17  ;;  %5390 = vmatmul.mubr.bf16.vlgmr.msra.gmra.mrb[0].mxu1 %v116_v17  ;;  %v7552_v17 = vld [vmem:[#allocation2 + $0x9e8] ss:$16 sps:$4 sm:$0xff]  }
 0x15c   :  { %4907 = vmatpush1.bf16.msra.mxu0 %v7459_v19  ;;  %5399 = vmatpush1.bf16.msra.mxu1 %v7462_v20  ;;  %v94_v19 = vld [vmem:[%s8561_s0 + $0x40] sm:$0xff]  ;;  %v7560_v20 = vld [vmem:[#allocation2 + $0xa0c] ss:$16 sps:$4 sm:$0xff]  }
 0x15d   :  { %4908 = vmatprep.subr.bf16.mxu0 %v7467_v21  ;;  %5400 = vmatprep.subr.bf16.mxu1 %v7470_v22  ;;  %v97_v21 = vld [vmem:[%s8561_s0 + $0x58] sm:$0xff]  ;;  %v118_v22 = vpack.c.bf16 %v94_v19, %v94_v19 }
 0x15e   :  { %4938 = vmatprep.mubr.bf16.mxu0 %v119_v23  ;;  %5430 = vmatprep.mubr.bf16.mxu1 %v119_v23  ;;  %v7555_v23 = vld [vmem:[#allocation2 + $0xa00] ss:$16 sps:$4 sm:$0xff]   ;;  %v7650_v19 = vld [vmem:[#allocation2 + $0xbec] ss:$16 sps:$4 sm:$0xff]  }
 0x160   :  { %4909 = vmatpush1.bf16.msra.mxu0 %v7465_v24  ;;  %5401 = vmatpush1.bf16.msra.mxu1 %v7468_v25  ;;  %v7558_v24 = vld [vmem:[#allocation2 + $0xa08] ss:$16 sps:$4 sm:$0xff]   ;;  %v7563_v25 = vld [vmem:[#allocation2 + $0xa24] ss:$16 sps:$4 sm:$0xff]  }
 0x161   :  { %4910 = vmatprep.subr.bf16.mxu0 %v7473_v26  ;;  %5402 = vmatprep.subr.bf16.mxu1 %v7476_v27  ;;  %v7566_v26 = vld [vmem:[#allocation2 + $0xa2c] ss:$16 sps:$4 sm:$0xff]   ;;  %v121_v27 = vpack.c.bf16 %v97_v21, %v97_v21  ;;  %v7648_v21 = vld [vmem:[#allocation2 + $0xbe8] ss:$16 sps:$4 sm:$0xff]  }
 0x164   :  { %4911 = vmatpush1.bf16.msra.mxu0 %v7471_v28  ;;  %5403 = vmatpush1.bf16.msra.mxu1 %v7474_v29  ;;  %v7561_v28 = vld [vmem:[#allocation2 + $0xa20] ss:$16 sps:$4 sm:$0xff]   ;;  %v7564_v29 = vld [vmem:[#allocation2 + $0xa28] ss:$16 sps:$4 sm:$0xff]  }
 0x165   :  { %4912 = vmatprep.subr.bf16.mxu0 %v7479_v30  ;;  %5404 = vmatprep.subr.bf16.mxu1 %v7482_v31  ;;  %v7569_v30 = vld [vmem:[#allocation2 + $0xa44] ss:$16 sps:$4 sm:$0xff]   ;;  %v7572_v31 = vld [vmem:[#allocation2 + $0xa4c] ss:$16 sps:$4 sm:$0xff]  }
 0x168   :  { %4913 = vmatpush1.bf16.msra.mxu0 %v7477_v32  ;;  %5405 = vmatpush1.bf16.msra.mxu1 %v7480_v33  ;;  %v7567_v32 = vld [vmem:[#allocation2 + $0xa40] ss:$16 sps:$4 sm:$0xff]   ;;  %v7570_v33 = vld [vmem:[#allocation2 + $0xa48] ss:$16 sps:$4 sm:$0xff]  }
 0x169   :  { %4914 = vmatprep.subr.bf16.mxu0 %v7485_v34  ;;  %5406 = vmatprep.subr.bf16.mxu1 %v7488_v35  ;;  %v7575_v34 = vld [vmem:[#allocation2 + $0xa64] ss:$16 sps:$4 sm:$0xff]   ;;  %v7578_v35 = vld [vmem:[#allocation2 + $0xa6c] ss:$16 sps:$4 sm:$0xff]  }
 0x16c   :  { %4915 = vmatpush1.bf16.msra.mxu0 %v7483_v36  ;;  %5407 = vmatpush1.bf16.msra.mxu1 %v7486_v37  ;;  %v7573_v36 = vld [vmem:[#allocation2 + $0xa60] ss:$16 sps:$4 sm:$0xff]   ;;  %v7576_v37 = vld [vmem:[#allocation2 + $0xa68] ss:$16 sps:$4 sm:$0xff]  }
 0x16d   :  { %4916 = vmatprep.subr.bf16.mxu0 %v7491_v38  ;;  %5408 = vmatprep.subr.bf16.mxu1 %v7494_v39  ;;  %v7581_v38 = vld [vmem:[#allocation2 + $0xa84] ss:$16 sps:$4 sm:$0xff]   ;;  %v7584_v39 = vld [vmem:[#allocation2 + $0xa8c] ss:$16 sps:$4 sm:$0xff]  }
 0x170   :  { %4917 = vmatpush1.bf16.msra.mxu0 %v7489_v40  ;;  %5409 = vmatpush1.bf16.msra.mxu1 %v7492_v41  ;;  %v7579_v40 = vld [vmem:[#allocation2 + $0xa80] ss:$16 sps:$4 sm:$0xff]   ;;  %v7582_v41 = vld [vmem:[#allocation2 + $0xa88] ss:$16 sps:$4 sm:$0xff]  }
 0x171   :  { %4918 = vmatprep.subr.bf16.mxu0 %v7497_v42  ;;  %5410 = vmatprep.subr.bf16.mxu1 %v7500_v43  ;;  %v7587_v42 = vld [vmem:[#allocation2 + $0xaa4] ss:$16 sps:$4 sm:$0xff]   ;;  %v7590_v43 = vld [vmem:[#allocation2 + $0xaac] ss:$16 sps:$4 sm:$0xff]  }
 0x174   :  { %4919 = vmatpush1.bf16.msra.mxu0 %v7495_v44  ;;  %5411 = vmatpush1.bf16.msra.mxu1 %v7498_v45  ;;  %v7585_v44 = vld [vmem:[#allocation2 + $0xaa0] ss:$16 sps:$4 sm:$0xff]   ;;  %v7588_v45 = vld [vmem:[#allocation2 + $0xaa8] ss:$16 sps:$4 sm:$0xff]  }
 0x175   :  { %4920 = vmatprep.subr.bf16.mxu0 %v7503_v46  ;;  %5412 = vmatprep.subr.bf16.mxu1 %v7506_v47  ;;  %v7593_v46 = vld [vmem:[#allocation2 + $0xac4] ss:$16 sps:$4 sm:$0xff]   ;;  %v7596_v47 = vld [vmem:[#allocation2 + $0xacc] ss:$16 sps:$4 sm:$0xff]  }
 0x178   :  { %4921 = vmatpush1.bf16.msra.mxu0 %v7501_v48  ;;  %5413 = vmatpush1.bf16.msra.mxu1 %v7504_v49  ;;  %v7591_v48 = vld [vmem:[#allocation2 + $0xac0] ss:$16 sps:$4 sm:$0xff]   ;;  %v7594_v49 = vld [vmem:[#allocation2 + $0xac8] ss:$16 sps:$4 sm:$0xff]  }
 0x179   :  { %4922 = vmatprep.subr.bf16.mxu0 %v7509_v50  ;;  %5414 = vmatprep.subr.bf16.mxu1 %v7512_v51  ;;  %v7599_v50 = vld [vmem:[#allocation2 + $0xae4] ss:$16 sps:$4 sm:$0xff]   ;;  %v7602_v51 = vld [vmem:[#allocation2 + $0xaec] ss:$16 sps:$4 sm:$0xff]  }
 0x17c   :  { %4923 = vmatpush1.bf16.msra.mxu0 %v7507_v52  ;;  %5415 = vmatpush1.bf16.msra.mxu1 %v7510_v53  ;;  %v7597_v52 = vld [vmem:[#allocation2 + $0xae0] ss:$16 sps:$4 sm:$0xff]   ;;  %v7600_v53 = vld [vmem:[#allocation2 + $0xae8] ss:$16 sps:$4 sm:$0xff]  }
 0x17d   :  { %4924 = vmatprep.subr.bf16.mxu0 %v7515_v54  ;;  %5416 = vmatprep.subr.bf16.mxu1 %v7518_v55  ;;  %v7605_v54 = vld [vmem:[#allocation2 + $0xb04] ss:$16 sps:$4 sm:$0xff]   ;;  %v7608_v55 = vld [vmem:[#allocation2 + $0xb0c] ss:$16 sps:$4 sm:$0xff]  }
 0x180   :  { %4925 = vmatpush1.bf16.msra.mxu0 %v7513_v56  ;;  %5417 = vmatpush1.bf16.msra.mxu1 %v7516_v57  ;;  %v7603_v56 = vld [vmem:[#allocation2 + $0xb00] ss:$16 sps:$4 sm:$0xff]   ;;  %v7606_v57 = vld [vmem:[#allocation2 + $0xb08] ss:$16 sps:$4 sm:$0xff]  }
 0x181   :  { %4926 = vmatprep.subr.bf16.mxu0 %v7521_v58  ;;  %5418 = vmatprep.subr.bf16.mxu1 %v7524_v59  ;;  %v7611_v58 = vld [vmem:[#allocation2 + $0xb24] ss:$16 sps:$4 sm:$0xff]   ;;  %v7614_v59 = vld [vmem:[#allocation2 + $0xb2c] ss:$16 sps:$4 sm:$0xff]  }
 0x184   :  { %4927 = vmatpush1.bf16.msra.mxu0 %v7519_v60  ;;  %5419 = vmatpush1.bf16.msra.mxu1 %v7522_v61  ;;  %v7609_v60 = vld [vmem:[#allocation2 + $0xb20] ss:$16 sps:$4 sm:$0xff]   ;;  %v7612_v61 = vld [vmem:[#allocation2 + $0xb28] ss:$16 sps:$4 sm:$0xff]  }
 0x185   :  { %4928 = vmatprep.subr.bf16.mxu0 %v7527_v62  ;;  %5420 = vmatprep.subr.bf16.mxu1 %v7530_v63  ;;  %v7617_v62 = vld [vmem:[#allocation2 + $0xb44] ss:$16 sps:$4 sm:$0xff]   ;;  %v7620_v63 = vld [vmem:[#allocation2 + $0xb4c] ss:$16 sps:$4 sm:$0xff]  }
 0x188   :  { %4929 = vmatpush1.bf16.msra.mxu0 %v7525_v0  ;;  %5421 = vmatpush1.bf16.msra.mxu1 %v7528_v1  ;;  %v7615_v0 = vld [vmem:[#allocation2 + $0xb40] ss:$16 sps:$4 sm:$0xff]   ;;  %v7618_v1 = vld [vmem:[#allocation2 + $0xb48] ss:$16 sps:$4 sm:$0xff]  }
 0x189   :  { %4930 = vmatprep.subr.bf16.mxu0 %v7533_v2  ;;  %5422 = vmatprep.subr.bf16.mxu1 %v7536_v3  ;;  %v7623_v2 = vld [vmem:[#allocation2 + $0xb64] ss:$16 sps:$4 sm:$0xff]   ;;  %v7626_v3 = vld [vmem:[#allocation2 + $0xb6c] ss:$16 sps:$4 sm:$0xff]  }
 0x18c   :  { %4931 = vmatpush1.bf16.msra.mxu0 %v7531_v4  ;;  %5423 = vmatpush1.bf16.msra.mxu1 %v7534_v5  ;;  %v7621_v4 = vld [vmem:[#allocation2 + $0xb60] ss:$16 sps:$4 sm:$0xff]   ;;  %v7624_v5 = vld [vmem:[#allocation2 + $0xb68] ss:$16 sps:$4 sm:$0xff]  }
 0x18d   :  { %4932 = vmatprep.subr.bf16.mxu0 %v7539_v6  ;;  %5424 = vmatprep.subr.bf16.mxu1 %v7542_v7  ;;  %v7629_v6 = vld [vmem:[#allocation2 + $0xb84] ss:$16 sps:$4 sm:$0xff]   ;;  %v7632_v7 = vld [vmem:[#allocation2 + $0xb8c] ss:$16 sps:$4 sm:$0xff]  }
 0x190   :  { %4933 = vmatpush1.bf16.msra.mxu0 %v7537_v8  ;;  %5425 = vmatpush1.bf16.msra.mxu1 %v7540_v9  ;;  %v7627_v8 = vld [vmem:[#allocation2 + $0xb80] ss:$16 sps:$4 sm:$0xff]   ;;  %v7630_v9 = vld [vmem:[#allocation2 + $0xb88] ss:$16 sps:$4 sm:$0xff]  }
 0x191   :  { %4934 = vmatprep.subr.bf16.mxu0 %v7545_v10  ;;  %5426 = vmatprep.subr.bf16.mxu1 %v7548_v11  ;;  %v7635_v10 = vld [vmem:[#allocation2 + $0xba4] ss:$16 sps:$4 sm:$0xff]   ;;  %v7638_v11 = vld [vmem:[#allocation2 + $0xbac] ss:$16 sps:$4 sm:$0xff]  }
 0x194   :  { %4935 = vmatpush1.bf16.msra.mxu0 %v7543_v12  ;;  %5427 = vmatpush1.bf16.msra.mxu1 %v7546_v13  ;;  %v7633_v12 = vld [vmem:[#allocation2 + $0xba0] ss:$16 sps:$4 sm:$0xff]   ;;  %v7636_v13 = vld [vmem:[#allocation2 + $0xba8] ss:$16 sps:$4 sm:$0xff]  }
 0x195   :  { %4936 = vmatprep.subr.bf16.mxu0 %v7551_v14  ;;  %5428 = vmatprep.subr.bf16.mxu1 %v7554_v15  ;;  %v7641_v14 = vld [vmem:[#allocation2 + $0xbc4] ss:$16 sps:$4 sm:$0xff]   ;;  %v7644_v15 = vld [vmem:[#allocation2 + $0xbcc] ss:$16 sps:$4 sm:$0xff]  }
 0x198   :  { %4937 = vmatpush1.bf16.msra.mxu0 %v7549_v16  ;;  %5429 = vmatpush1.bf16.msra.mxu1 %v7552_v17  ;;  %v7639_v16 = vld [vmem:[#allocation2 + $0xbc0] ss:$16 sps:$4 sm:$0xff]   ;;  %v7642_v17 = vld [vmem:[#allocation2 + $0xbc8] ss:$16 sps:$4 sm:$0xff]  }
 0x199   :  { %4947 = vmatprep.subr.bf16.mxu0 %v7557_v18  ;;  %5439 = vmatprep.subr.bf16.mxu1 %v7560_v20  ;;  %v7647_v18 = vld [vmem:[#allocation2 + $0xbe4] ss:$16 sps:$4 sm:$0xff]   ;;  %v7645_v20 = vld [vmem:[#allocation2 + $0xbe0] ss:$16 sps:$4 sm:$0xff]  }
 0x19b   :  { %4939 = vmatmul.mubr.bf16.vlgmr.msra.gmra.mrb[0].mxu0 %v118_v22  ;;  %5431 = vmatmul.mubr.bf16.vlgmr.msra.gmra.mrb[0].mxu1 %v118_v22  ;;  %v7653_v22 = vld [vmem:[#allocation2 + $0xc04] ss:$16 sps:$4 sm:$0xff]  }
 0x19c   :  { %4948 = vmatpush1.bf16.msra.mxu0 %v7555_v23  ;;  %5440 = vmatpush1.bf16.msra.mxu1 %v7558_v24  ;;  %v96_v23 = vld [vmem:[%s8561_s0 + $0x50] sm:$0xff]  ;;  %v7656_v24 = vld [vmem:[#allocation2 + $0xc0c] ss:$16 sps:$4 sm:$0xff]  }
 0x19d   :  { %4949 = vmatprep.subr.bf16.mxu0 %v7563_v25  ;;  %5441 = vmatprep.subr.bf16.mxu1 %v7566_v26  ;;  %v99_v25 = vld [vmem:[%s8561_s0 + $0x68] sm:$0xff]  ;;  %v120_v26 = vpack.c.bf16 %v96_v23, %v96_v23 }
 0x19e   :  { %4979 = vmatprep.mubr.bf16.mxu0 %v121_v27  ;;  %5471 = vmatprep.mubr.bf16.mxu1 %v121_v27  ;;  %v7651_v27 = vld [vmem:[#allocation2 + $0xc00] ss:$16 sps:$4 sm:$0xff]   ;;  %v7746_v23 = vld [vmem:[#allocation2 + $0xdec] ss:$16 sps:$4 sm:$0xff]  }
 0x1a0   :  { %4950 = vmatpush1.bf16.msra.mxu0 %v7561_v28  ;;  %5442 = vmatpush1.bf16.msra.mxu1 %v7564_v29  ;;  %v7654_v28 = vld [vmem:[#allocation2 + $0xc08] ss:$16 sps:$4 sm:$0xff]   ;;  %v7659_v29 = vld [vmem:[#allocation2 + $0xc24] ss:$16 sps:$4 sm:$0xff]  }
 0x1a1   :  { %4951 = vmatprep.subr.bf16.mxu0 %v7569_v30  ;;  %5443 = vmatprep.subr.bf16.mxu1 %v7572_v31  ;;  %v7662_v30 = vld [vmem:[#allocation2 + $0xc2c] ss:$16 sps:$4 sm:$0xff]   ;;  %v123_v31 = vpack.c.bf16 %v99_v25, %v99_v25  ;;  %v7744_v25 = vld [vmem:[#allocation2 + $0xde8] ss:$16 sps:$4 sm:$0xff]  }
 0x1a4   :  { %4952 = vmatpush1.bf16.msra.mxu0 %v7567_v32  ;;  %5444 = vmatpush1.bf16.msra.mxu1 %v7570_v33  ;;  %v7657_v32 = vld [vmem:[#allocation2 + $0xc20] ss:$16 sps:$4 sm:$0xff]   ;;  %v7660_v33 = vld [vmem:[#allocation2 + $0xc28] ss:$16 sps:$4 sm:$0xff]  }
 0x1a5   :  { %4953 = vmatprep.subr.bf16.mxu0 %v7575_v34  ;;  %5445 = vmatprep.subr.bf16.mxu1 %v7578_v35  ;;  %v7665_v34 = vld [vmem:[#allocation2 + $0xc44] ss:$16 sps:$4 sm:$0xff]   ;;  %v7668_v35 = vld [vmem:[#allocation2 + $0xc4c] ss:$16 sps:$4 sm:$0xff]  }
 0x1a8   :  { %4954 = vmatpush1.bf16.msra.mxu0 %v7573_v36  ;;  %5446 = vmatpush1.bf16.msra.mxu1 %v7576_v37  ;;  %v7663_v36 = vld [vmem:[#allocation2 + $0xc40] ss:$16 sps:$4 sm:$0xff]   ;;  %v7666_v37 = vld [vmem:[#allocation2 + $0xc48] ss:$16 sps:$4 sm:$0xff]  }
 0x1a9   :  { %4955 = vmatprep.subr.bf16.mxu0 %v7581_v38  ;;  %5447 = vmatprep.subr.bf16.mxu1 %v7584_v39  ;;  %v7671_v38 = vld [vmem:[#allocation2 + $0xc64] ss:$16 sps:$4 sm:$0xff]   ;;  %v7674_v39 = vld [vmem:[#allocation2 + $0xc6c] ss:$16 sps:$4 sm:$0xff]  }
 0x1ac   :  { %4956 = vmatpush1.bf16.msra.mxu0 %v7579_v40  ;;  %5448 = vmatpush1.bf16.msra.mxu1 %v7582_v41  ;;  %v7669_v40 = vld [vmem:[#allocation2 + $0xc60] ss:$16 sps:$4 sm:$0xff]   ;;  %v7672_v41 = vld [vmem:[#allocation2 + $0xc68] ss:$16 sps:$4 sm:$0xff]  }
 0x1ad   :  { %4957 = vmatprep.subr.bf16.mxu0 %v7587_v42  ;;  %5449 = vmatprep.subr.bf16.mxu1 %v7590_v43  ;;  %v7677_v42 = vld [vmem:[#allocation2 + $0xc84] ss:$16 sps:$4 sm:$0xff]   ;;  %v7680_v43 = vld [vmem:[#allocation2 + $0xc8c] ss:$16 sps:$4 sm:$0xff]  }
 0x1b0   :  { %4958 = vmatpush1.bf16.msra.mxu0 %v7585_v44  ;;  %5450 = vmatpush1.bf16.msra.mxu1 %v7588_v45  ;;  %v7675_v44 = vld [vmem:[#allocation2 + $0xc80] ss:$16 sps:$4 sm:$0xff]   ;;  %v7678_v45 = vld [vmem:[#allocation2 + $0xc88] ss:$16 sps:$4 sm:$0xff]  }
 0x1b1   :  { %4959 = vmatprep.subr.bf16.mxu0 %v7593_v46  ;;  %5451 = vmatprep.subr.bf16.mxu1 %v7596_v47  ;;  %v7683_v46 = vld [vmem:[#allocation2 + $0xca4] ss:$16 sps:$4 sm:$0xff]   ;;  %v7686_v47 = vld [vmem:[#allocation2 + $0xcac] ss:$16 sps:$4 sm:$0xff]  }
 0x1b4   :  { %4960 = vmatpush1.bf16.msra.mxu0 %v7591_v48  ;;  %5452 = vmatpush1.bf16.msra.mxu1 %v7594_v49  ;;  %v7681_v48 = vld [vmem:[#allocation2 + $0xca0] ss:$16 sps:$4 sm:$0xff]   ;;  %v7684_v49 = vld [vmem:[#allocation2 + $0xca8] ss:$16 sps:$4 sm:$0xff]  }
 0x1b5   :  { %4961 = vmatprep.subr.bf16.mxu0 %v7599_v50  ;;  %5453 = vmatprep.subr.bf16.mxu1 %v7602_v51  ;;  %v7689_v50 = vld [vmem:[#allocation2 + $0xcc4] ss:$16 sps:$4 sm:$0xff]   ;;  %v7692_v51 = vld [vmem:[#allocation2 + $0xccc] ss:$16 sps:$4 sm:$0xff]  }
 0x1b8   :  { %4962 = vmatpush1.bf16.msra.mxu0 %v7597_v52  ;;  %5454 = vmatpush1.bf16.msra.mxu1 %v7600_v53  ;;  %v7687_v52 = vld [vmem:[#allocation2 + $0xcc0] ss:$16 sps:$4 sm:$0xff]   ;;  %v7690_v53 = vld [vmem:[#allocation2 + $0xcc8] ss:$16 sps:$4 sm:$0xff]  }
 0x1b9   :  { %4963 = vmatprep.subr.bf16.mxu0 %v7605_v54  ;;  %5455 = vmatprep.subr.bf16.mxu1 %v7608_v55  ;;  %v7695_v54 = vld [vmem:[#allocation2 + $0xce4] ss:$16 sps:$4 sm:$0xff]   ;;  %v7698_v55 = vld [vmem:[#allocation2 + $0xcec] ss:$16 sps:$4 sm:$0xff]  }
 0x1bc   :  { %4964 = vmatpush1.bf16.msra.mxu0 %v7603_v56  ;;  %5456 = vmatpush1.bf16.msra.mxu1 %v7606_v57  ;;  %v7693_v56 = vld [vmem:[#allocation2 + $0xce0] ss:$16 sps:$4 sm:$0xff]   ;;  %v7696_v57 = vld [vmem:[#allocation2 + $0xce8] ss:$16 sps:$4 sm:$0xff]  }
 0x1bd   :  { %4965 = vmatprep.subr.bf16.mxu0 %v7611_v58  ;;  %5457 = vmatprep.subr.bf16.mxu1 %v7614_v59  ;;  %v7701_v58 = vld [vmem:[#allocation2 + $0xd04] ss:$16 sps:$4 sm:$0xff]   ;;  %v7704_v59 = vld [vmem:[#allocation2 + $0xd0c] ss:$16 sps:$4 sm:$0xff]  }
 0x1c0   :  { %4966 = vmatpush1.bf16.msra.mxu0 %v7609_v60  ;;  %5458 = vmatpush1.bf16.msra.mxu1 %v7612_v61  ;;  %v7699_v60 = vld [vmem:[#allocation2 + $0xd00] ss:$16 sps:$4 sm:$0xff]   ;;  %v7702_v61 = vld [vmem:[#allocation2 + $0xd08] ss:$16 sps:$4 sm:$0xff]  }
 0x1c1   :  { %4967 = vmatprep.subr.bf16.mxu0 %v7617_v62  ;;  %5459 = vmatprep.subr.bf16.mxu1 %v7620_v63  ;;  %v7707_v62 = vld [vmem:[#allocation2 + $0xd24] ss:$16 sps:$4 sm:$0xff]   ;;  %v7710_v63 = vld [vmem:[#allocation2 + $0xd2c] ss:$16 sps:$4 sm:$0xff]  }
 0x1c4   :  { %4968 = vmatpush1.bf16.msra.mxu0 %v7615_v0  ;;  %5460 = vmatpush1.bf16.msra.mxu1 %v7618_v1  ;;  %v7705_v0 = vld [vmem:[#allocation2 + $0xd20] ss:$16 sps:$4 sm:$0xff]   ;;  %v7708_v1 = vld [vmem:[#allocation2 + $0xd28] ss:$16 sps:$4 sm:$0xff]  }
 0x1c5   :  { %4969 = vmatprep.subr.bf16.mxu0 %v7623_v2  ;;  %5461 = vmatprep.subr.bf16.mxu1 %v7626_v3  ;;  %v7713_v2 = vld [vmem:[#allocation2 + $0xd44] ss:$16 sps:$4 sm:$0xff]   ;;  %v7716_v3 = vld [vmem:[#allocation2 + $0xd4c] ss:$16 sps:$4 sm:$0xff]  }
 0x1c8   :  { %4970 = vmatpush1.bf16.msra.mxu0 %v7621_v4  ;;  %5462 = vmatpush1.bf16.msra.mxu1 %v7624_v5  ;;  %v7711_v4 = vld [vmem:[#allocation2 + $0xd40] ss:$16 sps:$4 sm:$0xff]   ;;  %v7714_v5 = vld [vmem:[#allocation2 + $0xd48] ss:$16 sps:$4 sm:$0xff]  }
 0x1c9   :  { %4971 = vmatprep.subr.bf16.mxu0 %v7629_v6  ;;  %5463 = vmatprep.subr.bf16.mxu1 %v7632_v7  ;;  %v7719_v6 = vld [vmem:[#allocation2 + $0xd64] ss:$16 sps:$4 sm:$0xff]   ;;  %v7722_v7 = vld [vmem:[#allocation2 + $0xd6c] ss:$16 sps:$4 sm:$0xff]  }
 0x1cc   :  { %4972 = vmatpush1.bf16.msra.mxu0 %v7627_v8  ;;  %5464 = vmatpush1.bf16.msra.mxu1 %v7630_v9  ;;  %v7717_v8 = vld [vmem:[#allocation2 + $0xd60] ss:$16 sps:$4 sm:$0xff]   ;;  %v7720_v9 = vld [vmem:[#allocation2 + $0xd68] ss:$16 sps:$4 sm:$0xff]  }
 0x1cd   :  { %4973 = vmatprep.subr.bf16.mxu0 %v7635_v10  ;;  %5465 = vmatprep.subr.bf16.mxu1 %v7638_v11  ;;  %v7725_v10 = vld [vmem:[#allocation2 + $0xd84] ss:$16 sps:$4 sm:$0xff]   ;;  %v7728_v11 = vld [vmem:[#allocation2 + $0xd8c] ss:$16 sps:$4 sm:$0xff]  }
 0x1d0   :  { %4974 = vmatpush1.bf16.msra.mxu0 %v7633_v12  ;;  %5466 = vmatpush1.bf16.msra.mxu1 %v7636_v13  ;;  %v7723_v12 = vld [vmem:[#allocation2 + $0xd80] ss:$16 sps:$4 sm:$0xff]   ;;  %v7726_v13 = vld [vmem:[#allocation2 + $0xd88] ss:$16 sps:$4 sm:$0xff]  }
 0x1d1   :  { %4975 = vmatprep.subr.bf16.mxu0 %v7641_v14  ;;  %5467 = vmatprep.subr.bf16.mxu1 %v7644_v15  ;;  %v7731_v14 = vld [vmem:[#allocation2 + $0xda4] ss:$16 sps:$4 sm:$0xff]   ;;  %v7734_v15 = vld [vmem:[#allocation2 + $0xdac] ss:$16 sps:$4 sm:$0xff]  }
 0x1d4   :  { %4976 = vmatpush1.bf16.msra.mxu0 %v7639_v16  ;;  %5468 = vmatpush1.bf16.msra.mxu1 %v7642_v17  ;;  %v7729_v16 = vld [vmem:[#allocation2 + $0xda0] ss:$16 sps:$4 sm:$0xff]   ;;  %v7732_v17 = vld [vmem:[#allocation2 + $0xda8] ss:$16 sps:$4 sm:$0xff]  }
 0x1d5   :  { %4977 = vmatprep.subr.bf16.mxu0 %v7647_v18  ;;  %5469 = vmatprep.subr.bf16.mxu1 %v7650_v19  ;;  %v7737_v18 = vld [vmem:[#allocation2 + $0xdc4] ss:$16 sps:$4 sm:$0xff]   ;;  %v7740_v19 = vld [vmem:[#allocation2 + $0xdcc] ss:$16 sps:$4 sm:$0xff]  }
 0x1d8   :  { %4978 = vmatpush1.bf16.msra.mxu0 %v7645_v20  ;;  %5470 = vmatpush1.bf16.msra.mxu1 %v7648_v21  ;;  %v7735_v20 = vld [vmem:[#allocation2 + $0xdc0] ss:$16 sps:$4 sm:$0xff]   ;;  %v7738_v21 = vld [vmem:[#allocation2 + $0xdc8] ss:$16 sps:$4 sm:$0xff]  }
 0x1d9   :  { %4988 = vmatprep.subr.bf16.mxu0 %v7653_v22  ;;  %5480 = vmatprep.subr.bf16.mxu1 %v7656_v24  ;;  %v7743_v22 = vld [vmem:[#allocation2 + $0xde4] ss:$16 sps:$4 sm:$0xff]   ;;  %v7741_v24 = vld [vmem:[#allocation2 + $0xde0] ss:$16 sps:$4 sm:$0xff]  }
 0x1db   :  { %4980 = vmatmul.mubr.bf16.vlgmr.msra.gmra.mrb[0].mxu0 %v120_v26  ;;  %5472 = vmatmul.mubr.bf16.vlgmr.msra.gmra.mrb[0].mxu1 %v120_v26  ;;  %v7749_v26 = vld [vmem:[#allocation2 + $0xe04] ss:$16 sps:$4 sm:$0xff]  }
 0x1dc   :  { %4989 = vmatpush1.bf16.msra.mxu0 %v7651_v27  ;;  %5481 = vmatpush1.bf16.msra.mxu1 %v7654_v28  ;;  %v98_v27 = vld [vmem:[%s8561_s0 + $0x60] sm:$0xff]  ;;  %v7752_v28 = vld [vmem:[#allocation2 + $0xe0c] ss:$16 sps:$4 sm:$0xff]  }
 0x1dd   :  { %4990 = vmatprep.subr.bf16.mxu0 %v7659_v29  ;;  %5482 = vmatprep.subr.bf16.mxu1 %v7662_v30  ;;  %v101_v29 = vld [vmem:[%s8561_s0 + $0x78] sm:$0xff]  ;;  %v122_v30 = vpack.c.bf16 %v98_v27, %v98_v27 }
 0x1de   :  { %5020 = vmatprep.mubr.bf16.mxu0 %v123_v31  ;;  %5512 = vmatprep.mubr.bf16.mxu1 %v123_v31  ;;  %v7747_v31 = vld [vmem:[#allocation2 + $0xe00] ss:$16 sps:$4 sm:$0xff]   ;;  %v7842_v27 = vld [vmem:[#allocation2 + $0xfec] ss:$16 sps:$4 sm:$0xff]  }
 0x1e0   :  { %4991 = vmatpush1.bf16.msra.mxu0 %v7657_v32  ;;  %5483 = vmatpush1.bf16.msra.mxu1 %v7660_v33  ;;  %v7750_v32 = vld [vmem:[#allocation2 + $0xe08] ss:$16 sps:$4 sm:$0xff]   ;;  %v7755_v33 = vld [vmem:[#allocation2 + $0xe24] ss:$16 sps:$4 sm:$0xff]  }
 0x1e1   :  { %4992 = vmatprep.subr.bf16.mxu0 %v7665_v34  ;;  %5484 = vmatprep.subr.bf16.mxu1 %v7668_v35  ;;  %v7758_v34 = vld [vmem:[#allocation2 + $0xe2c] ss:$16 sps:$4 sm:$0xff]   ;;  %v125_v35 = vpack.c.bf16 %v101_v29, %v101_v29  ;;  %v7840_v29 = vld [vmem:[#allocation2 + $0xfe8] ss:$16 sps:$4 sm:$0xff]  }
 0x1e4   :  { %4993 = vmatpush1.bf16.msra.mxu0 %v7663_v36  ;;  %5485 = vmatpush1.bf16.msra.mxu1 %v7666_v37  ;;  %v7753_v36 = vld [vmem:[#allocation2 + $0xe20] ss:$16 sps:$4 sm:$0xff]   ;;  %v7756_v37 = vld [vmem:[#allocation2 + $0xe28] ss:$16 sps:$4 sm:$0xff]  }
 0x1e5   :  { %4994 = vmatprep.subr.bf16.mxu0 %v7671_v38  ;;  %5486 = vmatprep.subr.bf16.mxu1 %v7674_v39  ;;  %v7761_v38 = vld [vmem:[#allocation2 + $0xe44] ss:$16 sps:$4 sm:$0xff]   ;;  %v7764_v39 = vld [vmem:[#allocation2 + $0xe4c] ss:$16 sps:$4 sm:$0xff]  }
 0x1e8   :  { %4995 = vmatpush1.bf16.msra.mxu0 %v7669_v40  ;;  %5487 = vmatpush1.bf16.msra.mxu1 %v7672_v41  ;;  %v7759_v40 = vld [vmem:[#allocation2 + $0xe40] ss:$16 sps:$4 sm:$0xff]   ;;  %v7762_v41 = vld [vmem:[#allocation2 + $0xe48] ss:$16 sps:$4 sm:$0xff]  }
 0x1e9   :  { %4996 = vmatprep.subr.bf16.mxu0 %v7677_v42  ;;  %5488 = vmatprep.subr.bf16.mxu1 %v7680_v43  ;;  %v7767_v42 = vld [vmem:[#allocation2 + $0xe64] ss:$16 sps:$4 sm:$0xff]   ;;  %v7770_v43 = vld [vmem:[#allocation2 + $0xe6c] ss:$16 sps:$4 sm:$0xff]  }
 0x1ec   :  { %4997 = vmatpush1.bf16.msra.mxu0 %v7675_v44  ;;  %5489 = vmatpush1.bf16.msra.mxu1 %v7678_v45  ;;  %v7765_v44 = vld [vmem:[#allocation2 + $0xe60] ss:$16 sps:$4 sm:$0xff]   ;;  %v7768_v45 = vld [vmem:[#allocation2 + $0xe68] ss:$16 sps:$4 sm:$0xff]  }
 0x1ed   :  { %4998 = vmatprep.subr.bf16.mxu0 %v7683_v46  ;;  %5490 = vmatprep.subr.bf16.mxu1 %v7686_v47  ;;  %v7773_v46 = vld [vmem:[#allocation2 + $0xe84] ss:$16 sps:$4 sm:$0xff]   ;;  %v7776_v47 = vld [vmem:[#allocation2 + $0xe8c] ss:$16 sps:$4 sm:$0xff]  }
 0x1f0   :  { %4999 = vmatpush1.bf16.msra.mxu0 %v7681_v48  ;;  %5491 = vmatpush1.bf16.msra.mxu1 %v7684_v49  ;;  %v7771_v48 = vld [vmem:[#allocation2 + $0xe80] ss:$16 sps:$4 sm:$0xff]   ;;  %v7774_v49 = vld [vmem:[#allocation2 + $0xe88] ss:$16 sps:$4 sm:$0xff]  }
 0x1f1   :  { %5000 = vmatprep.subr.bf16.mxu0 %v7689_v50  ;;  %5492 = vmatprep.subr.bf16.mxu1 %v7692_v51  ;;  %v7779_v50 = vld [vmem:[#allocation2 + $0xea4] ss:$16 sps:$4 sm:$0xff]   ;;  %v7782_v51 = vld [vmem:[#allocation2 + $0xeac] ss:$16 sps:$4 sm:$0xff]  }
 0x1f4   :  { %5001 = vmatpush1.bf16.msra.mxu0 %v7687_v52  ;;  %5493 = vmatpush1.bf16.msra.mxu1 %v7690_v53  ;;  %v7777_v52 = vld [vmem:[#allocation2 + $0xea0] ss:$16 sps:$4 sm:$0xff]   ;;  %v7780_v53 = vld [vmem:[#allocation2 + $0xea8] ss:$16 sps:$4 sm:$0xff]  }
 0x1f5   :  { %5002 = vmatprep.subr.bf16.mxu0 %v7695_v54  ;;  %5494 = vmatprep.subr.bf16.mxu1 %v7698_v55  ;;  %v7785_v54 = vld [vmem:[#allocation2 + $0xec4] ss:$16 sps:$4 sm:$0xff]   ;;  %v7788_v55 = vld [vmem:[#allocation2 + $0xecc] ss:$16 sps:$4 sm:$0xff]  }
 0x1f8   :  { %5003 = vmatpush1.bf16.msra.mxu0 %v7693_v56  ;;  %5495 = vmatpush1.bf16.msra.mxu1 %v7696_v57  ;;  %v7783_v56 = vld [vmem:[#allocation2 + $0xec0] ss:$16 sps:$4 sm:$0xff]   ;;  %v7786_v57 = vld [vmem:[#allocation2 + $0xec8] ss:$16 sps:$4 sm:$0xff]  }
 0x1f9   :  { %5004 = vmatprep.subr.bf16.mxu0 %v7701_v58  ;;  %5496 = vmatprep.subr.bf16.mxu1 %v7704_v59  ;;  %v7791_v58 = vld [vmem:[#allocation2 + $0xee4] ss:$16 sps:$4 sm:$0xff]   ;;  %v7794_v59 = vld [vmem:[#allocation2 + $0xeec] ss:$16 sps:$4 sm:$0xff]  }
 0x1fc   :  { %5005 = vmatpush1.bf16.msra.mxu0 %v7699_v60  ;;  %5497 = vmatpush1.bf16.msra.mxu1 %v7702_v61  ;;  %v7789_v60 = vld [vmem:[#allocation2 + $0xee0] ss:$16 sps:$4 sm:$0xff]   ;;  %v7792_v61 = vld [vmem:[#allocation2 + $0xee8] ss:$16 sps:$4 sm:$0xff]  }
 0x1fd   :  { %5006 = vmatprep.subr.bf16.mxu0 %v7707_v62  ;;  %5498 = vmatprep.subr.bf16.mxu1 %v7710_v63  ;;  %v7797_v62 = vld [vmem:[#allocation2 + $0xf04] ss:$16 sps:$4 sm:$0xff]   ;;  %v7800_v63 = vld [vmem:[#allocation2 + $0xf0c] ss:$16 sps:$4 sm:$0xff]  }
 0x200   :  { %5007 = vmatpush1.bf16.msra.mxu0 %v7705_v0  ;;  %5499 = vmatpush1.bf16.msra.mxu1 %v7708_v1  ;;  %v7795_v0 = vld [vmem:[#allocation2 + $0xf00] ss:$16 sps:$4 sm:$0xff]   ;;  %v7798_v1 = vld [vmem:[#allocation2 + $0xf08] ss:$16 sps:$4 sm:$0xff]  }
 0x201   :  { %5008 = vmatprep.subr.bf16.mxu0 %v7713_v2  ;;  %5500 = vmatprep.subr.bf16.mxu1 %v7716_v3  ;;  %v7803_v2 = vld [vmem:[#allocation2 + $0xf24] ss:$16 sps:$4 sm:$0xff]   ;;  %v7806_v3 = vld [vmem:[#allocation2 + $0xf2c] ss:$16 sps:$4 sm:$0xff]  }
 0x204   :  { %5009 = vmatpush1.bf16.msra.mxu0 %v7711_v4  ;;  %5501 = vmatpush1.bf16.msra.mxu1 %v7714_v5  ;;  %v7801_v4 = vld [vmem:[#allocation2 + $0xf20] ss:$16 sps:$4 sm:$0xff]   ;;  %v7804_v5 = vld [vmem:[#allocation2 + $0xf28] ss:$16 sps:$4 sm:$0xff]  }
 0x205   :  { %5010 = vmatprep.subr.bf16.mxu0 %v7719_v6  ;;  %5502 = vmatprep.subr.bf16.mxu1 %v7722_v7  ;;  %v7809_v6 = vld [vmem:[#allocation2 + $0xf44] ss:$16 sps:$4 sm:$0xff]   ;;  %v7812_v7 = vld [vmem:[#allocation2 + $0xf4c] ss:$16 sps:$4 sm:$0xff]  }
 0x208   :  { %5011 = vmatpush1.bf16.msra.mxu0 %v7717_v8  ;;  %5503 = vmatpush1.bf16.msra.mxu1 %v7720_v9  ;;  %v7807_v8 = vld [vmem:[#allocation2 + $0xf40] ss:$16 sps:$4 sm:$0xff]   ;;  %v7810_v9 = vld [vmem:[#allocation2 + $0xf48] ss:$16 sps:$4 sm:$0xff]  }
 0x209   :  { %5012 = vmatprep.subr.bf16.mxu0 %v7725_v10  ;;  %5504 = vmatprep.subr.bf16.mxu1 %v7728_v11  ;;  %v7815_v10 = vld [vmem:[#allocation2 + $0xf64] ss:$16 sps:$4 sm:$0xff]   ;;  %v7818_v11 = vld [vmem:[#allocation2 + $0xf6c] ss:$16 sps:$4 sm:$0xff]  }
 0x20c   :  { %5013 = vmatpush1.bf16.msra.mxu0 %v7723_v12  ;;  %5505 = vmatpush1.bf16.msra.mxu1 %v7726_v13  ;;  %v7813_v12 = vld [vmem:[#allocation2 + $0xf60] ss:$16 sps:$4 sm:$0xff]   ;;  %v7816_v13 = vld [vmem:[#allocation2 + $0xf68] ss:$16 sps:$4 sm:$0xff]  }
 0x20d   :  { %5014 = vmatprep.subr.bf16.mxu0 %v7731_v14  ;;  %5506 = vmatprep.subr.bf16.mxu1 %v7734_v15  ;;  %v7821_v14 = vld [vmem:[#allocation2 + $0xf84] ss:$16 sps:$4 sm:$0xff]   ;;  %v7824_v15 = vld [vmem:[#allocation2 + $0xf8c] ss:$16 sps:$4 sm:$0xff]  }
 0x210   :  { %5015 = vmatpush1.bf16.msra.mxu0 %v7729_v16  ;;  %5507 = vmatpush1.bf16.msra.mxu1 %v7732_v17  ;;  %v7819_v16 = vld [vmem:[#allocation2 + $0xf80] ss:$16 sps:$4 sm:$0xff]   ;;  %v7822_v17 = vld [vmem:[#allocation2 + $0xf88] ss:$16 sps:$4 sm:$0xff]  }
 0x211   :  { %5016 = vmatprep.subr.bf16.mxu0 %v7737_v18  ;;  %5508 = vmatprep.subr.bf16.mxu1 %v7740_v19  ;;  %v7827_v18 = vld [vmem:[#allocation2 + $0xfa4] ss:$16 sps:$4 sm:$0xff]   ;;  %v7830_v19 = vld [vmem:[#allocation2 + $0xfac] ss:$16 sps:$4 sm:$0xff]  }
 0x214   :  { %5017 = vmatpush1.bf16.msra.mxu0 %v7735_v20  ;;  %5509 = vmatpush1.bf16.msra.mxu1 %v7738_v21  ;;  %v7825_v20 = vld [vmem:[#allocation2 + $0xfa0] ss:$16 sps:$4 sm:$0xff]   ;;  %v7828_v21 = vld [vmem:[#allocation2 + $0xfa8] ss:$16 sps:$4 sm:$0xff]  }
 0x215   :  { %5018 = vmatprep.subr.bf16.mxu0 %v7743_v22  ;;  %5510 = vmatprep.subr.bf16.mxu1 %v7746_v23  ;;  %v7833_v22 = vld [vmem:[#allocation2 + $0xfc4] ss:$16 sps:$4 sm:$0xff]   ;;  %v7836_v23 = vld [vmem:[#allocation2 + $0xfcc] ss:$16 sps:$4 sm:$0xff]  }
 0x218   :  { %5019 = vmatpush1.bf16.msra.mxu0 %v7741_v24  ;;  %5511 = vmatpush1.bf16.msra.mxu1 %v7744_v25  ;;  %v7831_v24 = vld [vmem:[#allocation2 + $0xfc0] ss:$16 sps:$4 sm:$0xff]   ;;  %v7834_v25 = vld [vmem:[#allocation2 + $0xfc8] ss:$16 sps:$4 sm:$0xff]  }
 0x219   :  { %5029 = vmatprep.subr.bf16.mxu0 %v7749_v26  ;;  %5521 = vmatprep.subr.bf16.mxu1 %v7752_v28  ;;  %v7839_v26 = vld [vmem:[#allocation2 + $0xfe4] ss:$16 sps:$4 sm:$0xff]   ;;  %v7837_v28 = vld [vmem:[#allocation2 + $0xfe0] ss:$16 sps:$4 sm:$0xff]  }
 0x21b   :  { %5021 = vmatmul.mubr.bf16.vlgmr.msra.gmra.mrb[0].mxu0 %v122_v30  ;;  %5513 = vmatmul.mubr.bf16.vlgmr.msra.gmra.mrb[0].mxu1 %v122_v30  ;;  %v100_v30 = vld [vmem:[%s8561_s0 + $0x70] sm:$0xff] }
 0x21c   :  { %5030 = vmatpush1.bf16.msra.mxu0 %v7747_v31  ;;  %5522 = vmatpush1.bf16.msra.mxu1 %v7750_v32  ;;  %v7845_v31 = vld [vmem:[#allocation2 + $0x1004] ss:$16 sps:$4 sm:$0xff]   ;;  %v7848_v32 = vld [vmem:[#allocation2 + $0x100c] ss:$16 sps:$4 sm:$0xff]  }
 0x21d   :  { %5031 = vmatprep.subr.bf16.mxu0 %v7755_v33  ;;  %5523 = vmatprep.subr.bf16.mxu1 %v7758_v34  ;;  %v124_v33 = vpack.c.bf16 %v100_v30, %v100_v30  ;;  %v103_v34 = vld [vmem:[%s8561_s0 + $0x88] sm:$0xff]  ;;  %v7935_v30 = vld [vmem:[#allocation2 + $0x11e4] ss:$16 sps:$4 sm:$0xff]  }
 0x21e   :  { %5061 = vmatprep.mubr.bf16.mxu0 %v125_v35  ;;  %5553 = vmatprep.mubr.bf16.mxu1 %v125_v35  ;;  %v7843_v35 = vld [vmem:[#allocation2 + $0x1000] ss:$16 sps:$4 sm:$0xff]  }
 0x220   :  { %5032 = vmatpush1.bf16.msra.mxu0 %v7753_v36  ;;  %5524 = vmatpush1.bf16.msra.mxu1 %v7756_v37  ;;  %v7846_v36 = vld [vmem:[#allocation2 + $0x1008] ss:$16 sps:$4 sm:$0xff]   ;;  %v7851_v37 = vld [vmem:[#allocation2 + $0x1024] ss:$16 sps:$4 sm:$0xff]  }
 0x221   :  { %5033 = vmatprep.subr.bf16.mxu0 %v7761_v38  ;;  %5525 = vmatprep.subr.bf16.mxu1 %v7764_v39  ;;  %v7854_v38 = vld [vmem:[#allocation2 + $0x102c] ss:$16 sps:$4 sm:$0xff]   ;;  %v127_v39 = vpack.c.bf16 %v103_v34, %v103_v34  ;;  %v102_v34 = vld [vmem:[%s8561_s0 + $0x80] sm:$0xff] }
 0x224   :  { %5034 = vmatpush1.bf16.msra.mxu0 %v7759_v40  ;;  %5526 = vmatpush1.bf16.msra.mxu1 %v7762_v41  ;;  %v7849_v40 = vld [vmem:[#allocation2 + $0x1020] ss:$16 sps:$4 sm:$0xff]   ;;  %v7852_v41 = vld [vmem:[#allocation2 + $0x1028] ss:$16 sps:$4 sm:$0xff]  }
 0x225   :  { %5035 = vmatprep.subr.bf16.mxu0 %v7767_v42  ;;  %5527 = vmatprep.subr.bf16.mxu1 %v7770_v43  ;;  %v7857_v42 = vld [vmem:[#allocation2 + $0x1044] ss:$16 sps:$4 sm:$0xff]   ;;  %v7860_v43 = vld [vmem:[#allocation2 + $0x104c] ss:$16 sps:$4 sm:$0xff]  }
 0x228   :  { %5036 = vmatpush1.bf16.msra.mxu0 %v7765_v44  ;;  %5528 = vmatpush1.bf16.msra.mxu1 %v7768_v45  ;;  %v7855_v44 = vld [vmem:[#allocation2 + $0x1040] ss:$16 sps:$4 sm:$0xff]   ;;  %v7858_v45 = vld [vmem:[#allocation2 + $0x1048] ss:$16 sps:$4 sm:$0xff]  }
 0x229   :  { %5037 = vmatprep.subr.bf16.mxu0 %v7773_v46  ;;  %5529 = vmatprep.subr.bf16.mxu1 %v7776_v47  ;;  %v7863_v46 = vld [vmem:[#allocation2 + $0x1064] ss:$16 sps:$4 sm:$0xff]   ;;  %v7866_v47 = vld [vmem:[#allocation2 + $0x106c] ss:$16 sps:$4 sm:$0xff]  }
 0x22c   :  { %5038 = vmatpush1.bf16.msra.mxu0 %v7771_v48  ;;  %5530 = vmatpush1.bf16.msra.mxu1 %v7774_v49  ;;  %v7861_v48 = vld [vmem:[#allocation2 + $0x1060] ss:$16 sps:$4 sm:$0xff]   ;;  %v7864_v49 = vld [vmem:[#allocation2 + $0x1068] ss:$16 sps:$4 sm:$0xff]  }
 0x22d   :  { %5039 = vmatprep.subr.bf16.mxu0 %v7779_v50  ;;  %5531 = vmatprep.subr.bf16.mxu1 %v7782_v51  ;;  %v7869_v50 = vld [vmem:[#allocation2 + $0x1084] ss:$16 sps:$4 sm:$0xff]   ;;  %v7872_v51 = vld [vmem:[#allocation2 + $0x108c] ss:$16 sps:$4 sm:$0xff]  }
 0x230   :  { %5040 = vmatpush1.bf16.msra.mxu0 %v7777_v52  ;;  %5532 = vmatpush1.bf16.msra.mxu1 %v7780_v53  ;;  %v7867_v52 = vld [vmem:[#allocation2 + $0x1080] ss:$16 sps:$4 sm:$0xff]   ;;  %v7870_v53 = vld [vmem:[#allocation2 + $0x1088] ss:$16 sps:$4 sm:$0xff]  }
 0x231   :  { %5041 = vmatprep.subr.bf16.mxu0 %v7785_v54  ;;  %5533 = vmatprep.subr.bf16.mxu1 %v7788_v55  ;;  %v7875_v54 = vld [vmem:[#allocation2 + $0x10a4] ss:$16 sps:$4 sm:$0xff]   ;;  %v7878_v55 = vld [vmem:[#allocation2 + $0x10ac] ss:$16 sps:$4 sm:$0xff]  }
 0x234   :  { %5042 = vmatpush1.bf16.msra.mxu0 %v7783_v56  ;;  %5534 = vmatpush1.bf16.msra.mxu1 %v7786_v57  ;;  %v7873_v56 = vld [vmem:[#allocation2 + $0x10a0] ss:$16 sps:$4 sm:$0xff]   ;;  %v7876_v57 = vld [vmem:[#allocation2 + $0x10a8] ss:$16 sps:$4 sm:$0xff]  }
 0x235   :  { %5043 = vmatprep.subr.bf16.mxu0 %v7791_v58  ;;  %5535 = vmatprep.subr.bf16.mxu1 %v7794_v59  ;;  %v7881_v58 = vld [vmem:[#allocation2 + $0x10c4] ss:$16 sps:$4 sm:$0xff]   ;;  %v7884_v59 = vld [vmem:[#allocation2 + $0x10cc] ss:$16 sps:$4 sm:$0xff]  }
 0x238   :  { %5044 = vmatpush1.bf16.msra.mxu0 %v7789_v60  ;;  %5536 = vmatpush1.bf16.msra.mxu1 %v7792_v61  ;;  %v7879_v60 = vld [vmem:[#allocation2 + $0x10c0] ss:$16 sps:$4 sm:$0xff]   ;;  %v7882_v61 = vld [vmem:[#allocation2 + $0x10c8] ss:$16 sps:$4 sm:$0xff]  }
 0x239   :  { %5045 = vmatprep.subr.bf16.mxu0 %v7797_v62  ;;  %5537 = vmatprep.subr.bf16.mxu1 %v7800_v63  ;;  %v7887_v62 = vld [vmem:[#allocation2 + $0x10e4] ss:$16 sps:$4 sm:$0xff]   ;;  %v7890_v63 = vld [vmem:[#allocation2 + $0x10ec] ss:$16 sps:$4 sm:$0xff]  }
 0x23c   :  { %5046 = vmatpush1.bf16.msra.mxu0 %v7795_v0  ;;  %5538 = vmatpush1.bf16.msra.mxu1 %v7798_v1  ;;  %v7885_v0 = vld [vmem:[#allocation2 + $0x10e0] ss:$16 sps:$4 sm:$0xff]   ;;  %v7888_v1 = vld [vmem:[#allocation2 + $0x10e8] ss:$16 sps:$4 sm:$0xff]  }
 0x23d   :  { %5047 = vmatprep.subr.bf16.mxu0 %v7803_v2  ;;  %5539 = vmatprep.subr.bf16.mxu1 %v7806_v3  ;;  %v7893_v2 = vld [vmem:[#allocation2 + $0x1104] ss:$16 sps:$4 sm:$0xff]   ;;  %v7896_v3 = vld [vmem:[#allocation2 + $0x110c] ss:$16 sps:$4 sm:$0xff]  }
 0x240   :  { %5048 = vmatpush1.bf16.msra.mxu0 %v7801_v4  ;;  %5540 = vmatpush1.bf16.msra.mxu1 %v7804_v5  ;;  %v7891_v4 = vld [vmem:[#allocation2 + $0x1100] ss:$16 sps:$4 sm:$0xff]   ;;  %v7894_v5 = vld [vmem:[#allocation2 + $0x1108] ss:$16 sps:$4 sm:$0xff]  }
 0x241   :  { %5049 = vmatprep.subr.bf16.mxu0 %v7809_v6  ;;  %5541 = vmatprep.subr.bf16.mxu1 %v7812_v7  ;;  %v7899_v6 = vld [vmem:[#allocation2 + $0x1124] ss:$16 sps:$4 sm:$0xff]   ;;  %v7902_v7 = vld [vmem:[#allocation2 + $0x112c] ss:$16 sps:$4 sm:$0xff]  }
 0x244   :  { %5050 = vmatpush1.bf16.msra.mxu0 %v7807_v8  ;;  %5542 = vmatpush1.bf16.msra.mxu1 %v7810_v9  ;;  %v7897_v8 = vld [vmem:[#allocation2 + $0x1120] ss:$16 sps:$4 sm:$0xff]   ;;  %v7900_v9 = vld [vmem:[#allocation2 + $0x1128] ss:$16 sps:$4 sm:$0xff]  }
 0x245   :  { %5051 = vmatprep.subr.bf16.mxu0 %v7815_v10  ;;  %5543 = vmatprep.subr.bf16.mxu1 %v7818_v11  ;;  %v7905_v10 = vld [vmem:[#allocation2 + $0x1144] ss:$16 sps:$4 sm:$0xff]   ;;  %v7908_v11 = vld [vmem:[#allocation2 + $0x114c] ss:$16 sps:$4 sm:$0xff]  }
 0x248   :  { %5052 = vmatpush1.bf16.msra.mxu0 %v7813_v12  ;;  %5544 = vmatpush1.bf16.msra.mxu1 %v7816_v13  ;;  %v7903_v12 = vld [vmem:[#allocation2 + $0x1140] ss:$16 sps:$4 sm:$0xff]   ;;  %v7906_v13 = vld [vmem:[#allocation2 + $0x1148] ss:$16 sps:$4 sm:$0xff]  }
 0x249   :  { %5053 = vmatprep.subr.bf16.mxu0 %v7821_v14  ;;  %5545 = vmatprep.subr.bf16.mxu1 %v7824_v15  ;;  %v7911_v14 = vld [vmem:[#allocation2 + $0x1164] ss:$16 sps:$4 sm:$0xff]   ;;  %v7914_v15 = vld [vmem:[#allocation2 + $0x116c] ss:$16 sps:$4 sm:$0xff]  }
 0x24c   :  { %5054 = vmatpush1.bf16.msra.mxu0 %v7819_v16  ;;  %5546 = vmatpush1.bf16.msra.mxu1 %v7822_v17  ;;  %v7909_v16 = vld [vmem:[#allocation2 + $0x1160] ss:$16 sps:$4 sm:$0xff]   ;;  %v7912_v17 = vld [vmem:[#allocation2 + $0x1168] ss:$16 sps:$4 sm:$0xff]  }
 0x24d   :  { %5055 = vmatprep.subr.bf16.mxu0 %v7827_v18  ;;  %5547 = vmatprep.subr.bf16.mxu1 %v7830_v19  ;;  %v7917_v18 = vld [vmem:[#allocation2 + $0x1184] ss:$16 sps:$4 sm:$0xff]   ;;  %v7920_v19 = vld [vmem:[#allocation2 + $0x118c] ss:$16 sps:$4 sm:$0xff]  }
 0x250   :  { %5056 = vmatpush1.bf16.msra.mxu0 %v7825_v20  ;;  %5548 = vmatpush1.bf16.msra.mxu1 %v7828_v21  ;;  %v7915_v20 = vld [vmem:[#allocation2 + $0x1180] ss:$16 sps:$4 sm:$0xff]   ;;  %v7918_v21 = vld [vmem:[#allocation2 + $0x1188] ss:$16 sps:$4 sm:$0xff]  }
 0x251   :  { %5057 = vmatprep.subr.bf16.mxu0 %v7833_v22  ;;  %5549 = vmatprep.subr.bf16.mxu1 %v7836_v23  ;;  %v7923_v22 = vld [vmem:[#allocation2 + $0x11a4] ss:$16 sps:$4 sm:$0xff]   ;;  %v7926_v23 = vld [vmem:[#allocation2 + $0x11ac] ss:$16 sps:$4 sm:$0xff]  }
 0x254   :  { %5058 = vmatpush1.bf16.msra.mxu0 %v7831_v24  ;;  %5550 = vmatpush1.bf16.msra.mxu1 %v7834_v25  ;;  %v7921_v24 = vld [vmem:[#allocation2 + $0x11a0] ss:$16 sps:$4 sm:$0xff]   ;;  %v7924_v25 = vld [vmem:[#allocation2 + $0x11a8] ss:$16 sps:$4 sm:$0xff]  }
 0x255   :  { %5059 = vmatprep.subr.bf16.mxu0 %v7839_v26  ;;  %5551 = vmatprep.subr.bf16.mxu1 %v7842_v27  ;;  %v7929_v26 = vld [vmem:[#allocation2 + $0x11c4] ss:$16 sps:$4 sm:$0xff]   ;;  %v7932_v27 = vld [vmem:[#allocation2 + $0x11cc] ss:$16 sps:$4 sm:$0xff]  }
 0x258   :  { %5060 = vmatpush1.bf16.msra.mxu0 %v7837_v28  ;;  %5552 = vmatpush1.bf16.msra.mxu1 %v7840_v29  ;;  %v7927_v28 = vld [vmem:[#allocation2 + $0x11c0] ss:$16 sps:$4 sm:$0xff]   ;;  %v7930_v29 = vld [vmem:[#allocation2 + $0x11c8] ss:$16 sps:$4 sm:$0xff]  }
 0x259   :  { %5070 = vmatprep.subr.bf16.mxu0 %v7845_v31  ;;  %5562 = vmatprep.subr.bf16.mxu1 %v7848_v32  ;;  %v7938_v31 = vld [vmem:[#allocation2 + $0x11ec] ss:$16 sps:$4 sm:$0xff]   ;;  %v7933_v32 = vld [vmem:[#allocation2 + $0x11e0] ss:$16 sps:$4 sm:$0xff]  }
 0x25b   :  { %5062 = vmatmul.mubr.bf16.vlgmr.msra.gmra.mrb[0].mxu0 %v124_v33  ;;  %5554 = vmatmul.mubr.bf16.vlgmr.msra.gmra.mrb[0].mxu1 %v124_v33  ;;  %v7936_v33 = vld [vmem:[#allocation2 + $0x11e8] ss:$16 sps:$4 sm:$0xff]  }
 0x25c   :  { %5071 = vmatpush1.bf16.msra.mxu0 %v7843_v35  ;;  %5563 = vmatpush1.bf16.msra.mxu1 %v7846_v36  ;;  %v7941_v35 = vld [vmem:[#allocation2 + $0x1204] ss:$16 sps:$4 sm:$0xff]   ;;  %v7944_v36 = vld [vmem:[#allocation2 + $0x120c] ss:$16 sps:$4 sm:$0xff]  }
 0x25d   :  { %5072 = vmatprep.subr.bf16.mxu0 %v7851_v37  ;;  %5564 = vmatprep.subr.bf16.mxu1 %v7854_v38  ;;  %v126_v37 = vpack.c.bf16 %v102_v34, %v102_v34  ;;  %v105_v38 = vld [vmem:[%s8561_s0 + $0x98] sm:$0xff]  ;;  %v8031_v34 = vld [vmem:[#allocation2 + $0x13e4] ss:$16 sps:$4 sm:$0xff]  }
 0x25e   :  { %5102 = vmatprep.mubr.bf16.mxu0 %v127_v39  ;;  %5594 = vmatprep.mubr.bf16.mxu1 %v127_v39  ;;  %v7939_v39 = vld [vmem:[#allocation2 + $0x1200] ss:$16 sps:$4 sm:$0xff]  }
 0x260   :  { %5073 = vmatpush1.bf16.msra.mxu0 %v7849_v40  ;;  %5565 = vmatpush1.bf16.msra.mxu1 %v7852_v41  ;;  %v7942_v40 = vld [vmem:[#allocation2 + $0x1208] ss:$16 sps:$4 sm:$0xff]   ;;  %v7947_v41 = vld [vmem:[#allocation2 + $0x1224] ss:$16 sps:$4 sm:$0xff]  }
 0x261   :  { %5074 = vmatprep.subr.bf16.mxu0 %v7857_v42  ;;  %5566 = vmatprep.subr.bf16.mxu1 %v7860_v43  ;;  %v7950_v42 = vld [vmem:[#allocation2 + $0x122c] ss:$16 sps:$4 sm:$0xff]   ;;  %v129_v43 = vpack.c.bf16 %v105_v38, %v105_v38  ;;  %v104_v38 = vld [vmem:[%s8561_s0 + $0x90] sm:$0xff] }
 0x264   :  { %5075 = vmatpush1.bf16.msra.mxu0 %v7855_v44  ;;  %5567 = vmatpush1.bf16.msra.mxu1 %v7858_v45  ;;  %v7945_v44 = vld [vmem:[#allocation2 + $0x1220] ss:$16 sps:$4 sm:$0xff]   ;;  %v7948_v45 = vld [vmem:[#allocation2 + $0x1228] ss:$16 sps:$4 sm:$0xff]  }
 0x265   :  { %5076 = vmatprep.subr.bf16.mxu0 %v7863_v46  ;;  %5568 = vmatprep.subr.bf16.mxu1 %v7866_v47  ;;  %v7953_v46 = vld [vmem:[#allocation2 + $0x1244] ss:$16 sps:$4 sm:$0xff]   ;;  %v7956_v47 = vld [vmem:[#allocation2 + $0x124c] ss:$16 sps:$4 sm:$0xff]  }
 0x268   :  { %5077 = vmatpush1.bf16.msra.mxu0 %v7861_v48  ;;  %5569 = vmatpush1.bf16.msra.mxu1 %v7864_v49  ;;  %v7951_v48 = vld [vmem:[#allocation2 + $0x1240] ss:$16 sps:$4 sm:$0xff]   ;;  %v7954_v49 = vld [vmem:[#allocation2 + $0x1248] ss:$16 sps:$4 sm:$0xff]  }
 0x269   :  { %5078 = vmatprep.subr.bf16.mxu0 %v7869_v50  ;;  %5570 = vmatprep.subr.bf16.mxu1 %v7872_v51  ;;  %v7959_v50 = vld [vmem:[#allocation2 + $0x1264] ss:$16 sps:$4 sm:$0xff]   ;;  %v7962_v51 = vld [vmem:[#allocation2 + $0x126c] ss:$16 sps:$4 sm:$0xff]  }
 0x26c   :  { %5079 = vmatpush1.bf16.msra.mxu0 %v7867_v52  ;;  %5571 = vmatpush1.bf16.msra.mxu1 %v7870_v53  ;;  %v7957_v52 = vld [vmem:[#allocation2 + $0x1260] ss:$16 sps:$4 sm:$0xff]   ;;  %v7960_v53 = vld [vmem:[#allocation2 + $0x1268] ss:$16 sps:$4 sm:$0xff]  }
 0x26d   :  { %5080 = vmatprep.subr.bf16.mxu0 %v7875_v54  ;;  %5572 = vmatprep.subr.bf16.mxu1 %v7878_v55  ;;  %v7965_v54 = vld [vmem:[#allocation2 + $0x1284] ss:$16 sps:$4 sm:$0xff]   ;;  %v7968_v55 = vld [vmem:[#allocation2 + $0x128c] ss:$16 sps:$4 sm:$0xff]  }
 0x270   :  { %5081 = vmatpush1.bf16.msra.mxu0 %v7873_v56  ;;  %5573 = vmatpush1.bf16.msra.mxu1 %v7876_v57  ;;  %v7963_v56 = vld [vmem:[#allocation2 + $0x1280] ss:$16 sps:$4 sm:$0xff]   ;;  %v7966_v57 = vld [vmem:[#allocation2 + $0x1288] ss:$16 sps:$4 sm:$0xff]  }
 0x271   :  { %5082 = vmatprep.subr.bf16.mxu0 %v7881_v58  ;;  %5574 = vmatprep.subr.bf16.mxu1 %v7884_v59  ;;  %v7971_v58 = vld [vmem:[#allocation2 + $0x12a4] ss:$16 sps:$4 sm:$0xff]   ;;  %v7974_v59 = vld [vmem:[#allocation2 + $0x12ac] ss:$16 sps:$4 sm:$0xff]  }
 0x274   :  { %5083 = vmatpush1.bf16.msra.mxu0 %v7879_v60  ;;  %5575 = vmatpush1.bf16.msra.mxu1 %v7882_v61  ;;  %v7969_v60 = vld [vmem:[#allocation2 + $0x12a0] ss:$16 sps:$4 sm:$0xff]   ;;  %v7972_v61 = vld [vmem:[#allocation2 + $0x12a8] ss:$16 sps:$4 sm:$0xff]  }
 0x275   :  { %5084 = vmatprep.subr.bf16.mxu0 %v7887_v62  ;;  %5576 = vmatprep.subr.bf16.mxu1 %v7890_v63  ;;  %v7977_v62 = vld [vmem:[#allocation2 + $0x12c4] ss:$16 sps:$4 sm:$0xff]   ;;  %v7980_v63 = vld [vmem:[#allocation2 + $0x12cc] ss:$16 sps:$4 sm:$0xff]  }
 0x278   :  { %5085 = vmatpush1.bf16.msra.mxu0 %v7885_v0  ;;  %5577 = vmatpush1.bf16.msra.mxu1 %v7888_v1  ;;  %v7975_v0 = vld [vmem:[#allocation2 + $0x12c0] ss:$16 sps:$4 sm:$0xff]   ;;  %v7978_v1 = vld [vmem:[#allocation2 + $0x12c8] ss:$16 sps:$4 sm:$0xff]  }
 0x279   :  { %5086 = vmatprep.subr.bf16.mxu0 %v7893_v2  ;;  %5578 = vmatprep.subr.bf16.mxu1 %v7896_v3  ;;  %v7983_v2 = vld [vmem:[#allocation2 + $0x12e4] ss:$16 sps:$4 sm:$0xff]   ;;  %v7986_v3 = vld [vmem:[#allocation2 + $0x12ec] ss:$16 sps:$4 sm:$0xff]  }
 0x27c   :  { %5087 = vmatpush1.bf16.msra.mxu0 %v7891_v4  ;;  %5579 = vmatpush1.bf16.msra.mxu1 %v7894_v5  ;;  %v7981_v4 = vld [vmem:[#allocation2 + $0x12e0] ss:$16 sps:$4 sm:$0xff]   ;;  %v7984_v5 = vld [vmem:[#allocation2 + $0x12e8] ss:$16 sps:$4 sm:$0xff]  }
 0x27d   :  { %5088 = vmatprep.subr.bf16.mxu0 %v7899_v6  ;;  %5580 = vmatprep.subr.bf16.mxu1 %v7902_v7  ;;  %v7989_v6 = vld [vmem:[#allocation2 + $0x1304] ss:$16 sps:$4 sm:$0xff]   ;;  %v7992_v7 = vld [vmem:[#allocation2 + $0x130c] ss:$16 sps:$4 sm:$0xff]  }
 0x280   :  { %5089 = vmatpush1.bf16.msra.mxu0 %v7897_v8  ;;  %5581 = vmatpush1.bf16.msra.mxu1 %v7900_v9  ;;  %v7987_v8 = vld [vmem:[#allocation2 + $0x1300] ss:$16 sps:$4 sm:$0xff]   ;;  %v7990_v9 = vld [vmem:[#allocation2 + $0x1308] ss:$16 sps:$4 sm:$0xff]  }
 0x281   :  { %5090 = vmatprep.subr.bf16.mxu0 %v7905_v10  ;;  %5582 = vmatprep.subr.bf16.mxu1 %v7908_v11  ;;  %v7995_v10 = vld [vmem:[#allocation2 + $0x1324] ss:$16 sps:$4 sm:$0xff]   ;;  %v7998_v11 = vld [vmem:[#allocation2 + $0x132c] ss:$16 sps:$4 sm:$0xff]  }
 0x284   :  { %5091 = vmatpush1.bf16.msra.mxu0 %v7903_v12  ;;  %5583 = vmatpush1.bf16.msra.mxu1 %v7906_v13  ;;  %v7993_v12 = vld [vmem:[#allocation2 + $0x1320] ss:$16 sps:$4 sm:$0xff]   ;;  %v7996_v13 = vld [vmem:[#allocation2 + $0x1328] ss:$16 sps:$4 sm:$0xff]  }
 0x285   :  { %5092 = vmatprep.subr.bf16.mxu0 %v7911_v14  ;;  %5584 = vmatprep.subr.bf16.mxu1 %v7914_v15  ;;  %v8001_v14 = vld [vmem:[#allocation2 + $0x1344] ss:$16 sps:$4 sm:$0xff]   ;;  %v8004_v15 = vld [vmem:[#allocation2 + $0x134c] ss:$16 sps:$4 sm:$0xff]  }
 0x288   :  { %5093 = vmatpush1.bf16.msra.mxu0 %v7909_v16  ;;  %5585 = vmatpush1.bf16.msra.mxu1 %v7912_v17  ;;  %v7999_v16 = vld [vmem:[#allocation2 + $0x1340] ss:$16 sps:$4 sm:$0xff]   ;;  %v8002_v17 = vld [vmem:[#allocation2 + $0x1348] ss:$16 sps:$4 sm:$0xff]  }
 0x289   :  { %5094 = vmatprep.subr.bf16.mxu0 %v7917_v18  ;;  %5586 = vmatprep.subr.bf16.mxu1 %v7920_v19  ;;  %v8007_v18 = vld [vmem:[#allocation2 + $0x1364] ss:$16 sps:$4 sm:$0xff]   ;;  %v8010_v19 = vld [vmem:[#allocation2 + $0x136c] ss:$16 sps:$4 sm:$0xff]  }
 0x28c   :  { %5095 = vmatpush1.bf16.msra.mxu0 %v7915_v20  ;;  %5587 = vmatpush1.bf16.msra.mxu1 %v7918_v21  ;;  %v8005_v20 = vld [vmem:[#allocation2 + $0x1360] ss:$16 sps:$4 sm:$0xff]   ;;  %v8008_v21 = vld [vmem:[#allocation2 + $0x1368] ss:$16 sps:$4 sm:$0xff]  }
 0x28d   :  { %5096 = vmatprep.subr.bf16.mxu0 %v7923_v22  ;;  %5588 = vmatprep.subr.bf16.mxu1 %v7926_v23  ;;  %v8013_v22 = vld [vmem:[#allocation2 + $0x1384] ss:$16 sps:$4 sm:$0xff]   ;;  %v8016_v23 = vld [vmem:[#allocation2 + $0x138c] ss:$16 sps:$4 sm:$0xff]  }
 0x290   :  { %5097 = vmatpush1.bf16.msra.mxu0 %v7921_v24  ;;  %5589 = vmatpush1.bf16.msra.mxu1 %v7924_v25  ;;  %v8011_v24 = vld [vmem:[#allocation2 + $0x1380] ss:$16 sps:$4 sm:$0xff]   ;;  %v8014_v25 = vld [vmem:[#allocation2 + $0x1388] ss:$16 sps:$4 sm:$0xff]  }
 0x291   :  { %5098 = vmatprep.subr.bf16.mxu0 %v7929_v26  ;;  %5590 = vmatprep.subr.bf16.mxu1 %v7932_v27  ;;  %v8019_v26 = vld [vmem:[#allocation2 + $0x13a4] ss:$16 sps:$4 sm:$0xff]   ;;  %v8022_v27 = vld [vmem:[#allocation2 + $0x13ac] ss:$16 sps:$4 sm:$0xff]  }
 0x294   :  { %5099 = vmatpush1.bf16.msra.mxu0 %v7927_v28  ;;  %5591 = vmatpush1.bf16.msra.mxu1 %v7930_v29  ;;  %v8017_v28 = vld [vmem:[#allocation2 + $0x13a0] ss:$16 sps:$4 sm:$0xff]   ;;  %v8020_v29 = vld [vmem:[#allocation2 + $0x13a8] ss:$16 sps:$4 sm:$0xff]  }
 0x295   :  { %5100 = vmatprep.subr.bf16.mxu0 %v7935_v30  ;;  %5592 = vmatprep.subr.bf16.mxu1 %v7938_v31  ;;  %v8025_v30 = vld [vmem:[#allocation2 + $0x13c4] ss:$16 sps:$4 sm:$0xff]   ;;  %v8028_v31 = vld [vmem:[#allocation2 + $0x13cc] ss:$16 sps:$4 sm:$0xff]  }
 0x298   :  { %5101 = vmatpush1.bf16.msra.mxu0 %v7933_v32  ;;  %5593 = vmatpush1.bf16.msra.mxu1 %v7936_v33  ;;  %v8023_v32 = vld [vmem:[#allocation2 + $0x13c0] ss:$16 sps:$4 sm:$0xff]   ;;  %v8026_v33 = vld [vmem:[#allocation2 + $0x13c8] ss:$16 sps:$4 sm:$0xff]  }
 0x299   :  { %5111 = vmatprep.subr.bf16.mxu0 %v7941_v35  ;;  %5603 = vmatprep.subr.bf16.mxu1 %v7944_v36  ;;  %v8034_v35 = vld [vmem:[#allocation2 + $0x13ec] ss:$16 sps:$4 sm:$0xff]   ;;  %v8029_v36 = vld [vmem:[#allocation2 + $0x13e0] ss:$16 sps:$4 sm:$0xff]  }
 0x29b   :  { %5103 = vmatmul.mubr.bf16.vlgmr.msra.gmra.mrb[0].mxu0 %v126_v37  ;;  %5595 = vmatmul.mubr.bf16.vlgmr.msra.gmra.mrb[0].mxu1 %v126_v37  ;;  %v8032_v37 = vld [vmem:[#allocation2 + $0x13e8] ss:$16 sps:$4 sm:$0xff]  }
 0x29c   :  { %5112 = vmatpush1.bf16.msra.mxu0 %v7939_v39  ;;  %5604 = vmatpush1.bf16.msra.mxu1 %v7942_v40  ;;  %v8037_v39 = vld [vmem:[#allocation2 + $0x1404] ss:$16 sps:$4 sm:$0xff]   ;;  %v8040_v40 = vld [vmem:[#allocation2 + $0x140c] ss:$16 sps:$4 sm:$0xff]  }
 0x29d   :  { %5113 = vmatprep.subr.bf16.mxu0 %v7947_v41  ;;  %5605 = vmatprep.subr.bf16.mxu1 %v7950_v42  ;;  %v128_v41 = vpack.c.bf16 %v104_v38, %v104_v38  ;;  %v107_v42 = vld [vmem:[%s8561_s0 + $0xa8] sm:$0xff]  ;;  %v8127_v38 = vld [vmem:[#allocation2 + $0x15e4] ss:$16 sps:$4 sm:$0xff]  }
 0x29e   :  { %5143 = vmatprep.mubr.bf16.mxu0 %v129_v43  ;;  %5635 = vmatprep.mubr.bf16.mxu1 %v129_v43  ;;  %v8035_v43 = vld [vmem:[#allocation2 + $0x1400] ss:$16 sps:$4 sm:$0xff]  }
 0x2a0   :  { %5114 = vmatpush1.bf16.msra.mxu0 %v7945_v44  ;;  %5606 = vmatpush1.bf16.msra.mxu1 %v7948_v45  ;;  %v8038_v44 = vld [vmem:[#allocation2 + $0x1408] ss:$16 sps:$4 sm:$0xff]   ;;  %v8043_v45 = vld [vmem:[#allocation2 + $0x1424] ss:$16 sps:$4 sm:$0xff]  }
 0x2a1   :  { %5115 = vmatprep.subr.bf16.mxu0 %v7953_v46  ;;  %5607 = vmatprep.subr.bf16.mxu1 %v7956_v47  ;;  %v8046_v46 = vld [vmem:[#allocation2 + $0x142c] ss:$16 sps:$4 sm:$0xff]   ;;  %v131_v47 = vpack.c.bf16 %v107_v42, %v107_v42  ;;  %v106_v42 = vld [vmem:[%s8561_s0 + $0xa0] sm:$0xff] }
 0x2a4   :  { %5116 = vmatpush1.bf16.msra.mxu0 %v7951_v48  ;;  %5608 = vmatpush1.bf16.msra.mxu1 %v7954_v49  ;;  %v8041_v48 = vld [vmem:[#allocation2 + $0x1420] ss:$16 sps:$4 sm:$0xff]   ;;  %v8044_v49 = vld [vmem:[#allocation2 + $0x1428] ss:$16 sps:$4 sm:$0xff]  }
 0x2a5   :  { %5117 = vmatprep.subr.bf16.mxu0 %v7959_v50  ;;  %5609 = vmatprep.subr.bf16.mxu1 %v7962_v51  ;;  %v8049_v50 = vld [vmem:[#allocation2 + $0x1444] ss:$16 sps:$4 sm:$0xff]   ;;  %v8052_v51 = vld [vmem:[#allocation2 + $0x144c] ss:$16 sps:$4 sm:$0xff]  }
 0x2a8   :  { %5118 = vmatpush1.bf16.msra.mxu0 %v7957_v52  ;;  %5610 = vmatpush1.bf16.msra.mxu1 %v7960_v53  ;;  %v8047_v52 = vld [vmem:[#allocation2 + $0x1440] ss:$16 sps:$4 sm:$0xff]   ;;  %v8050_v53 = vld [vmem:[#allocation2 + $0x1448] ss:$16 sps:$4 sm:$0xff]  }
 0x2a9   :  { %5119 = vmatprep.subr.bf16.mxu0 %v7965_v54  ;;  %5611 = vmatprep.subr.bf16.mxu1 %v7968_v55  ;;  %v8055_v54 = vld [vmem:[#allocation2 + $0x1464] ss:$16 sps:$4 sm:$0xff]   ;;  %v8058_v55 = vld [vmem:[#allocation2 + $0x146c] ss:$16 sps:$4 sm:$0xff]  }
 0x2ac   :  { %5120 = vmatpush1.bf16.msra.mxu0 %v7963_v56  ;;  %5612 = vmatpush1.bf16.msra.mxu1 %v7966_v57  ;;  %v8053_v56 = vld [vmem:[#allocation2 + $0x1460] ss:$16 sps:$4 sm:$0xff]   ;;  %v8056_v57 = vld [vmem:[#allocation2 + $0x1468] ss:$16 sps:$4 sm:$0xff]  }
 0x2ad   :  { %5121 = vmatprep.subr.bf16.mxu0 %v7971_v58  ;;  %5613 = vmatprep.subr.bf16.mxu1 %v7974_v59  ;;  %v8061_v58 = vld [vmem:[#allocation2 + $0x1484] ss:$16 sps:$4 sm:$0xff]   ;;  %v8064_v59 = vld [vmem:[#allocation2 + $0x148c] ss:$16 sps:$4 sm:$0xff]  }
 0x2b0   :  { %5122 = vmatpush1.bf16.msra.mxu0 %v7969_v60  ;;  %5614 = vmatpush1.bf16.msra.mxu1 %v7972_v61  ;;  %v8059_v60 = vld [vmem:[#allocation2 + $0x1480] ss:$16 sps:$4 sm:$0xff]   ;;  %v8062_v61 = vld [vmem:[#allocation2 + $0x1488] ss:$16 sps:$4 sm:$0xff]  }
 0x2b1   :  { %5123 = vmatprep.subr.bf16.mxu0 %v7977_v62  ;;  %5615 = vmatprep.subr.bf16.mxu1 %v7980_v63  ;;  %v8067_v62 = vld [vmem:[#allocation2 + $0x14a4] ss:$16 sps:$4 sm:$0xff]   ;;  %v8070_v63 = vld [vmem:[#allocation2 + $0x14ac] ss:$16 sps:$4 sm:$0xff]  }
 0x2b4   :  { %5124 = vmatpush1.bf16.msra.mxu0 %v7975_v0  ;;  %5616 = vmatpush1.bf16.msra.mxu1 %v7978_v1  ;;  %v8065_v0 = vld [vmem:[#allocation2 + $0x14a0] ss:$16 sps:$4 sm:$0xff]   ;;  %v8068_v1 = vld [vmem:[#allocation2 + $0x14a8] ss:$16 sps:$4 sm:$0xff]  }
 0x2b5   :  { %5125 = vmatprep.subr.bf16.mxu0 %v7983_v2  ;;  %5617 = vmatprep.subr.bf16.mxu1 %v7986_v3  ;;  %v8073_v2 = vld [vmem:[#allocation2 + $0x14c4] ss:$16 sps:$4 sm:$0xff]   ;;  %v8076_v3 = vld [vmem:[#allocation2 + $0x14cc] ss:$16 sps:$4 sm:$0xff]  }
 0x2b8   :  { %5126 = vmatpush1.bf16.msra.mxu0 %v7981_v4  ;;  %5618 = vmatpush1.bf16.msra.mxu1 %v7984_v5  ;;  %v8071_v4 = vld [vmem:[#allocation2 + $0x14c0] ss:$16 sps:$4 sm:$0xff]   ;;  %v8074_v5 = vld [vmem:[#allocation2 + $0x14c8] ss:$16 sps:$4 sm:$0xff]  }
 0x2b9   :  { %5127 = vmatprep.subr.bf16.mxu0 %v7989_v6  ;;  %5619 = vmatprep.subr.bf16.mxu1 %v7992_v7  ;;  %v8079_v6 = vld [vmem:[#allocation2 + $0x14e4] ss:$16 sps:$4 sm:$0xff]   ;;  %v8082_v7 = vld [vmem:[#allocation2 + $0x14ec] ss:$16 sps:$4 sm:$0xff]  }
 0x2bc   :  { %5128 = vmatpush1.bf16.msra.mxu0 %v7987_v8  ;;  %5620 = vmatpush1.bf16.msra.mxu1 %v7990_v9  ;;  %v8077_v8 = vld [vmem:[#allocation2 + $0x14e0] ss:$16 sps:$4 sm:$0xff]   ;;  %v8080_v9 = vld [vmem:[#allocation2 + $0x14e8] ss:$16 sps:$4 sm:$0xff]  }
 0x2bd   :  { %5129 = vmatprep.subr.bf16.mxu0 %v7995_v10  ;;  %5621 = vmatprep.subr.bf16.mxu1 %v7998_v11  ;;  %v8085_v10 = vld [vmem:[#allocation2 + $0x1504] ss:$16 sps:$4 sm:$0xff]   ;;  %v8088_v11 = vld [vmem:[#allocation2 + $0x150c] ss:$16 sps:$4 sm:$0xff]  }
 0x2c0   :  { %5130 = vmatpush1.bf16.msra.mxu0 %v7993_v12  ;;  %5622 = vmatpush1.bf16.msra.mxu1 %v7996_v13  ;;  %v8083_v12 = vld [vmem:[#allocation2 + $0x1500] ss:$16 sps:$4 sm:$0xff]   ;;  %v8086_v13 = vld [vmem:[#allocation2 + $0x1508] ss:$16 sps:$4 sm:$0xff]  }
 0x2c1   :  { %5131 = vmatprep.subr.bf16.mxu0 %v8001_v14  ;;  %5623 = vmatprep.subr.bf16.mxu1 %v8004_v15  ;;  %v8091_v14 = vld [vmem:[#allocation2 + $0x1524] ss:$16 sps:$4 sm:$0xff]   ;;  %v8094_v15 = vld [vmem:[#allocation2 + $0x152c] ss:$16 sps:$4 sm:$0xff]  }
 0x2c4   :  { %5132 = vmatpush1.bf16.msra.mxu0 %v7999_v16  ;;  %5624 = vmatpush1.bf16.msra.mxu1 %v8002_v17  ;;  %v8089_v16 = vld [vmem:[#allocation2 + $0x1520] ss:$16 sps:$4 sm:$0xff]   ;;  %v8092_v17 = vld [vmem:[#allocation2 + $0x1528] ss:$16 sps:$4 sm:$0xff]  }
 0x2c5   :  { %5133 = vmatprep.subr.bf16.mxu0 %v8007_v18  ;;  %5625 = vmatprep.subr.bf16.mxu1 %v8010_v19  ;;  %v8097_v18 = vld [vmem:[#allocation2 + $0x1544] ss:$16 sps:$4 sm:$0xff]   ;;  %v8100_v19 = vld [vmem:[#allocation2 + $0x154c] ss:$16 sps:$4 sm:$0xff]  }
 0x2c8   :  { %5134 = vmatpush1.bf16.msra.mxu0 %v8005_v20  ;;  %5626 = vmatpush1.bf16.msra.mxu1 %v8008_v21  ;;  %v8095_v20 = vld [vmem:[#allocation2 + $0x1540] ss:$16 sps:$4 sm:$0xff]   ;;  %v8098_v21 = vld [vmem:[#allocation2 + $0x1548] ss:$16 sps:$4 sm:$0xff]  }
 0x2c9   :  { %5135 = vmatprep.subr.bf16.mxu0 %v8013_v22  ;;  %5627 = vmatprep.subr.bf16.mxu1 %v8016_v23  ;;  %v8103_v22 = vld [vmem:[#allocation2 + $0x1564] ss:$16 sps:$4 sm:$0xff]   ;;  %v8106_v23 = vld [vmem:[#allocation2 + $0x156c] ss:$16 sps:$4 sm:$0xff]  }
 0x2cc   :  { %5136 = vmatpush1.bf16.msra.mxu0 %v8011_v24  ;;  %5628 = vmatpush1.bf16.msra.mxu1 %v8014_v25  ;;  %v8101_v24 = vld [vmem:[#allocation2 + $0x1560] ss:$16 sps:$4 sm:$0xff]   ;;  %v8104_v25 = vld [vmem:[#allocation2 + $0x1568] ss:$16 sps:$4 sm:$0xff]  }
 0x2cd   :  { %5137 = vmatprep.subr.bf16.mxu0 %v8019_v26  ;;  %5629 = vmatprep.subr.bf16.mxu1 %v8022_v27  ;;  %v8109_v26 = vld [vmem:[#allocation2 + $0x1584] ss:$16 sps:$4 sm:$0xff]   ;;  %v8112_v27 = vld [vmem:[#allocation2 + $0x158c] ss:$16 sps:$4 sm:$0xff]  }
 0x2d0   :  { %5138 = vmatpush1.bf16.msra.mxu0 %v8017_v28  ;;  %5630 = vmatpush1.bf16.msra.mxu1 %v8020_v29  ;;  %v8107_v28 = vld [vmem:[#allocation2 + $0x1580] ss:$16 sps:$4 sm:$0xff]   ;;  %v8110_v29 = vld [vmem:[#allocation2 + $0x1588] ss:$16 sps:$4 sm:$0xff]  }
 0x2d1   :  { %5139 = vmatprep.subr.bf16.mxu0 %v8025_v30  ;;  %5631 = vmatprep.subr.bf16.mxu1 %v8028_v31  ;;  %v8115_v30 = vld [vmem:[#allocation2 + $0x15a4] ss:$16 sps:$4 sm:$0xff]   ;;  %v8118_v31 = vld [vmem:[#allocation2 + $0x15ac] ss:$16 sps:$4 sm:$0xff]  }
 0x2d4   :  { %5140 = vmatpush1.bf16.msra.mxu0 %v8023_v32  ;;  %5632 = vmatpush1.bf16.msra.mxu1 %v8026_v33  ;;  %v8113_v32 = vld [vmem:[#allocation2 + $0x15a0] ss:$16 sps:$4 sm:$0xff]   ;;  %v8116_v33 = vld [vmem:[#allocation2 + $0x15a8] ss:$16 sps:$4 sm:$0xff]  }
 0x2d5   :  { %5141 = vmatprep.subr.bf16.mxu0 %v8031_v34  ;;  %5633 = vmatprep.subr.bf16.mxu1 %v8034_v35  ;;  %v8121_v34 = vld [vmem:[#allocation2 + $0x15c4] ss:$16 sps:$4 sm:$0xff]   ;;  %v8124_v35 = vld [vmem:[#allocation2 + $0x15cc] ss:$16 sps:$4 sm:$0xff]  }
 0x2d8   :  { %5142 = vmatpush1.bf16.msra.mxu0 %v8029_v36  ;;  %5634 = vmatpush1.bf16.msra.mxu1 %v8032_v37  ;;  %v8119_v36 = vld [vmem:[#allocation2 + $0x15c0] ss:$16 sps:$4 sm:$0xff]   ;;  %v8122_v37 = vld [vmem:[#allocation2 + $0x15c8] ss:$16 sps:$4 sm:$0xff]  }
 0x2d9   :  { %5152 = vmatprep.subr.bf16.mxu0 %v8037_v39  ;;  %5644 = vmatprep.subr.bf16.mxu1 %v8040_v40  ;;  %v8130_v39 = vld [vmem:[#allocation2 + $0x15ec] ss:$16 sps:$4 sm:$0xff]   ;;  %v8125_v40 = vld [vmem:[#allocation2 + $0x15e0] ss:$16 sps:$4 sm:$0xff]  }
 0x2db   :  { %5144 = vmatmul.mubr.bf16.vlgmr.msra.gmra.mrb[0].mxu0 %v128_v41  ;;  %5636 = vmatmul.mubr.bf16.vlgmr.msra.gmra.mrb[0].mxu1 %v128_v41  ;;  %v8128_v41 = vld [vmem:[#allocation2 + $0x15e8] ss:$16 sps:$4 sm:$0xff]  }
 0x2dc   :  { %5153 = vmatpush1.bf16.msra.mxu0 %v8035_v43  ;;  %5645 = vmatpush1.bf16.msra.mxu1 %v8038_v44  ;;  %v8133_v43 = vld [vmem:[#allocation2 + $0x1604] ss:$16 sps:$4 sm:$0xff]   ;;  %v8136_v44 = vld [vmem:[#allocation2 + $0x160c] ss:$16 sps:$4 sm:$0xff]  }
 0x2dd   :  { %5154 = vmatprep.subr.bf16.mxu0 %v8043_v45  ;;  %5646 = vmatprep.subr.bf16.mxu1 %v8046_v46  ;;  %v130_v45 = vpack.c.bf16 %v106_v42, %v106_v42  ;;  %v109_v46 = vld [vmem:[%s8561_s0 + $0xb8] sm:$0xff]  ;;  %v8223_v42 = vld [vmem:[#allocation2 + $0x17e4] ss:$16 sps:$4 sm:$0xff]  }
 0x2de   :  { %5184 = vmatprep.mubr.bf16.mxu0 %v131_v47  ;;  %5676 = vmatprep.mubr.bf16.mxu1 %v131_v47  ;;  %v8131_v47 = vld [vmem:[#allocation2 + $0x1600] ss:$16 sps:$4 sm:$0xff]  }
 0x2e0   :  { %5155 = vmatpush1.bf16.msra.mxu0 %v8041_v48  ;;  %5647 = vmatpush1.bf16.msra.mxu1 %v8044_v49  ;;  %v8134_v48 = vld [vmem:[#allocation2 + $0x1608] ss:$16 sps:$4 sm:$0xff]   ;;  %v8139_v49 = vld [vmem:[#allocation2 + $0x1624] ss:$16 sps:$4 sm:$0xff]  }
 0x2e1   :  { %5156 = vmatprep.subr.bf16.mxu0 %v8049_v50  ;;  %5648 = vmatprep.subr.bf16.mxu1 %v8052_v51  ;;  %v8142_v50 = vld [vmem:[#allocation2 + $0x162c] ss:$16 sps:$4 sm:$0xff]   ;;  %v133_v51 = vpack.c.bf16 %v109_v46, %v109_v46  ;;  %v108_v46 = vld [vmem:[%s8561_s0 + $0xb0] sm:$0xff] }
 0x2e4   :  { %5157 = vmatpush1.bf16.msra.mxu0 %v8047_v52  ;;  %5649 = vmatpush1.bf16.msra.mxu1 %v8050_v53  ;;  %v8137_v52 = vld [vmem:[#allocation2 + $0x1620] ss:$16 sps:$4 sm:$0xff]   ;;  %v8140_v53 = vld [vmem:[#allocation2 + $0x1628] ss:$16 sps:$4 sm:$0xff]  }
 0x2e5   :  { %5158 = vmatprep.subr.bf16.mxu0 %v8055_v54  ;;  %5650 = vmatprep.subr.bf16.mxu1 %v8058_v55  ;;  %v8145_v54 = vld [vmem:[#allocation2 + $0x1644] ss:$16 sps:$4 sm:$0xff]   ;;  %v8148_v55 = vld [vmem:[#allocation2 + $0x164c] ss:$16 sps:$4 sm:$0xff]  }
 0x2e8   :  { %5159 = vmatpush1.bf16.msra.mxu0 %v8053_v56  ;;  %5651 = vmatpush1.bf16.msra.mxu1 %v8056_v57  ;;  %v8143_v56 = vld [vmem:[#allocation2 + $0x1640] ss:$16 sps:$4 sm:$0xff]   ;;  %v8146_v57 = vld [vmem:[#allocation2 + $0x1648] ss:$16 sps:$4 sm:$0xff]  }
 0x2e9   :  { %5160 = vmatprep.subr.bf16.mxu0 %v8061_v58  ;;  %5652 = vmatprep.subr.bf16.mxu1 %v8064_v59  ;;  %v8151_v58 = vld [vmem:[#allocation2 + $0x1664] ss:$16 sps:$4 sm:$0xff]   ;;  %v8154_v59 = vld [vmem:[#allocation2 + $0x166c] ss:$16 sps:$4 sm:$0xff]  }
 0x2ec   :  { %5161 = vmatpush1.bf16.msra.mxu0 %v8059_v60  ;;  %5653 = vmatpush1.bf16.msra.mxu1 %v8062_v61  ;;  %v8149_v60 = vld [vmem:[#allocation2 + $0x1660] ss:$16 sps:$4 sm:$0xff]   ;;  %v8152_v61 = vld [vmem:[#allocation2 + $0x1668] ss:$16 sps:$4 sm:$0xff]  }
 0x2ed   :  { %5162 = vmatprep.subr.bf16.mxu0 %v8067_v62  ;;  %5654 = vmatprep.subr.bf16.mxu1 %v8070_v63  ;;  %v8157_v62 = vld [vmem:[#allocation2 + $0x1684] ss:$16 sps:$4 sm:$0xff]   ;;  %v8160_v63 = vld [vmem:[#allocation2 + $0x168c] ss:$16 sps:$4 sm:$0xff]  }
 0x2f0   :  { %5163 = vmatpush1.bf16.msra.mxu0 %v8065_v0  ;;  %5655 = vmatpush1.bf16.msra.mxu1 %v8068_v1  ;;  %v8155_v0 = vld [vmem:[#allocation2 + $0x1680] ss:$16 sps:$4 sm:$0xff]   ;;  %v8158_v1 = vld [vmem:[#allocation2 + $0x1688] ss:$16 sps:$4 sm:$0xff]  }
 0x2f1   :  { %5164 = vmatprep.subr.bf16.mxu0 %v8073_v2  ;;  %5656 = vmatprep.subr.bf16.mxu1 %v8076_v3  ;;  %v8163_v2 = vld [vmem:[#allocation2 + $0x16a4] ss:$16 sps:$4 sm:$0xff]   ;;  %v8166_v3 = vld [vmem:[#allocation2 + $0x16ac] ss:$16 sps:$4 sm:$0xff]  }
 0x2f4   :  { %5165 = vmatpush1.bf16.msra.mxu0 %v8071_v4  ;;  %5657 = vmatpush1.bf16.msra.mxu1 %v8074_v5  ;;  %v8161_v4 = vld [vmem:[#allocation2 + $0x16a0] ss:$16 sps:$4 sm:$0xff]   ;;  %v8164_v5 = vld [vmem:[#allocation2 + $0x16a8] ss:$16 sps:$4 sm:$0xff]  }
 0x2f5   :  { %5166 = vmatprep.subr.bf16.mxu0 %v8079_v6  ;;  %5658 = vmatprep.subr.bf16.mxu1 %v8082_v7  ;;  %v8169_v6 = vld [vmem:[#allocation2 + $0x16c4] ss:$16 sps:$4 sm:$0xff]   ;;  %v8172_v7 = vld [vmem:[#allocation2 + $0x16cc] ss:$16 sps:$4 sm:$0xff]  }
 0x2f8   :  { %5167 = vmatpush1.bf16.msra.mxu0 %v8077_v8  ;;  %5659 = vmatpush1.bf16.msra.mxu1 %v8080_v9  ;;  %v8167_v8 = vld [vmem:[#allocation2 + $0x16c0] ss:$16 sps:$4 sm:$0xff]   ;;  %v8170_v9 = vld [vmem:[#allocation2 + $0x16c8] ss:$16 sps:$4 sm:$0xff]  }
 0x2f9   :  { %5168 = vmatprep.subr.bf16.mxu0 %v8085_v10  ;;  %5660 = vmatprep.subr.bf16.mxu1 %v8088_v11  ;;  %v8175_v10 = vld [vmem:[#allocation2 + $0x16e4] ss:$16 sps:$4 sm:$0xff]   ;;  %v8178_v11 = vld [vmem:[#allocation2 + $0x16ec] ss:$16 sps:$4 sm:$0xff]  }
 0x2fc   :  { %5169 = vmatpush1.bf16.msra.mxu0 %v8083_v12  ;;  %5661 = vmatpush1.bf16.msra.mxu1 %v8086_v13  ;;  %v8173_v12 = vld [vmem:[#allocation2 + $0x16e0] ss:$16 sps:$4 sm:$0xff]   ;;  %v8176_v13 = vld [vmem:[#allocation2 + $0x16e8] ss:$16 sps:$4 sm:$0xff]  }
 0x2fd   :  { %5170 = vmatprep.subr.bf16.mxu0 %v8091_v14  ;;  %5662 = vmatprep.subr.bf16.mxu1 %v8094_v15  ;;  %v8181_v14 = vld [vmem:[#allocation2 + $0x1704] ss:$16 sps:$4 sm:$0xff]   ;;  %v8184_v15 = vld [vmem:[#allocation2 + $0x170c] ss:$16 sps:$4 sm:$0xff]  }
 0x300   :  { %5171 = vmatpush1.bf16.msra.mxu0 %v8089_v16  ;;  %5663 = vmatpush1.bf16.msra.mxu1 %v8092_v17  ;;  %v8179_v16 = vld [vmem:[#allocation2 + $0x1700] ss:$16 sps:$4 sm:$0xff]   ;;  %v8182_v17 = vld [vmem:[#allocation2 + $0x1708] ss:$16 sps:$4 sm:$0xff]  }
 0x301   :  { %5172 = vmatprep.subr.bf16.mxu0 %v8097_v18  ;;  %5664 = vmatprep.subr.bf16.mxu1 %v8100_v19  ;;  %v8187_v18 = vld [vmem:[#allocation2 + $0x1724] ss:$16 sps:$4 sm:$0xff]   ;;  %v8190_v19 = vld [vmem:[#allocation2 + $0x172c] ss:$16 sps:$4 sm:$0xff]  }
 0x304   :  { %5173 = vmatpush1.bf16.msra.mxu0 %v8095_v20  ;;  %5665 = vmatpush1.bf16.msra.mxu1 %v8098_v21  ;;  %v8185_v20 = vld [vmem:[#allocation2 + $0x1720] ss:$16 sps:$4 sm:$0xff]   ;;  %v8188_v21 = vld [vmem:[#allocation2 + $0x1728] ss:$16 sps:$4 sm:$0xff]  }
 0x305   :  { %5174 = vmatprep.subr.bf16.mxu0 %v8103_v22  ;;  %5666 = vmatprep.subr.bf16.mxu1 %v8106_v23  ;;  %v8193_v22 = vld [vmem:[#allocation2 + $0x1744] ss:$16 sps:$4 sm:$0xff]   ;;  %v8196_v23 = vld [vmem:[#allocation2 + $0x174c] ss:$16 sps:$4 sm:$0xff]  }
 0x308   :  { %5175 = vmatpush1.bf16.msra.mxu0 %v8101_v24  ;;  %5667 = vmatpush1.bf16.msra.mxu1 %v8104_v25  ;;  %v8191_v24 = vld [vmem:[#allocation2 + $0x1740] ss:$16 sps:$4 sm:$0xff]   ;;  %v8194_v25 = vld [vmem:[#allocation2 + $0x1748] ss:$16 sps:$4 sm:$0xff]  }
 0x309   :  { %5176 = vmatprep.subr.bf16.mxu0 %v8109_v26  ;;  %5668 = vmatprep.subr.bf16.mxu1 %v8112_v27  ;;  %v8199_v26 = vld [vmem:[#allocation2 + $0x1764] ss:$16 sps:$4 sm:$0xff]   ;;  %v8202_v27 = vld [vmem:[#allocation2 + $0x176c] ss:$16 sps:$4 sm:$0xff]  }
 0x30c   :  { %5177 = vmatpush1.bf16.msra.mxu0 %v8107_v28  ;;  %5669 = vmatpush1.bf16.msra.mxu1 %v8110_v29  ;;  %v8197_v28 = vld [vmem:[#allocation2 + $0x1760] ss:$16 sps:$4 sm:$0xff]   ;;  %v8200_v29 = vld [vmem:[#allocation2 + $0x1768] ss:$16 sps:$4 sm:$0xff]  }
 0x30d   :  { %5178 = vmatprep.subr.bf16.mxu0 %v8115_v30  ;;  %5670 = vmatprep.subr.bf16.mxu1 %v8118_v31  ;;  %v8205_v30 = vld [vmem:[#allocation2 + $0x1784] ss:$16 sps:$4 sm:$0xff]   ;;  %v8208_v31 = vld [vmem:[#allocation2 + $0x178c] ss:$16 sps:$4 sm:$0xff]  }
 0x310   :  { %5179 = vmatpush1.bf16.msra.mxu0 %v8113_v32  ;;  %5671 = vmatpush1.bf16.msra.mxu1 %v8116_v33  ;;  %v8203_v32 = vld [vmem:[#allocation2 + $0x1780] ss:$16 sps:$4 sm:$0xff]   ;;  %v8206_v33 = vld [vmem:[#allocation2 + $0x1788] ss:$16 sps:$4 sm:$0xff]  }
 0x311   :  { %5180 = vmatprep.subr.bf16.mxu0 %v8121_v34  ;;  %5672 = vmatprep.subr.bf16.mxu1 %v8124_v35  ;;  %v8211_v34 = vld [vmem:[#allocation2 + $0x17a4] ss:$16 sps:$4 sm:$0xff]   ;;  %v8214_v35 = vld [vmem:[#allocation2 + $0x17ac] ss:$16 sps:$4 sm:$0xff]  }
 0x314   :  { %5181 = vmatpush1.bf16.msra.mxu0 %v8119_v36  ;;  %5673 = vmatpush1.bf16.msra.mxu1 %v8122_v37  ;;  %v8209_v36 = vld [vmem:[#allocation2 + $0x17a0] ss:$16 sps:$4 sm:$0xff]   ;;  %v8212_v37 = vld [vmem:[#allocation2 + $0x17a8] ss:$16 sps:$4 sm:$0xff]  }
 0x315   :  { %5182 = vmatprep.subr.bf16.mxu0 %v8127_v38  ;;  %5674 = vmatprep.subr.bf16.mxu1 %v8130_v39  ;;  %v8217_v38 = vld [vmem:[#allocation2 + $0x17c4] ss:$16 sps:$4 sm:$0xff]   ;;  %v8220_v39 = vld [vmem:[#allocation2 + $0x17cc] ss:$16 sps:$4 sm:$0xff]  }
 0x318   :  { %5183 = vmatpush1.bf16.msra.mxu0 %v8125_v40  ;;  %5675 = vmatpush1.bf16.msra.mxu1 %v8128_v41  ;;  %v8215_v40 = vld [vmem:[#allocation2 + $0x17c0] ss:$16 sps:$4 sm:$0xff]   ;;  %v8218_v41 = vld [vmem:[#allocation2 + $0x17c8] ss:$16 sps:$4 sm:$0xff]  }
 0x319   :  { %5193 = vmatprep.subr.bf16.mxu0 %v8133_v43  ;;  %5685 = vmatprep.subr.bf16.mxu1 %v8136_v44  ;;  %v8226_v43 = vld [vmem:[#allocation2 + $0x17ec] ss:$16 sps:$4 sm:$0xff]   ;;  %v8221_v44 = vld [vmem:[#allocation2 + $0x17e0] ss:$16 sps:$4 sm:$0xff]  }
 0x31b   :  { %5185 = vmatmul.mubr.bf16.vlgmr.msra.gmra.mrb[0].mxu0 %v130_v45  ;;  %5677 = vmatmul.mubr.bf16.vlgmr.msra.gmra.mrb[0].mxu1 %v130_v45  ;;  %v8224_v45 = vld [vmem:[#allocation2 + $0x17e8] ss:$16 sps:$4 sm:$0xff]  }
 0x31c   :  { %5194 = vmatpush1.bf16.msra.mxu0 %v8131_v47  ;;  %5686 = vmatpush1.bf16.msra.mxu1 %v8134_v48  ;;  %v8227_v47 = vld [vmem:[#allocation7 + $0x40] sm:$0xff]  }
 0x31d   :  { %5195 = vmatprep.subr.bf16.mxu0 %v8139_v49  ;;  %5687 = vmatprep.subr.bf16.mxu1 %v8142_v50  ;;  %v8228_v48 = vld [vmem:[#allocation7 + $0xc0] sm:$0xff]   ;;  %v132_v49 = vpack.c.bf16 %v108_v46, %v108_v46 }
 0x31e   :  { %5225 = vmatprep.mubr.bf16.mxu0 %v133_v51  ;;  %5717 = vmatprep.mubr.bf16.mxu1 %v133_v51  ;;  %v8229_v50 = vld [vmem:[#allocation7] sm:$0xff]  }
 0x31f   :  { %v8230_v51 = vld [vmem:[#allocation7 + $0x80] sm:$0xff]  }
 0x320   :  { %5196 = vmatpush1.bf16.msra.mxu0 %v8137_v52  ;;  %5688 = vmatpush1.bf16.msra.mxu1 %v8140_v53  ;;  %v8231_v52 = vld [vmem:[#allocation7 + $0x48] sm:$0xff]  }
 0x321   :  { %5197 = vmatprep.subr.bf16.mxu0 %v8145_v54  ;;  %5689 = vmatprep.subr.bf16.mxu1 %v8148_v55  ;;  %v8232_v53 = vld [vmem:[#allocation7 + $0xc8] sm:$0xff]  }
 0x322   :  { %v8233_v54 = vld [vmem:[#allocation7 + $0x8] sm:$0xff]  }
 0x323   :  { %v8234_v55 = vld [vmem:[#allocation7 + $0x88] sm:$0xff]  }
 0x324   :  { %5198 = vmatpush1.bf16.msra.mxu0 %v8143_v56  ;;  %5690 = vmatpush1.bf16.msra.mxu1 %v8146_v57  ;;  %v8235_v56 = vld [vmem:[#allocation7 + $0x50] sm:$0xff]  }
 0x325   :  { %5199 = vmatprep.subr.bf16.mxu0 %v8151_v58  ;;  %5691 = vmatprep.subr.bf16.mxu1 %v8154_v59  ;;  %v8236_v57 = vld [vmem:[#allocation7 + $0xd0] sm:$0xff]  }
 0x326   :  { %v8237_v58 = vld [vmem:[#allocation7 + $0x10] sm:$0xff]  }
 0x327   :  { %v8238_v59 = vld [vmem:[#allocation7 + $0x90] sm:$0xff]  }
 0x328   :  { %5200 = vmatpush1.bf16.msra.mxu0 %v8149_v60  ;;  %5692 = vmatpush1.bf16.msra.mxu1 %v8152_v61  ;;  %v8239_v60 = vld [vmem:[#allocation7 + $0x58] sm:$0xff]  }
 0x329   :  { %5201 = vmatprep.subr.bf16.mxu0 %v8157_v62  ;;  %5693 = vmatprep.subr.bf16.mxu1 %v8160_v63  ;;  %v8240_v61 = vld [vmem:[#allocation7 + $0xd8] sm:$0xff]  }
 0x32a   :  { %v8241_v62 = vld [vmem:[#allocation7 + $0x18] sm:$0xff]  }
 0x32b   :  { %v8242_v63 = vld [vmem:[#allocation7 + $0x98] sm:$0xff]  }
 0x32c   :  { %5202 = vmatpush1.bf16.msra.mxu0 %v8155_v0  ;;  %5694 = vmatpush1.bf16.msra.mxu1 %v8158_v1  ;;  %v8243_v0 = vld [vmem:[#allocation7 + $0x60] sm:$0xff]  }
 0x32d   :  { %5203 = vmatprep.subr.bf16.mxu0 %v8163_v2  ;;  %5695 = vmatprep.subr.bf16.mxu1 %v8166_v3  ;;  %v8244_v1 = vld [vmem:[#allocation7 + $0xe0] sm:$0xff]  }
 0x32e   :  { %v8245_v2 = vld [vmem:[#allocation7 + $0x20] sm:$0xff]  }
 0x32f   :  { %v8246_v3 = vld [vmem:[#allocation7 + $0xa0] sm:$0xff]  }
 0x330   :  { %5204 = vmatpush1.bf16.msra.mxu0 %v8161_v4  ;;  %5696 = vmatpush1.bf16.msra.mxu1 %v8164_v5  ;;  %v8247_v4 = vld [vmem:[#allocation7 + $0x68] sm:$0xff]  }
 0x331   :  { %5205 = vmatprep.subr.bf16.mxu0 %v8169_v6  ;;  %5697 = vmatprep.subr.bf16.mxu1 %v8172_v7  ;;  %v8248_v5 = vld [vmem:[#allocation7 + $0xe8] sm:$0xff]  }
 0x332   :  { %v8249_v6 = vld [vmem:[#allocation7 + $0x28] sm:$0xff]  }
 0x333   :  { %v8250_v7 = vld [vmem:[#allocation7 + $0xa8] sm:$0xff]  }
 0x334   :  { %5206 = vmatpush1.bf16.msra.mxu0 %v8167_v8  ;;  %5698 = vmatpush1.bf16.msra.mxu1 %v8170_v9  ;;  %v8251_v8 = vld [vmem:[#allocation7 + $0x70] sm:$0xff]  }
 0x335   :  { %5207 = vmatprep.subr.bf16.mxu0 %v8175_v10  ;;  %5699 = vmatprep.subr.bf16.mxu1 %v8178_v11  ;;  %v8252_v9 = vld [vmem:[#allocation7 + $0xf0] sm:$0xff]  }
 0x336   :  { %v8253_v10 = vld [vmem:[#allocation7 + $0x30] sm:$0xff]  }
 0x337   :  { %v8254_v11 = vld [vmem:[#allocation7 + $0xb0] sm:$0xff]  }
 0x338   :  { %5208 = vmatpush1.bf16.msra.mxu0 %v8173_v12  ;;  %5700 = vmatpush1.bf16.msra.mxu1 %v8176_v13  ;;  %v8255_v12 = vld [vmem:[#allocation7 + $0x78] sm:$0xff]  }
 0x339   :  { %5209 = vmatprep.subr.bf16.mxu0 %v8181_v14  ;;  %5701 = vmatprep.subr.bf16.mxu1 %v8184_v15  ;;  %v8256_v13 = vld [vmem:[#allocation7 + $0xf8] sm:$0xff]  }
 0x33a   :  { %v8257_v14 = vld [vmem:[#allocation7 + $0x38] sm:$0xff]  }
 0x33b   :  { %v8258_v15 = vld [vmem:[#allocation7 + $0xb8] sm:$0xff]  }
 0x33c   :  { %5210 = vmatpush1.bf16.msra.mxu0 %v8179_v16  ;;  %5702 = vmatpush1.bf16.msra.mxu1 %v8182_v17  ;;  %v5728_v16 = vlaneseq }
 0x33d   :  { %5211 = vmatprep.subr.bf16.mxu0 %v8187_v18  ;;  %5703 = vmatprep.subr.bf16.mxu1 %v8190_v19 }
 0x33e   :  { %v5729_v17 = vshrl.u32 %v5728_v16, 7 }
 0x340   :  { %5212 = vmatpush1.bf16.msra.mxu0 %v8185_v20  ;;  %5704 = vmatpush1.bf16.msra.mxu1 %v8188_v21  ;;  %v5730_v18 = vsub.s32 0, %v5729_v17  ;;  %v5738_v19 = vsub.s32 2, %v5729_v17  ;;  %v5726_v20 = vld [vmem:[#allocation4] sm:$0xf]  ;;  %v5734_v21 = vsub.s32 1, %v5729_v17 }
 0x341   :  { %5213 = vmatprep.subr.bf16.mxu0 %v8193_v22  ;;  %5705 = vmatprep.subr.bf16.mxu1 %v8196_v23  ;;  %v5742_v22 = vsub.s32 3, %v5729_v17  ;;  %v5752_v23 = vld [vmem:[#allocation6] sm:$0xf] }
 0x344   :  { %5214 = vmatpush1.bf16.msra.mxu0 %v8191_v24  ;;  %5706 = vmatpush1.bf16.msra.mxu1 %v8194_v25  ;;  %v5731_v24 = vrot.slane %v5726_v20, %v5730_v18  ;;  %v5739_v25 = vrot.slane %v5726_v20, %v5738_v19 }
 0x345   :  { %5215 = vmatprep.subr.bf16.mxu0 %v8199_v26  ;;  %5707 = vmatprep.subr.bf16.mxu1 %v8202_v27  ;;  %v5735_v26 = vrot.slane %v5726_v20, %v5734_v21  ;;  %v5743_v27 = vrot.slane %v5726_v20, %v5742_v22 }
 0x348   :  { %5216 = vmatpush1.bf16.msra.mxu0 %v8197_v28  ;;  %5708 = vmatpush1.bf16.msra.mxu1 %v8200_v29  ;;  %v5757_v28 = vrot.slane %v5752_v23, %v5730_v18  ;;  %v5765_v29 = vrot.slane %v5752_v23, %v5738_v19 }
 0x349   :  { %5217 = vmatprep.subr.bf16.mxu0 %v8205_v30  ;;  %5709 = vmatprep.subr.bf16.mxu1 %v8208_v31 }
 0x34c   :  { %5218 = vmatpush1.bf16.msra.mxu0 %v8203_v32  ;;  %5710 = vmatpush1.bf16.msra.mxu1 %v8206_v33  ;;  %v5761_v32 = vrot.slane %v5752_v23, %v5734_v21  ;;  %v5769_v33 = vrot.slane %v5752_v23, %v5742_v22 }
 0x34d   :  { %5219 = vmatprep.subr.bf16.mxu0 %v8211_v34  ;;  %5711 = vmatprep.subr.bf16.mxu1 %v8214_v35 }
 0x350   :  { %5220 = vmatpush1.bf16.msra.mxu0 %v8209_v36  ;;  %5712 = vmatpush1.bf16.msra.mxu1 %v8212_v37 }
 0x351   :  { %5221 = vmatprep.subr.bf16.mxu0 %v8217_v38  ;;  %5713 = vmatprep.subr.bf16.mxu1 %v8220_v39 }
 0x354   :  { %5222 = vmatpush1.bf16.msra.mxu0 %v8215_v40  ;;  %5714 = vmatpush1.bf16.msra.mxu1 %v8218_v41 }
 0x355   :  { %5223 = vmatprep.subr.bf16.mxu0 %v8223_v42  ;;  %5715 = vmatprep.subr.bf16.mxu1 %v8226_v43 }
 0x358   :  { %5224 = vmatpush1.bf16.msra.mxu0 %v8221_v44  ;;  %5716 = vmatpush1.bf16.msra.mxu1 %v8224_v45 }
 0x359   :  { %6934 = vmatprep.subr.bf16.mxu0 %v8227_v47  ;;  %6956 = vmatprep.subr.bf16.mxu1 %v8228_v48 }
 0x35b   :  { %5226 = vmatmul.mubr.bf16.vlgmr.msra.gmra.mrb[0].mxu0 %v132_v49  ;;  %5718 = vmatmul.mubr.bf16.vlgmr.msra.gmra.mrb[0].mxu1 %v132_v49 }
 0x35c   :  { %6935 = vmatpush3.bf16.msra.mxu0 %v8229_v50  ;;  %6957 = vmatpush3.bf16.msra.mxu1 %v8230_v51 }
 0x35d   :  { %6936 = vmatprep.subr.bf16.mxu0 %v8231_v52  ;;  %6958 = vmatprep.subr.bf16.mxu1 %v8232_v53 }
 0x360   :  { %6937 = vmatpush3.bf16.msra.mxu0 %v8233_v54  ;;  %6959 = vmatpush3.bf16.msra.mxu1 %v8234_v55  ;;  %v6901_v54 = vld [vmem:[#allocation9] ss:$0 sm:$0xff] }
 0x361   :  { %6938 = vmatprep.subr.bf16.mxu0 %v8235_v56  ;;  %6960 = vmatprep.subr.bf16.mxu1 %v8236_v57 }
 0x364   :  { %6939 = vmatpush3.bf16.msra.mxu0 %v8237_v58  ;;  %6961 = vmatpush3.bf16.msra.mxu1 %v8238_v59 }
 0x365   :  { %6940 = vmatprep.subr.bf16.mxu0 %v8239_v60  ;;  %6962 = vmatprep.subr.bf16.mxu1 %v8240_v61 }
 0x368   :  { %6941 = vmatpush3.bf16.msra.mxu0 %v8241_v62  ;;  %6963 = vmatpush3.bf16.msra.mxu1 %v8242_v63 }
 0x369   :  { %6942 = vmatprep.subr.bf16.mxu0 %v8243_v0  ;;  %6964 = vmatprep.subr.bf16.mxu1 %v8244_v1 }
 0x36c   :  { %6943 = vmatpush3.bf16.msra.mxu0 %v8245_v2  ;;  %6965 = vmatpush3.bf16.msra.mxu1 %v8246_v3 }
 0x36d   :  { %6944 = vmatprep.subr.bf16.mxu0 %v8247_v4  ;;  %6966 = vmatprep.subr.bf16.mxu1 %v8248_v5 }
 0x370   :  { %6945 = vmatpush3.bf16.msra.mxu0 %v8249_v6  ;;  %6967 = vmatpush3.bf16.msra.mxu1 %v8250_v7 }
 0x371   :  { %6946 = vmatprep.subr.bf16.mxu0 %v8251_v8  ;;  %6968 = vmatprep.subr.bf16.mxu1 %v8252_v9 }
 0x374   :  { %6947 = vmatpush3.bf16.msra.mxu0 %v8253_v10  ;;  %6969 = vmatpush3.bf16.msra.mxu1 %v8254_v11 }
 0x375   :  { %6948 = vmatprep.subr.bf16.mxu0 %v8255_v12  ;;  %6970 = vmatprep.subr.bf16.mxu1 %v8256_v13 }
 0x378   :  { %6949 = vmatpush3.bf16.msra.mxu0 %v8257_v14  ;;  %6971 = vmatpush3.bf16.msra.mxu1 %v8258_v15 }
 0x42e   :  { %v5227_v30 = vpop.f32.mrb[0].mxu0  ;;  %v5719_v31 = vpop.f32.mrb[0].mxu1 }
 0x42f   :  { %v5748_v34 = vmul.f32 %v5731_v24, %v5227_v30  ;;  %v5750_v35 = vmul.f32 %v5739_v25, %v5719_v31  ;;  %v5229_v36 = vpop.f32.mrb[1].mxu0  ;;  %v5721_v37 = vpop.f32.mrb[1].mxu1 }
 0x430   :  { %v5749_v38 = vmul.f32 %v5735_v26, %v5229_v36  ;;  %v5751_v39 = vmul.f32 %v5743_v27, %v5721_v37  ;;  %v5231_v40 = vpop.f32.mrb[2].mxu0  ;;  %v5723_v41 = vpop.f32.mrb[2].mxu1 }
 0x431   :  { %v5774_v42 = vadd.f32 %v5757_v28, %v5748_v34  ;;  %v5776_v43 = vadd.f32 %v5765_v29, %v5750_v35  ;;  %v5232_v44 = vpop.f32.mrb[3].mxu0  ;;  %v5724_v45 = vpop.f32.mrb[3].mxu1 }
 0x432   :  { %v5775_v46 = vadd.f32 %v5761_v32, %v5749_v38  ;;  %v5777_v47 = vadd.f32 %v5769_v33, %v5751_v39 }
 0x433   :  { %v5778_v50 = vpack.c.bf16 %v5774_v42, %v5774_v42  ;;  %v5780_v51 = vpack.c.bf16 %v5776_v43, %v5776_v43 }
 0x434   :  { %v5779_v48 = vpack.c.bf16 %v5775_v46, %v5775_v46  ;;  %v5781_v49 = vpack.c.bf16 %v5777_v47, %v5777_v47 }
 0x436   :  { %6077 = vmatprep.mubr.bf16.mxu0 %v5779_v48  ;;  %6117 = vmatprep.mubr.bf16.mxu1 %v5781_v49 }
 0x437   :  { %6078 = vmatmul.mubr.bf16.vlgmr.msra.gmra.mrb[4].mxu0 %v5778_v50  ;;  %6118 = vmatmul.mubr.bf16.vlgmr.msra.gmra.mrb[4].mxu1 %v5780_v51 }
 0x50a   :  { %v6950_v52 = vpop.f32.mrb[4].mxu0  ;;  %v6972_v53 = vpop.f32.mrb[4].mxu1 }
 0x50b   :  { %v6951_v55 = vpop.f32.mrb[5].mxu0  ;;  %v6973_v56 = vpop.f32.mrb[5].mxu1 }
 0x50c   :  { %v6952_v57 = vadd.f32 %v6951_v55, %v6950_v52  ;;  %v6974_v58 = vadd.f32 %v6973_v56, %v6972_v53  ;;  %v6953_v59 = vpop.f32.mrb[6].mxu0  ;;  %v6975_v60 = vpop.f32.mrb[6].mxu1 }
 0x50d   :  { %v6954_v61 = vpop.f32.mrb[7].mxu0  ;;  %v6976_v62 = vpop.f32.mrb[7].mxu1 }
 0x50e   :  { %v6080_v63 = vadd.f32 %v6952_v57, %v6901_v54 }
 0x510   :  { %v6120_v0 = vadd.f32 %v6974_v58, %v6080_v63 }
 0x512   :  { %6125 = vst [vmem:[%s8567_s6] sm:$0xff] %v6120_v0 }
 0x513   :  { %6130 = vsyncpa [#allocation3], 1 }
 0x514   :  { %6131 = vsyncpa [#allocation5], 1 }
 0x515   :  { %6132 = vsyncpa [#allocation8], 1 }

</bundles_post_ra>
